<compile_context>
chip_gen: v6e
topology: v6e:2x2x1
jax: 0.10.0
libtpu: 0.0.40
codegen_flags: <defaults>
</compile_context>

<pallas_src>
import functools

import jax
import jax.numpy as jnp
from jax.experimental import pallas as pl
from jax.experimental.pallas import tpu as pltpu


def _round_up(x, m):
    return ((x + m - 1) // m) * m


# ----------------------------------------------------------------------------
# Fused Pallas kernel: embedding gather + all GRU layers + final Linear
# ----------------------------------------------------------------------------
def make_fused_kernel(num_layers, S, BP, HP, VP):
    """Build the fused kernel body.

    Ref layout (all whole-array VMEM):
      inputs : ids (S*BP, 1) int32 (time-major, batch-padded),
               emb (VP, EP) f32,
               per layer: w_ih_t (Din_pad, 3*HP) bf16, w_hh_t (HP, 3*HP) f32,
                          b_ih (1, 3*HP) f32,        b_hh  (1, 3*HP) f32,
               fc_w_t (HP, OP) f32, fc_b (1, OP) f32
      outputs: out2d (S*BP, HP) f32, h_last (BP, HP) f32, logits (BP, OP) f32
      scratch: x2d (S*BP, EP) f32, gx (S*BP, 3*HP) f32
    Gate g lives in lanes [g*HP, g*HP + H); padded lanes are zero and stay zero.
    """

    def kernel(*refs):
        ids_ref = refs[0]
        emb_ref = refs[1]
        layer_refs = [refs[2 + 4 * l: 2 + 4 * (l + 1)] for l in range(num_layers)]
        w_fc_ref = refs[2 + 4 * num_layers]
        b_fc_ref = refs[3 + 4 * num_layers]
        out2d_ref = refs[4 + 4 * num_layers]
        h_last_ref = refs[5 + 4 * num_layers]
        logits_ref = refs[6 + 4 * num_layers]
        x2d_ref = refs[7 + 4 * num_layers]
        gx_ref = refs[8 + 4 * num_layers]

        R = S * BP

        def sigmoid(v):
            # One EUP (tanh) push instead of exp + divide on the serial chain.
            return 0.5 * jnp.tanh(0.5 * v) + 0.5

        # --- Fused embedding gather: exact one-hot selection on the MXU ------
        ids = ids_ref[...]                                          # (R, 1) i32
        iota = jax.lax.broadcasted_iota(jnp.int32, (R, VP), 1)      # (R, VP)
        onehot = (ids == iota).astype(jnp.float32)                  # exact 0/1
        x2d_ref[...] = jnp.dot(onehot, emb_ref[...],
                               preferred_element_type=jnp.float32)  # (R, EP)

        h = jnp.zeros((BP, HP), jnp.float32)
        for l in range(num_layers):
            w_ih_t_ref, w_hh_t_ref, b_ih_ref, b_hh_ref = layer_refs[l]

            # Layer input: flattened time-major activations.  Layer 0 reads the
            # gathered embeddings; deeper layers read the previous layer's
            # output, still resident in VMEM (out2d_ref doubles as the
            # inter-layer buffer).
            in2d = x2d_ref[...] if l == 0 else out2d_ref[...]

            # Hoisted input projection (bf16 operands, f32 accumulate): ONE
            # matmul per layer, off the serial recurrence chain.  b_ih folded.
            gx_ref[...] = (
                jnp.dot(in2d.astype(jnp.bfloat16), w_ih_t_ref[...],
                        preferred_element_type=jnp.float32)
                + b_ih_ref[...]
            )

            # Time recurrence: h carried in vregs, loop fully unrolled,
            # static 8-sublane-aligned offsets, 128-lane-aligned gate slices.
            h = jnp.zeros((BP, HP), jnp.float32)
            for t in range(S):
                gx_t = gx_ref[pl.ds(t * BP, BP), :]                 # (BP, 3*HP)
                gh = (
                    jnp.dot(h, w_hh_t_ref[...],
                            preferred_element_type=jnp.float32)
                    + b_hh_ref[...]
                )                                                   # (BP, 3*HP)
                # PyTorch GRU gate order: reset, update, new.
                # r and z fused into ONE EUP push over the first 2*HP lanes.
                rz = sigmoid(gx_t[:, 0:2 * HP] + gh[:, 0:2 * HP])
                r = rz[:, 0:HP]
                z = rz[:, HP:2 * HP]
                n = jnp.tanh(gx_t[:, 2 * HP:3 * HP] + r * gh[:, 2 * HP:3 * HP])
                h = (1.0 - z) * n + z * h
                out2d_ref[pl.ds(t * BP, BP), :] = h

        # Epilogue: final hidden state + fused Linear (logits).
        h_last_ref[...] = h
        logits_ref[...] = (
            jnp.dot(h, w_fc_ref[...], preferred_element_type=jnp.float32)
            + b_fc_ref[...]
        )

    return kernel


# ----------------------------------------------------------------------------
# One-time parameter preparation (pre-transpose + padding, outside jit)
# ----------------------------------------------------------------------------
def prepare_params(params, num_layers, hidden_dim, output_size):
    H = hidden_dim
    HP = _round_up(H, 128)
    O = output_size
    OP = _round_up(O, 128)
    dic_size, E = params["embedding"].shape
    EP = _round_up(E, 128)
    VP = _round_up(dic_size, 128)

    emb_p = jnp.zeros((VP, EP), jnp.float32).at[:dic_size, :E].set(
        params["embedding"].astype(jnp.float32))
    prepped = {"embedding": emb_p}

    for l in range(num_layers):
        w_ih = params[f"w_ih_l{l}"].astype(jnp.float32)   # (3H, Din)
        w_hh = params[f"w_hh_l{l}"].astype(jnp.float32)   # (3H, H)
        b_ih = params[f"b_ih_l{l}"].astype(jnp.float32)   # (3H,)
        b_hh = params[f"b_hh_l{l}"].astype(jnp.float32)   # (3H,)
        Din = w_ih.shape[1]
        Din_pad = EP if l == 0 else HP                    # padded contracting dim

        w_ih_t = jnp.zeros((Din_pad, 3 * HP), jnp.float32)
        w_hh_t = jnp.zeros((HP, 3 * HP), jnp.float32)
        b_ih_p = jnp.zeros((1, 3 * HP), jnp.float32)
        b_hh_p = jnp.zeros((1, 3 * HP), jnp.float32)
        for g in range(3):
            w_ih_t = w_ih_t.at[:Din, g * HP:g * HP + H].set(
                w_ih[g * H:(g + 1) * H, :].T)
            w_hh_t = w_hh_t.at[:H, g * HP:g * HP + H].set(
                w_hh[g * H:(g + 1) * H, :].T)
            b_ih_p = b_ih_p.at[0, g * HP:g * HP + H].set(b_ih[g * H:(g + 1) * H])
            b_hh_p = b_hh_p.at[0, g * HP:g * HP + H].set(b_hh[g * H:(g + 1) * H])

        # bf16 only on the hoisted projection weight (off the serial chain);
        # recurrent weights stay f32 so error does not compound over timesteps.
        prepped[f"w_ih_t_l{l}"] = w_ih_t.astype(jnp.bfloat16)
        prepped[f"w_hh_t_l{l}"] = w_hh_t
        prepped[f"b_ih_l{l}"] = b_ih_p
        prepped[f"b_hh_l{l}"] = b_hh_p

    w_fc_t = jnp.zeros((HP, OP), jnp.float32).at[:H, :O].set(
        params["fc2_w"].astype(jnp.float32).T)
    b_fc_p = jnp.zeros((1, OP), jnp.float32).at[0, :O].set(
        params["fc2_b"].astype(jnp.float32))
    prepped["fc_w_t"] = w_fc_t
    prepped["fc_b"] = b_fc_p
    return prepped


# ----------------------------------------------------------------------------
# Jitted forward: one fused pallas_call (+ cheap host-side unpad/reshape)
# ----------------------------------------------------------------------------
@functools.partial(jax.jit,
                   static_argnames=("num_layers", "hidden_dim", "output_size"))
def single_encoder_text_forward(prepped, x_ids, lengths,
                                num_layers, hidden_dim, output_size):
    del lengths  # PyTorch module only uses it for batch_size (no packing)
    H = hidden_dim
    HP = _round_up(H, 128)
    O = output_size
    OP = _round_up(O, 128)

    B, S = x_ids.shape
    BP = _round_up(B, 8)                 # sublane padding: full (8,128) tiles
    VP, EP = prepped["embedding"].shape

    # Time-major ids, batch padded to BP (pad rows read token 0; sliced off).
    ids_tm = jnp.zeros((S, BP), jnp.int32).at[:, :B].set(
        jnp.transpose(x_ids, (1, 0)).astype(jnp.int32))
    ids_col = ids_tm.reshape(S * BP, 1)

    inputs = [ids_col, prepped["embedding"]]
    for l in range(num_layers):
        inputs += [prepped[f"w_ih_t_l{l}"], prepped[f"w_hh_t_l{l}"],
                   prepped[f"b_ih_l{l}"], prepped[f"b_hh_l{l}"]]
    inputs += [prepped["fc_w_t"], prepped["fc_b"]]

    vmem = pl.BlockSpec(memory_space=pltpu.MemorySpace.VMEM)
    out2d, h_last_p, logits_p = pl.pallas_call(
        make_fused_kernel(num_layers, S, BP, HP, VP),
        out_shape=(
            jax.ShapeDtypeStruct((S * BP, HP), jnp.float32),
            jax.ShapeDtypeStruct((BP, HP), jnp.float32),
            jax.ShapeDtypeStruct((BP, OP), jnp.float32),
        ),
        in_specs=[vmem] * len(inputs),
        out_specs=(vmem, vmem, vmem),
        scratch_shapes=[pltpu.VMEM((S * BP, EP), jnp.float32),
                        pltpu.VMEM((S * BP, 3 * HP), jnp.float32)],
        compiler_params=pltpu.CompilerParams(
            vmem_limit_bytes=32 * 1024 * 1024),   # headroom on v5e's 16 MiB default
    )(*inputs)

    output = jnp.transpose(out2d.reshape(S, BP, HP)[:, :B, :H], (1, 0, 2))  # (B,S,H)
    last_hidden = h_last_p[:B, :H]
    logits = logits_p[:B, :O]
    return output, logits, last_hidden


# ----------------------------------------------------------------------------
# Pure-JAX reference (for correctness check)
# ----------------------------------------------------------------------------
def reference_forward(params, x_ids, num_layers):
    emb = params["embedding"][x_ids]
    B, S, _ = emb.shape
    layer_in = emb
    last_hidden = None
    for l in range(num_layers):
        H = params[f"w_hh_l{l}"].shape[1]
        w_ih, w_hh = params[f"w_ih_l{l}"], params[f"w_hh_l{l}"]
        b_ih, b_hh = params[f"b_ih_l{l}"], params[f"b_hh_l{l}"]
        h = jnp.zeros((B, H), jnp.float32)
        outs = []
        for t in range(S):
            x_t = layer_in[:, t, :]
            gx = x_t @ w_ih.T + b_ih
            gh = h @ w_hh.T + b_hh
            r = jax.nn.sigmoid(gx[:, :H] + gh[:, :H])
            z = jax.nn.sigmoid(gx[:, H:2 * H] + gh[:, H:2 * H])
            n = jnp.tanh(gx[:, 2 * H:] + r * gh[:, 2 * H:])
            h = (1.0 - z) * n + z * h
            outs.append(h)
        layer_in = jnp.stack(outs, axis=1)
        last_hidden = h
    logits = last_hidden @ params["fc2_w"].T + params["fc2_b"]
    return layer_in, logits, last_hidden


# ----------------------------------------------------------------------------
# Parameter construction (deterministic, synthetic)
# ----------------------------------------------------------------------------
def init_params(key, dic_size, embed_dim, hidden_dim, num_layers, output_size):
    params = {}
    keys = jax.random.split(key, 2 + 4 * num_layers + 2)
    k = iter(keys)
    params["embedding"] = jax.random.normal(next(k), (dic_size, embed_dim),
                                            jnp.float32) * 0.1
    for l in range(num_layers):
        in_dim = embed_dim if l == 0 else hidden_dim
        s = 1.0 / jnp.sqrt(hidden_dim)
        params[f"w_ih_l{l}"] = jax.random.uniform(
            next(k), (3 * hidden_dim, in_dim), jnp.float32, -s, s)
        params[f"w_hh_l{l}"] = jax.random.uniform(
            next(k), (3 * hidden_dim, hidden_dim), jnp.float32, -s, s)
        params[f"b_ih_l{l}"] = jax.random.uniform(
            next(k), (3 * hidden_dim,), jnp.float32, -s, s)
        params[f"b_hh_l{l}"] = jax.random.uniform(
            next(k), (3 * hidden_dim,), jnp.float32, -s, s)
    s = 1.0 / jnp.sqrt(hidden_dim)
    params["fc2_w"] = jax.random.uniform(next(k), (output_size, hidden_dim),
                                         jnp.float32, -s, s)
    params["fc2_b"] = jax.random.uniform(next(k), (output_size,),
                                         jnp.float32, -s, s)
    return params


# ----------------------------------------------------------------------------
if __name__ == "__main__":
    # Small, module-consistent shapes.
    DIC_SIZE = 50          # vocabulary size
    EMBED_DIM = 300        # use_glove=True -> 300
    HIDDEN_DIM = 32
    NUM_LAYERS = 2
    OUTPUT_SIZE = 4
    B, S = 2, 8

    key = jax.random.PRNGKey(0)
    k_param, k_x, k_len = jax.random.split(key, 3)

    params = init_params(k_param, DIC_SIZE, EMBED_DIM, HIDDEN_DIM,
                         NUM_LAYERS, OUTPUT_SIZE)
    prepped = prepare_params(params, NUM_LAYERS, HIDDEN_DIM, OUTPUT_SIZE)

    x_ids = jax.random.randint(k_x, (B, S), 0, DIC_SIZE, jnp.int32)
    lengths = jnp.full((B,), S, jnp.int32)

    output, logits, last_hidden = single_encoder_text_forward(
        prepped, x_ids, lengths, NUM_LAYERS, HIDDEN_DIM, OUTPUT_SIZE)
    jax.block_until_ready((output, logits, last_hidden))

    # Correctness check against a pure-f32 JAX reference.  The fused kernel
    # runs the hoisted input projections with bf16 operands (f32 accumulate),
    # so tolerances reflect bf16 operand rounding propagated through S steps.
    ref_out, ref_logits, ref_h = reference_forward(params, x_ids, NUM_LAYERS)
    assert output.shape == (B, S, HIDDEN_DIM)
    assert logits.shape == (B, OUTPUT_SIZE)
    assert last_hidden.shape == (B, HIDDEN_DIM)
    assert jnp.allclose(output, ref_out, rtol=2e-2, atol=2e-2)
    assert jnp.allclose(logits, ref_logits, rtol=2e-2, atol=2e-2)
    assert jnp.allclose(last_hidden, ref_h, rtol=2e-2, atol=2e-2)

    print("KERNEL_OK")
</pallas_src>

<mosaic_0001>
module attributes {stable_mosaic.version = 11 : i64} {
  func.func @kernel(%arg0: memref<64x1xi32, #tpu.memory_space<vmem>>, %arg1: memref<128x384xf32, #tpu.memory_space<vmem>>, %arg2: memref<384x384xbf16, #tpu.memory_space<vmem>>, %arg3: memref<128x384xf32, #tpu.memory_space<vmem>>, %arg4: memref<1x384xf32, #tpu.memory_space<vmem>>, %arg5: memref<1x384xf32, #tpu.memory_space<vmem>>, %arg6: memref<128x384xbf16, #tpu.memory_space<vmem>>, %arg7: memref<128x384xf32, #tpu.memory_space<vmem>>, %arg8: memref<1x384xf32, #tpu.memory_space<vmem>>, %arg9: memref<1x384xf32, #tpu.memory_space<vmem>>, %arg10: memref<128x128xf32, #tpu.memory_space<vmem>>, %arg11: memref<1x128xf32, #tpu.memory_space<vmem>>, %arg12: memref<64x128xf32, #tpu.memory_space<vmem>>, %arg13: memref<8x128xf32, #tpu.memory_space<vmem>>, %arg14: memref<8x128xf32, #tpu.memory_space<vmem>>, %arg15: memref<64x384xf32, #tpu.memory_space<vmem>>, %arg16: memref<64x384xf32, #tpu.memory_space<vmem>>) attributes {dimension_semantics = [], scalar_prefetch = 0 : i64, scratch_operands = 2 : i64, tpu.core_type = #tpu.core_type<tc>} {
    %c0 = arith.constant 0 : index
    %c0_0 = arith.constant 0 : index
    %0 = vector.load %arg0[%c0, %c0_0] : memref<64x1xi32, #tpu.memory_space<vmem>>, vector<64x1xi32>
    %1 = tpu.iota {dimensions = array<i32: 1>} : vector<64x128xi32>
    %2 = vector.broadcast %0 : vector<64x1xi32> to vector<64x128xi32>
    %3 = arith.cmpi eq, %2, %1 : vector<64x128xi32>
    %4 = arith.extui %3 : vector<64x128xi1> to vector<64x128xi32>
    %5 = arith.sitofp %4 : vector<64x128xi32> to vector<64x128xf32>
    %c0_1 = arith.constant 0 : index
    %c0_2 = arith.constant 0 : index
    %6 = vector.load %arg1[%c0_1, %c0_2] : memref<128x384xf32, #tpu.memory_space<vmem>>, vector<128x384xf32>
    %cst = arith.constant dense<0.000000e+00> : vector<64x384xf32>
    %7 = tpu.matmul %5, %6, %cst {dimension_numbers = #tpu.dot_dimension_numbers<[1], [0], [0], [1], [0, 0, 1, 1], [], []>} : vector<64x128xf32>, vector<128x384xf32>, vector<64x384xf32> -> vector<64x384xf32>
    %c0_3 = arith.constant 0 : index
    %c0_4 = arith.constant 0 : index
    %8 = vector.load %arg15[%c0_3, %c0_4] : memref<64x384xf32, #tpu.memory_space<vmem>>, vector<64x384xf32>
    tpu.vector_store %arg15[%c0_3, %c0_4], %7 {strides = array<i32>} : memref<64x384xf32, #tpu.memory_space<vmem>>, vector<64x384xf32>,
    %c0_5 = arith.constant 0 : index
    %c0_6 = arith.constant 0 : index
    %9 = vector.load %arg15[%c0_5, %c0_6] : memref<64x384xf32, #tpu.memory_space<vmem>>, vector<64x384xf32>
    %10 = arith.truncf %9 : vector<64x384xf32> to vector<64x384xbf16>
    %c0_7 = arith.constant 0 : index
    %c0_8 = arith.constant 0 : index
    %11 = vector.load %arg2[%c0_7, %c0_8] : memref<384x384xbf16, #tpu.memory_space<vmem>>, vector<384x384xbf16>
    %cst_9 = arith.constant dense<0.000000e+00> : vector<64x384xf32>
    %12 = tpu.matmul %10, %11, %cst_9 {dimension_numbers = #tpu.dot_dimension_numbers<[1], [0], [0], [1], [0, 0, 1, 1], [], []>} : vector<64x384xbf16>, vector<384x384xbf16>, vector<64x384xf32> -> vector<64x384xf32>
    %c0_10 = arith.constant 0 : index
    %c0_11 = arith.constant 0 : index
    %13 = vector.load %arg4[%c0_10, %c0_11] : memref<1x384xf32, #tpu.memory_space<vmem>>, vector<1x384xf32>
    %14 = vector.broadcast %13 : vector<1x384xf32> to vector<64x384xf32>
    %15 = arith.addf %12, %14 : vector<64x384xf32>
    %c0_12 = arith.constant 0 : index
    %c0_13 = arith.constant 0 : index
    %16 = vector.load %arg16[%c0_12, %c0_13] : memref<64x384xf32, #tpu.memory_space<vmem>>, vector<64x384xf32>
    tpu.vector_store %arg16[%c0_12, %c0_13], %15 {strides = array<i32>} : memref<64x384xf32, #tpu.memory_space<vmem>>, vector<64x384xf32>,
    %cst_14 = arith.constant 0.000000e+00 : f32
    %17 = vector.broadcast %cst_14 : f32 to vector<8x128xf32>
    %c0_15 = arith.constant 0 : index
    %c0_16 = arith.constant 0 : index
    %18 = vector.load %arg16[%c0_15, %c0_16] : memref<64x384xf32, #tpu.memory_space<vmem>>, vector<8x384xf32>
    %c0_17 = arith.constant 0 : index
    %c0_18 = arith.constant 0 : index
    %19 = vector.load %arg3[%c0_17, %c0_18] : memref<128x384xf32, #tpu.memory_space<vmem>>, vector<128x384xf32>
    %cst_19 = arith.constant dense<0.000000e+00> : vector<8x384xf32>
    %20 = tpu.matmul %17, %19, %cst_19 {dimension_numbers = #tpu.dot_dimension_numbers<[1], [0], [0], [1], [0, 0, 1, 1], [], []>} : vector<8x128xf32>, vector<128x384xf32>, vector<8x384xf32> -> vector<8x384xf32>
    %c0_20 = arith.constant 0 : index
    %c0_21 = arith.constant 0 : index
    %21 = vector.load %arg5[%c0_20, %c0_21] : memref<1x384xf32, #tpu.memory_space<vmem>>, vector<1x384xf32>
    %22 = vector.broadcast %21 : vector<1x384xf32> to vector<8x384xf32>
    %23 = arith.addf %20, %22 : vector<8x384xf32>
    %24 = vector.extract_strided_slice %18 {offsets = [0, 0], sizes = [8, 256], strides = [1, 1]} : vector<8x384xf32> to vector<8x256xf32>
    %25 = vector.extract_strided_slice %23 {offsets = [0, 0], sizes = [8, 256], strides = [1, 1]} : vector<8x384xf32> to vector<8x256xf32>
    %26 = arith.addf %24, %25 : vector<8x256xf32>
    %cst_22 = arith.constant 5.000000e-01 : f32
    %27 = vector.broadcast %cst_22 : f32 to vector<8x256xf32>
    %28 = arith.mulf %27, %26 : vector<8x256xf32>
    %29 = math.tanh %28 : vector<8x256xf32>
    %cst_23 = arith.constant 5.000000e-01 : f32
    %30 = vector.broadcast %cst_23 : f32 to vector<8x256xf32>
    %31 = arith.mulf %30, %29 : vector<8x256xf32>
    %cst_24 = arith.constant 5.000000e-01 : f32
    %32 = vector.broadcast %cst_24 : f32 to vector<8x256xf32>
    %33 = arith.addf %31, %32 : vector<8x256xf32>
    %34 = vector.extract_strided_slice %33 {offsets = [0, 0], sizes = [8, 128], strides = [1, 1]} : vector<8x256xf32> to vector<8x128xf32>
    %35 = vector.extract_strided_slice %33 {offsets = [0, 128], sizes = [8, 128], strides = [1, 1]} : vector<8x256xf32> to vector<8x128xf32>
    %36 = vector.extract_strided_slice %18 {offsets = [0, 256], sizes = [8, 128], strides = [1, 1]} : vector<8x384xf32> to vector<8x128xf32>
    %37 = vector.extract_strided_slice %23 {offsets = [0, 256], sizes = [8, 128], strides = [1, 1]} : vector<8x384xf32> to vector<8x128xf32>
    %38 = arith.mulf %34, %37 : vector<8x128xf32>
    %39 = arith.addf %36, %38 : vector<8x128xf32>
    %40 = math.tanh %39 : vector<8x128xf32>
    %cst_25 = arith.constant 1.000000e+00 : f32
    %41 = vector.broadcast %cst_25 : f32 to vector<8x128xf32>
    %42 = arith.subf %41, %35 : vector<8x128xf32>
    %43 = arith.mulf %42, %40 : vector<8x128xf32>
    %44 = arith.mulf %35, %17 : vector<8x128xf32>
    %45 = arith.addf %43, %44 : vector<8x128xf32>
    %c0_26 = arith.constant 0 : index
    %c0_27 = arith.constant 0 : index
    %46 = vector.load %arg12[%c0_26, %c0_27] : memref<64x128xf32, #tpu.memory_space<vmem>>, vector<8x128xf32>
    tpu.vector_store %arg12[%c0_26, %c0_27], %45 {strides = array<i32>} : memref<64x128xf32, #tpu.memory_space<vmem>>, vector<8x128xf32>,
    %c8 = arith.constant 8 : index
    %c0_28 = arith.constant 0 : index
    %47 = vector.load %arg16[%c8, %c0_28] : memref<64x384xf32, #tpu.memory_space<vmem>>, vector<8x384xf32>
    %c0_29 = arith.constant 0 : index
    %c0_30 = arith.constant 0 : index
    %48 = vector.load %arg3[%c0_29, %c0_30] : memref<128x384xf32, #tpu.memory_space<vmem>>, vector<128x384xf32>
    %cst_31 = arith.constant dense<0.000000e+00> : vector<8x384xf32>
    %49 = tpu.matmul %45, %48, %cst_31 {dimension_numbers = #tpu.dot_dimension_numbers<[1], [0], [0], [1], [0, 0, 1, 1], [], []>} : vector<8x128xf32>, vector<128x384xf32>, vector<8x384xf32> -> vector<8x384xf32>
    %c0_32 = arith.constant 0 : index
    %c0_33 = arith.constant 0 : index
    %50 = vector.load %arg5[%c0_32, %c0_33] : memref<1x384xf32, #tpu.memory_space<vmem>>, vector<1x384xf32>
    %51 = vector.broadcast %50 : vector<1x384xf32> to vector<8x384xf32>
    %52 = arith.addf %49, %51 : vector<8x384xf32>
    %53 = vector.extract_strided_slice %47 {offsets = [0, 0], sizes = [8, 256], strides = [1, 1]} : vector<8x384xf32> to vector<8x256xf32>
    %54 = vector.extract_strided_slice %52 {offsets = [0, 0], sizes = [8, 256], strides = [1, 1]} : vector<8x384xf32> to vector<8x256xf32>
    %55 = arith.addf %53, %54 : vector<8x256xf32>
    %cst_34 = arith.constant 5.000000e-01 : f32
    %56 = vector.broadcast %cst_34 : f32 to vector<8x256xf32>
    %57 = arith.mulf %56, %55 : vector<8x256xf32>
    %58 = math.tanh %57 : vector<8x256xf32>
    %cst_35 = arith.constant 5.000000e-01 : f32
    %59 = vector.broadcast %cst_35 : f32 to vector<8x256xf32>
    %60 = arith.mulf %59, %58 : vector<8x256xf32>
    %cst_36 = arith.constant 5.000000e-01 : f32
    %61 = vector.broadcast %cst_36 : f32 to vector<8x256xf32>
    %62 = arith.addf %60, %61 : vector<8x256xf32>
    %63 = vector.extract_strided_slice %62 {offsets = [0, 0], sizes = [8, 128], strides = [1, 1]} : vector<8x256xf32> to vector<8x128xf32>
    %64 = vector.extract_strided_slice %62 {offsets = [0, 128], sizes = [8, 128], strides = [1, 1]} : vector<8x256xf32> to vector<8x128xf32>
    %65 = vector.extract_strided_slice %47 {offsets = [0, 256], sizes = [8, 128], strides = [1, 1]} : vector<8x384xf32> to vector<8x128xf32>
    %66 = vector.extract_strided_slice %52 {offsets = [0, 256], sizes = [8, 128], strides = [1, 1]} : vector<8x384xf32> to vector<8x128xf32>
    %67 = arith.mulf %63, %66 : vector<8x128xf32>
    %68 = arith.addf %65, %67 : vector<8x128xf32>
    %69 = math.tanh %68 : vector<8x128xf32>
    %cst_37 = arith.constant 1.000000e+00 : f32
    %70 = vector.broadcast %cst_37 : f32 to vector<8x128xf32>
    %71 = arith.subf %70, %64 : vector<8x128xf32>
    %72 = arith.mulf %71, %69 : vector<8x128xf32>
    %73 = arith.mulf %64, %45 : vector<8x128xf32>
    %74 = arith.addf %72, %73 : vector<8x128xf32>
    %c8_38 = arith.constant 8 : index
    %c0_39 = arith.constant 0 : index
    %75 = vector.load %arg12[%c8_38, %c0_39] : memref<64x128xf32, #tpu.memory_space<vmem>>, vector<8x128xf32>
    tpu.vector_store %arg12[%c8_38, %c0_39], %74 {strides = array<i32>} : memref<64x128xf32, #tpu.memory_space<vmem>>, vector<8x128xf32>,
    %c16 = arith.constant 16 : index
    %c0_40 = arith.constant 0 : index
    %76 = vector.load %arg16[%c16, %c0_40] : memref<64x384xf32, #tpu.memory_space<vmem>>, vector<8x384xf32>
    %c0_41 = arith.constant 0 : index
    %c0_42 = arith.constant 0 : index
    %77 = vector.load %arg3[%c0_41, %c0_42] : memref<128x384xf32, #tpu.memory_space<vmem>>, vector<128x384xf32>
    %cst_43 = arith.constant dense<0.000000e+00> : vector<8x384xf32>
    %78 = tpu.matmul %74, %77, %cst_43 {dimension_numbers = #tpu.dot_dimension_numbers<[1], [0], [0], [1], [0, 0, 1, 1], [], []>} : vector<8x128xf32>, vector<128x384xf32>, vector<8x384xf32> -> vector<8x384xf32>
    %c0_44 = arith.constant 0 : index
    %c0_45 = arith.constant 0 : index
    %79 = vector.load %arg5[%c0_44, %c0_45] : memref<1x384xf32, #tpu.memory_space<vmem>>, vector<1x384xf32>
    %80 = vector.broadcast %79 : vector<1x384xf32> to vector<8x384xf32>
    %81 = arith.addf %78, %80 : vector<8x384xf32>
    %82 = vector.extract_strided_slice %76 {offsets = [0, 0], sizes = [8, 256], strides = [1, 1]} : vector<8x384xf32> to vector<8x256xf32>
    %83 = vector.extract_strided_slice %81 {offsets = [0, 0], sizes = [8, 256], strides = [1, 1]} : vector<8x384xf32> to vector<8x256xf32>
    %84 = arith.addf %82, %83 : vector<8x256xf32>
    %cst_46 = arith.constant 5.000000e-01 : f32
    %85 = vector.broadcast %cst_46 : f32 to vector<8x256xf32>
    %86 = arith.mulf %85, %84 : vector<8x256xf32>
    %87 = math.tanh %86 : vector<8x256xf32>
    %cst_47 = arith.constant 5.000000e-01 : f32
    %88 = vector.broadcast %cst_47 : f32 to vector<8x256xf32>
    %89 = arith.mulf %88, %87 : vector<8x256xf32>
    %cst_48 = arith.constant 5.000000e-01 : f32
    %90 = vector.broadcast %cst_48 : f32 to vector<8x256xf32>
    %91 = arith.addf %89, %90 : vector<8x256xf32>
    %92 = vector.extract_strided_slice %91 {offsets = [0, 0], sizes = [8, 128], strides = [1, 1]} : vector<8x256xf32> to vector<8x128xf32>
    %93 = vector.extract_strided_slice %91 {offsets = [0, 128], sizes = [8, 128], strides = [1, 1]} : vector<8x256xf32> to vector<8x128xf32>
    %94 = vector.extract_strided_slice %76 {offsets = [0, 256], sizes = [8, 128], strides = [1, 1]} : vector<8x384xf32> to vector<8x128xf32>
    %95 = vector.extract_strided_slice %81 {offsets = [0, 256], sizes = [8, 128], strides = [1, 1]} : vector<8x384xf32> to vector<8x128xf32>
    %96 = arith.mulf %92, %95 : vector<8x128xf32>
    %97 = arith.addf %94, %96 : vector<8x128xf32>
    %98 = math.tanh %97 : vector<8x128xf32>
    %cst_49 = arith.constant 1.000000e+00 : f32
    %99 = vector.broadcast %cst_49 : f32 to vector<8x128xf32>
    %100 = arith.subf %99, %93 : vector<8x128xf32>
    %101 = arith.mulf %100, %98 : vector<8x128xf32>
    %102 = arith.mulf %93, %74 : vector<8x128xf32>
    %103 = arith.addf %101, %102 : vector<8x128xf32>
    %c16_50 = arith.constant 16 : index
    %c0_51 = arith.constant 0 : index
    %104 = vector.load %arg12[%c16_50, %c0_51] : memref<64x128xf32, #tpu.memory_space<vmem>>, vector<8x128xf32>
    tpu.vector_store %arg12[%c16_50, %c0_51], %103 {strides = array<i32>} : memref<64x128xf32, #tpu.memory_space<vmem>>, vector<8x128xf32>,
    %c24 = arith.constant 24 : index
    %c0_52 = arith.constant 0 : index
    %105 = vector.load %arg16[%c24, %c0_52] : memref<64x384xf32, #tpu.memory_space<vmem>>, vector<8x384xf32>
    %c0_53 = arith.constant 0 : index
    %c0_54 = arith.constant 0 : index
    %106 = vector.load %arg3[%c0_53, %c0_54] : memref<128x384xf32, #tpu.memory_space<vmem>>, vector<128x384xf32>
    %cst_55 = arith.constant dense<0.000000e+00> : vector<8x384xf32>
    %107 = tpu.matmul %103, %106, %cst_55 {dimension_numbers = #tpu.dot_dimension_numbers<[1], [0], [0], [1], [0, 0, 1, 1], [], []>} : vector<8x128xf32>, vector<128x384xf32>, vector<8x384xf32> -> vector<8x384xf32>
    %c0_56 = arith.constant 0 : index
    %c0_57 = arith.constant 0 : index
    %108 = vector.load %arg5[%c0_56, %c0_57] : memref<1x384xf32, #tpu.memory_space<vmem>>, vector<1x384xf32>
    %109 = vector.broadcast %108 : vector<1x384xf32> to vector<8x384xf32>
    %110 = arith.addf %107, %109 : vector<8x384xf32>
    %111 = vector.extract_strided_slice %105 {offsets = [0, 0], sizes = [8, 256], strides = [1, 1]} : vector<8x384xf32> to vector<8x256xf32>
    %112 = vector.extract_strided_slice %110 {offsets = [0, 0], sizes = [8, 256], strides = [1, 1]} : vector<8x384xf32> to vector<8x256xf32>
    %113 = arith.addf %111, %112 : vector<8x256xf32>
    %cst_58 = arith.constant 5.000000e-01 : f32
    %114 = vector.broadcast %cst_58 : f32 to vector<8x256xf32>
    %115 = arith.mulf %114, %113 : vector<8x256xf32>
    %116 = math.tanh %115 : vector<8x256xf32>
    %cst_59 = arith.constant 5.000000e-01 : f32
    %117 = vector.broadcast %cst_59 : f32 to vector<8x256xf32>
    %118 = arith.mulf %117, %116 : vector<8x256xf32>
    %cst_60 = arith.constant 5.000000e-01 : f32
    %119 = vector.broadcast %cst_60 : f32 to vector<8x256xf32>
    %120 = arith.addf %118, %119 : vector<8x256xf32>
    %121 = vector.extract_strided_slice %120 {offsets = [0, 0], sizes = [8, 128], strides = [1, 1]} : vector<8x256xf32> to vector<8x128xf32>
    %122 = vector.extract_strided_slice %120 {offsets = [0, 128], sizes = [8, 128], strides = [1, 1]} : vector<8x256xf32> to vector<8x128xf32>
    %123 = vector.extract_strided_slice %105 {offsets = [0, 256], sizes = [8, 128], strides = [1, 1]} : vector<8x384xf32> to vector<8x128xf32>
    %124 = vector.extract_strided_slice %110 {offsets = [0, 256], sizes = [8, 128], strides = [1, 1]} : vector<8x384xf32> to vector<8x128xf32>
    %125 = arith.mulf %121, %124 : vector<8x128xf32>
    %126 = arith.addf %123, %125 : vector<8x128xf32>
    %127 = math.tanh %126 : vector<8x128xf32>
    %cst_61 = arith.constant 1.000000e+00 : f32
    %128 = vector.broadcast %cst_61 : f32 to vector<8x128xf32>
    %129 = arith.subf %128, %122 : vector<8x128xf32>
    %130 = arith.mulf %129, %127 : vector<8x128xf32>
    %131 = arith.mulf %122, %103 : vector<8x128xf32>
    %132 = arith.addf %130, %131 : vector<8x128xf32>
    %c24_62 = arith.constant 24 : index
    %c0_63 = arith.constant 0 : index
    %133 = vector.load %arg12[%c24_62, %c0_63] : memref<64x128xf32, #tpu.memory_space<vmem>>, vector<8x128xf32>
    tpu.vector_store %arg12[%c24_62, %c0_63], %132 {strides = array<i32>} : memref<64x128xf32, #tpu.memory_space<vmem>>, vector<8x128xf32>,
    %c32 = arith.constant 32 : index
    %c0_64 = arith.constant 0 : index
    %134 = vector.load %arg16[%c32, %c0_64] : memref<64x384xf32, #tpu.memory_space<vmem>>, vector<8x384xf32>
    %c0_65 = arith.constant 0 : index
    %c0_66 = arith.constant 0 : index
    %135 = vector.load %arg3[%c0_65, %c0_66] : memref<128x384xf32, #tpu.memory_space<vmem>>, vector<128x384xf32>
    %cst_67 = arith.constant dense<0.000000e+00> : vector<8x384xf32>
    %136 = tpu.matmul %132, %135, %cst_67 {dimension_numbers = #tpu.dot_dimension_numbers<[1], [0], [0], [1], [0, 0, 1, 1], [], []>} : vector<8x128xf32>, vector<128x384xf32>, vector<8x384xf32> -> vector<8x384xf32>
    %c0_68 = arith.constant 0 : index
    %c0_69 = arith.constant 0 : index
    %137 = vector.load %arg5[%c0_68, %c0_69] : memref<1x384xf32, #tpu.memory_space<vmem>>, vector<1x384xf32>
    %138 = vector.broadcast %137 : vector<1x384xf32> to vector<8x384xf32>
    %139 = arith.addf %136, %138 : vector<8x384xf32>
    %140 = vector.extract_strided_slice %134 {offsets = [0, 0], sizes = [8, 256], strides = [1, 1]} : vector<8x384xf32> to vector<8x256xf32>
    %141 = vector.extract_strided_slice %139 {offsets = [0, 0], sizes = [8, 256], strides = [1, 1]} : vector<8x384xf32> to vector<8x256xf32>
    %142 = arith.addf %140, %141 : vector<8x256xf32>
    %cst_70 = arith.constant 5.000000e-01 : f32
    %143 = vector.broadcast %cst_70 : f32 to vector<8x256xf32>
    %144 = arith.mulf %143, %142 : vector<8x256xf32>
    %145 = math.tanh %144 : vector<8x256xf32>
    %cst_71 = arith.constant 5.000000e-01 : f32
    %146 = vector.broadcast %cst_71 : f32 to vector<8x256xf32>
    %147 = arith.mulf %146, %145 : vector<8x256xf32>
    %cst_72 = arith.constant 5.000000e-01 : f32
    %148 = vector.broadcast %cst_72 : f32 to vector<8x256xf32>
    %149 = arith.addf %147, %148 : vector<8x256xf32>
    %150 = vector.extract_strided_slice %149 {offsets = [0, 0], sizes = [8, 128], strides = [1, 1]} : vector<8x256xf32> to vector<8x128xf32>
    %151 = vector.extract_strided_slice %149 {offsets = [0, 128], sizes = [8, 128], strides = [1, 1]} : vector<8x256xf32> to vector<8x128xf32>
    %152 = vector.extract_strided_slice %134 {offsets = [0, 256], sizes = [8, 128], strides = [1, 1]} : vector<8x384xf32> to vector<8x128xf32>
    %153 = vector.extract_strided_slice %139 {offsets = [0, 256], sizes = [8, 128], strides = [1, 1]} : vector<8x384xf32> to vector<8x128xf32>
    %154 = arith.mulf %150, %153 : vector<8x128xf32>
    %155 = arith.addf %152, %154 : vector<8x128xf32>
    %156 = math.tanh %155 : vector<8x128xf32>
    %cst_73 = arith.constant 1.000000e+00 : f32
    %157 = vector.broadcast %cst_73 : f32 to vector<8x128xf32>
    %158 = arith.subf %157, %151 : vector<8x128xf32>
    %159 = arith.mulf %158, %156 : vector<8x128xf32>
    %160 = arith.mulf %151, %132 : vector<8x128xf32>
    %161 = arith.addf %159, %160 : vector<8x128xf32>
    %c32_74 = arith.constant 32 : index
    %c0_75 = arith.constant 0 : index
    %162 = vector.load %arg12[%c32_74, %c0_75] : memref<64x128xf32, #tpu.memory_space<vmem>>, vector<8x128xf32>
    tpu.vector_store %arg12[%c32_74, %c0_75], %161 {strides = array<i32>} : memref<64x128xf32, #tpu.memory_space<vmem>>, vector<8x128xf32>,
    %c40 = arith.constant 40 : index
    %c0_76 = arith.constant 0 : index
    %163 = vector.load %arg16[%c40, %c0_76] : memref<64x384xf32, #tpu.memory_space<vmem>>, vector<8x384xf32>
    %c0_77 = arith.constant 0 : index
    %c0_78 = arith.constant 0 : index
    %164 = vector.load %arg3[%c0_77, %c0_78] : memref<128x384xf32, #tpu.memory_space<vmem>>, vector<128x384xf32>
    %cst_79 = arith.constant dense<0.000000e+00> : vector<8x384xf32>
    %165 = tpu.matmul %161, %164, %cst_79 {dimension_numbers = #tpu.dot_dimension_numbers<[1], [0], [0], [1], [0, 0, 1, 1], [], []>} : vector<8x128xf32>, vector<128x384xf32>, vector<8x384xf32> -> vector<8x384xf32>
    %c0_80 = arith.constant 0 : index
    %c0_81 = arith.constant 0 : index
    %166 = vector.load %arg5[%c0_80, %c0_81] : memref<1x384xf32, #tpu.memory_space<vmem>>, vector<1x384xf32>
    %167 = vector.broadcast %166 : vector<1x384xf32> to vector<8x384xf32>
    %168 = arith.addf %165, %167 : vector<8x384xf32>
    %169 = vector.extract_strided_slice %163 {offsets = [0, 0], sizes = [8, 256], strides = [1, 1]} : vector<8x384xf32> to vector<8x256xf32>
    %170 = vector.extract_strided_slice %168 {offsets = [0, 0], sizes = [8, 256], strides = [1, 1]} : vector<8x384xf32> to vector<8x256xf32>
    %171 = arith.addf %169, %170 : vector<8x256xf32>
    %cst_82 = arith.constant 5.000000e-01 : f32
    %172 = vector.broadcast %cst_82 : f32 to vector<8x256xf32>
    %173 = arith.mulf %172, %171 : vector<8x256xf32>
    %174 = math.tanh %173 : vector<8x256xf32>
    %cst_83 = arith.constant 5.000000e-01 : f32
    %175 = vector.broadcast %cst_83 : f32 to vector<8x256xf32>
    %176 = arith.mulf %175, %174 : vector<8x256xf32>
    %cst_84 = arith.constant 5.000000e-01 : f32
    %177 = vector.broadcast %cst_84 : f32 to vector<8x256xf32>
    %178 = arith.addf %176, %177 : vector<8x256xf32>
    %179 = vector.extract_strided_slice %178 {offsets = [0, 0], sizes = [8, 128], strides = [1, 1]} : vector<8x256xf32> to vector<8x128xf32>
    %180 = vector.extract_strided_slice %178 {offsets = [0, 128], sizes = [8, 128], strides = [1, 1]} : vector<8x256xf32> to vector<8x128xf32>
    %181 = vector.extract_strided_slice %163 {offsets = [0, 256], sizes = [8, 128], strides = [1, 1]} : vector<8x384xf32> to vector<8x128xf32>
    %182 = vector.extract_strided_slice %168 {offsets = [0, 256], sizes = [8, 128], strides = [1, 1]} : vector<8x384xf32> to vector<8x128xf32>
    %183 = arith.mulf %179, %182 : vector<8x128xf32>
    %184 = arith.addf %181, %183 : vector<8x128xf32>
    %185 = math.tanh %184 : vector<8x128xf32>
    %cst_85 = arith.constant 1.000000e+00 : f32
    %186 = vector.broadcast %cst_85 : f32 to vector<8x128xf32>
    %187 = arith.subf %186, %180 : vector<8x128xf32>
    %188 = arith.mulf %187, %185 : vector<8x128xf32>
    %189 = arith.mulf %180, %161 : vector<8x128xf32>
    %190 = arith.addf %188, %189 : vector<8x128xf32>
    %c40_86 = arith.constant 40 : index
    %c0_87 = arith.constant 0 : index
    %191 = vector.load %arg12[%c40_86, %c0_87] : memref<64x128xf32, #tpu.memory_space<vmem>>, vector<8x128xf32>
    tpu.vector_store %arg12[%c40_86, %c0_87], %190 {strides = array<i32>} : memref<64x128xf32, #tpu.memory_space<vmem>>, vector<8x128xf32>,
    %c48 = arith.constant 48 : index
    %c0_88 = arith.constant 0 : index
    %192 = vector.load %arg16[%c48, %c0_88] : memref<64x384xf32, #tpu.memory_space<vmem>>, vector<8x384xf32>
    %c0_89 = arith.constant 0 : index
    %c0_90 = arith.constant 0 : index
    %193 = vector.load %arg3[%c0_89, %c0_90] : memref<128x384xf32, #tpu.memory_space<vmem>>, vector<128x384xf32>
    %cst_91 = arith.constant dense<0.000000e+00> : vector<8x384xf32>
    %194 = tpu.matmul %190, %193, %cst_91 {dimension_numbers = #tpu.dot_dimension_numbers<[1], [0], [0], [1], [0, 0, 1, 1], [], []>} : vector<8x128xf32>, vector<128x384xf32>, vector<8x384xf32> -> vector<8x384xf32>
    %c0_92 = arith.constant 0 : index
    %c0_93 = arith.constant 0 : index
    %195 = vector.load %arg5[%c0_92, %c0_93] : memref<1x384xf32, #tpu.memory_space<vmem>>, vector<1x384xf32>
    %196 = vector.broadcast %195 : vector<1x384xf32> to vector<8x384xf32>
    %197 = arith.addf %194, %196 : vector<8x384xf32>
    %198 = vector.extract_strided_slice %192 {offsets = [0, 0], sizes = [8, 256], strides = [1, 1]} : vector<8x384xf32> to vector<8x256xf32>
    %199 = vector.extract_strided_slice %197 {offsets = [0, 0], sizes = [8, 256], strides = [1, 1]} : vector<8x384xf32> to vector<8x256xf32>
    %200 = arith.addf %198, %199 : vector<8x256xf32>
    %cst_94 = arith.constant 5.000000e-01 : f32
    %201 = vector.broadcast %cst_94 : f32 to vector<8x256xf32>
    %202 = arith.mulf %201, %200 : vector<8x256xf32>
    %203 = math.tanh %202 : vector<8x256xf32>
    %cst_95 = arith.constant 5.000000e-01 : f32
    %204 = vector.broadcast %cst_95 : f32 to vector<8x256xf32>
    %205 = arith.mulf %204, %203 : vector<8x256xf32>
    %cst_96 = arith.constant 5.000000e-01 : f32
    %206 = vector.broadcast %cst_96 : f32 to vector<8x256xf32>
    %207 = arith.addf %205, %206 : vector<8x256xf32>
    %208 = vector.extract_strided_slice %207 {offsets = [0, 0], sizes = [8, 128], strides = [1, 1]} : vector<8x256xf32> to vector<8x128xf32>
    %209 = vector.extract_strided_slice %207 {offsets = [0, 128], sizes = [8, 128], strides = [1, 1]} : vector<8x256xf32> to vector<8x128xf32>
    %210 = vector.extract_strided_slice %192 {offsets = [0, 256], sizes = [8, 128], strides = [1, 1]} : vector<8x384xf32> to vector<8x128xf32>
    %211 = vector.extract_strided_slice %197 {offsets = [0, 256], sizes = [8, 128], strides = [1, 1]} : vector<8x384xf32> to vector<8x128xf32>
    %212 = arith.mulf %208, %211 : vector<8x128xf32>
    %213 = arith.addf %210, %212 : vector<8x128xf32>
    %214 = math.tanh %213 : vector<8x128xf32>
    %cst_97 = arith.constant 1.000000e+00 : f32
    %215 = vector.broadcast %cst_97 : f32 to vector<8x128xf32>
    %216 = arith.subf %215, %209 : vector<8x128xf32>
    %217 = arith.mulf %216, %214 : vector<8x128xf32>
    %218 = arith.mulf %209, %190 : vector<8x128xf32>
    %219 = arith.addf %217, %218 : vector<8x128xf32>
    %c48_98 = arith.constant 48 : index
    %c0_99 = arith.constant 0 : index
    %220 = vector.load %arg12[%c48_98, %c0_99] : memref<64x128xf32, #tpu.memory_space<vmem>>, vector<8x128xf32>
    tpu.vector_store %arg12[%c48_98, %c0_99], %219 {strides = array<i32>} : memref<64x128xf32, #tpu.memory_space<vmem>>, vector<8x128xf32>,
    %c56 = arith.constant 56 : index
    %c0_100 = arith.constant 0 : index
    %221 = vector.load %arg16[%c56, %c0_100] : memref<64x384xf32, #tpu.memory_space<vmem>>, vector<8x384xf32>
    %c0_101 = arith.constant 0 : index
    %c0_102 = arith.constant 0 : index
    %222 = vector.load %arg3[%c0_101, %c0_102] : memref<128x384xf32, #tpu.memory_space<vmem>>, vector<128x384xf32>
    %cst_103 = arith.constant dense<0.000000e+00> : vector<8x384xf32>
    %223 = tpu.matmul %219, %222, %cst_103 {dimension_numbers = #tpu.dot_dimension_numbers<[1], [0], [0], [1], [0, 0, 1, 1], [], []>} : vector<8x128xf32>, vector<128x384xf32>, vector<8x384xf32> -> vector<8x384xf32>
    %c0_104 = arith.constant 0 : index
    %c0_105 = arith.constant 0 : index
    %224 = vector.load %arg5[%c0_104, %c0_105] : memref<1x384xf32, #tpu.memory_space<vmem>>, vector<1x384xf32>
    %225 = vector.broadcast %224 : vector<1x384xf32> to vector<8x384xf32>
    %226 = arith.addf %223, %225 : vector<8x384xf32>
    %227 = vector.extract_strided_slice %221 {offsets = [0, 0], sizes = [8, 256], strides = [1, 1]} : vector<8x384xf32> to vector<8x256xf32>
    %228 = vector.extract_strided_slice %226 {offsets = [0, 0], sizes = [8, 256], strides = [1, 1]} : vector<8x384xf32> to vector<8x256xf32>
    %229 = arith.addf %227, %228 : vector<8x256xf32>
    %cst_106 = arith.constant 5.000000e-01 : f32
    %230 = vector.broadcast %cst_106 : f32 to vector<8x256xf32>
    %231 = arith.mulf %230, %229 : vector<8x256xf32>
    %232 = math.tanh %231 : vector<8x256xf32>
    %cst_107 = arith.constant 5.000000e-01 : f32
    %233 = vector.broadcast %cst_107 : f32 to vector<8x256xf32>
    %234 = arith.mulf %233, %232 : vector<8x256xf32>
    %cst_108 = arith.constant 5.000000e-01 : f32
    %235 = vector.broadcast %cst_108 : f32 to vector<8x256xf32>
    %236 = arith.addf %234, %235 : vector<8x256xf32>
    %237 = vector.extract_strided_slice %236 {offsets = [0, 0], sizes = [8, 128], strides = [1, 1]} : vector<8x256xf32> to vector<8x128xf32>
    %238 = vector.extract_strided_slice %236 {offsets = [0, 128], sizes = [8, 128], strides = [1, 1]} : vector<8x256xf32> to vector<8x128xf32>
    %239 = vector.extract_strided_slice %221 {offsets = [0, 256], sizes = [8, 128], strides = [1, 1]} : vector<8x384xf32> to vector<8x128xf32>
    %240 = vector.extract_strided_slice %226 {offsets = [0, 256], sizes = [8, 128], strides = [1, 1]} : vector<8x384xf32> to vector<8x128xf32>
    %241 = arith.mulf %237, %240 : vector<8x128xf32>
    %242 = arith.addf %239, %241 : vector<8x128xf32>
    %243 = math.tanh %242 : vector<8x128xf32>
    %cst_109 = arith.constant 1.000000e+00 : f32
    %244 = vector.broadcast %cst_109 : f32 to vector<8x128xf32>
    %245 = arith.subf %244, %238 : vector<8x128xf32>
    %246 = arith.mulf %245, %243 : vector<8x128xf32>
    %247 = arith.mulf %238, %219 : vector<8x128xf32>
    %248 = arith.addf %246, %247 : vector<8x128xf32>
    %c56_110 = arith.constant 56 : index
    %c0_111 = arith.constant 0 : index
    %249 = vector.load %arg12[%c56_110, %c0_111] : memref<64x128xf32, #tpu.memory_space<vmem>>, vector<8x128xf32>
    tpu.vector_store %arg12[%c56_110, %c0_111], %248 {strides = array<i32>} : memref<64x128xf32, #tpu.memory_space<vmem>>, vector<8x128xf32>,
    %c0_112 = arith.constant 0 : index
    %c0_113 = arith.constant 0 : index
    %250 = vector.load %arg12[%c0_112, %c0_113] : memref<64x128xf32, #tpu.memory_space<vmem>>, vector<64x128xf32>
    %251 = arith.truncf %250 : vector<64x128xf32> to vector<64x128xbf16>
    %c0_114 = arith.constant 0 : index
    %c0_115 = arith.constant 0 : index
    %252 = vector.load %arg6[%c0_114, %c0_115] : memref<128x384xbf16, #tpu.memory_space<vmem>>, vector<128x384xbf16>
    %cst_116 = arith.constant dense<0.000000e+00> : vector<64x384xf32>
    %253 = tpu.matmul %251, %252, %cst_116 {dimension_numbers = #tpu.dot_dimension_numbers<[1], [0], [0], [1], [0, 0, 1, 1], [], []>} : vector<64x128xbf16>, vector<128x384xbf16>, vector<64x384xf32> -> vector<64x384xf32>
    %c0_117 = arith.constant 0 : index
    %c0_118 = arith.constant 0 : index
    %254 = vector.load %arg8[%c0_117, %c0_118] : memref<1x384xf32, #tpu.memory_space<vmem>>, vector<1x384xf32>
    %255 = vector.broadcast %254 : vector<1x384xf32> to vector<64x384xf32>
    %256 = arith.addf %253, %255 : vector<64x384xf32>
    %c0_119 = arith.constant 0 : index
    %c0_120 = arith.constant 0 : index
    %257 = vector.load %arg16[%c0_119, %c0_120] : memref<64x384xf32, #tpu.memory_space<vmem>>, vector<64x384xf32>
    tpu.vector_store %arg16[%c0_119, %c0_120], %256 {strides = array<i32>} : memref<64x384xf32, #tpu.memory_space<vmem>>, vector<64x384xf32>,
    %cst_121 = arith.constant 0.000000e+00 : f32
    %258 = vector.broadcast %cst_121 : f32 to vector<8x128xf32>
    %c0_122 = arith.constant 0 : index
    %c0_123 = arith.constant 0 : index
    %259 = vector.load %arg16[%c0_122, %c0_123] : memref<64x384xf32, #tpu.memory_space<vmem>>, vector<8x384xf32>
    %c0_124 = arith.constant 0 : index
    %c0_125 = arith.constant 0 : index
    %260 = vector.load %arg7[%c0_124, %c0_125] : memref<128x384xf32, #tpu.memory_space<vmem>>, vector<128x384xf32>
    %cst_126 = arith.constant dense<0.000000e+00> : vector<8x384xf32>
    %261 = tpu.matmul %258, %260, %cst_126 {dimension_numbers = #tpu.dot_dimension_numbers<[1], [0], [0], [1], [0, 0, 1, 1], [], []>} : vector<8x128xf32>, vector<128x384xf32>, vector<8x384xf32> -> vector<8x384xf32>
    %c0_127 = arith.constant 0 : index
    %c0_128 = arith.constant 0 : index
    %262 = vector.load %arg9[%c0_127, %c0_128] : memref<1x384xf32, #tpu.memory_space<vmem>>, vector<1x384xf32>
    %263 = vector.broadcast %262 : vector<1x384xf32> to vector<8x384xf32>
    %264 = arith.addf %261, %263 : vector<8x384xf32>
    %265 = vector.extract_strided_slice %259 {offsets = [0, 0], sizes = [8, 256], strides = [1, 1]} : vector<8x384xf32> to vector<8x256xf32>
    %266 = vector.extract_strided_slice %264 {offsets = [0, 0], sizes = [8, 256], strides = [1, 1]} : vector<8x384xf32> to vector<8x256xf32>
    %267 = arith.addf %265, %266 : vector<8x256xf32>
    %cst_129 = arith.constant 5.000000e-01 : f32
    %268 = vector.broadcast %cst_129 : f32 to vector<8x256xf32>
    %269 = arith.mulf %268, %267 : vector<8x256xf32>
    %270 = math.tanh %269 : vector<8x256xf32>
    %cst_130 = arith.constant 5.000000e-01 : f32
    %271 = vector.broadcast %cst_130 : f32 to vector<8x256xf32>
    %272 = arith.mulf %271, %270 : vector<8x256xf32>
    %cst_131 = arith.constant 5.000000e-01 : f32
    %273 = vector.broadcast %cst_131 : f32 to vector<8x256xf32>
    %274 = arith.addf %272, %273 : vector<8x256xf32>
    %275 = vector.extract_strided_slice %274 {offsets = [0, 0], sizes = [8, 128], strides = [1, 1]} : vector<8x256xf32> to vector<8x128xf32>
    %276 = vector.extract_strided_slice %274 {offsets = [0, 128], sizes = [8, 128], strides = [1, 1]} : vector<8x256xf32> to vector<8x128xf32>
    %277 = vector.extract_strided_slice %259 {offsets = [0, 256], sizes = [8, 128], strides = [1, 1]} : vector<8x384xf32> to vector<8x128xf32>
    %278 = vector.extract_strided_slice %264 {offsets = [0, 256], sizes = [8, 128], strides = [1, 1]} : vector<8x384xf32> to vector<8x128xf32>
    %279 = arith.mulf %275, %278 : vector<8x128xf32>
    %280 = arith.addf %277, %279 : vector<8x128xf32>
    %281 = math.tanh %280 : vector<8x128xf32>
    %cst_132 = arith.constant 1.000000e+00 : f32
    %282 = vector.broadcast %cst_132 : f32 to vector<8x128xf32>
    %283 = arith.subf %282, %276 : vector<8x128xf32>
    %284 = arith.mulf %283, %281 : vector<8x128xf32>
    %285 = arith.mulf %276, %258 : vector<8x128xf32>
    %286 = arith.addf %284, %285 : vector<8x128xf32>
    %c0_133 = arith.constant 0 : index
    %c0_134 = arith.constant 0 : index
    %287 = vector.load %arg12[%c0_133, %c0_134] : memref<64x128xf32, #tpu.memory_space<vmem>>, vector<8x128xf32>
    tpu.vector_store %arg12[%c0_133, %c0_134], %286 {strides = array<i32>} : memref<64x128xf32, #tpu.memory_space<vmem>>, vector<8x128xf32>,
    %c8_135 = arith.constant 8 : index
    %c0_136 = arith.constant 0 : index
    %288 = vector.load %arg16[%c8_135, %c0_136] : memref<64x384xf32, #tpu.memory_space<vmem>>, vector<8x384xf32>
    %c0_137 = arith.constant 0 : index
    %c0_138 = arith.constant 0 : index
    %289 = vector.load %arg7[%c0_137, %c0_138] : memref<128x384xf32, #tpu.memory_space<vmem>>, vector<128x384xf32>
    %cst_139 = arith.constant dense<0.000000e+00> : vector<8x384xf32>
    %290 = tpu.matmul %286, %289, %cst_139 {dimension_numbers = #tpu.dot_dimension_numbers<[1], [0], [0], [1], [0, 0, 1, 1], [], []>} : vector<8x128xf32>, vector<128x384xf32>, vector<8x384xf32> -> vector<8x384xf32>
    %c0_140 = arith.constant 0 : index
    %c0_141 = arith.constant 0 : index
    %291 = vector.load %arg9[%c0_140, %c0_141] : memref<1x384xf32, #tpu.memory_space<vmem>>, vector<1x384xf32>
    %292 = vector.broadcast %291 : vector<1x384xf32> to vector<8x384xf32>
    %293 = arith.addf %290, %292 : vector<8x384xf32>
    %294 = vector.extract_strided_slice %288 {offsets = [0, 0], sizes = [8, 256], strides = [1, 1]} : vector<8x384xf32> to vector<8x256xf32>
    %295 = vector.extract_strided_slice %293 {offsets = [0, 0], sizes = [8, 256], strides = [1, 1]} : vector<8x384xf32> to vector<8x256xf32>
    %296 = arith.addf %294, %295 : vector<8x256xf32>
    %cst_142 = arith.constant 5.000000e-01 : f32
    %297 = vector.broadcast %cst_142 : f32 to vector<8x256xf32>
    %298 = arith.mulf %297, %296 : vector<8x256xf32>
    %299 = math.tanh %298 : vector<8x256xf32>
    %cst_143 = arith.constant 5.000000e-01 : f32
    %300 = vector.broadcast %cst_143 : f32 to vector<8x256xf32>
    %301 = arith.mulf %300, %299 : vector<8x256xf32>
    %cst_144 = arith.constant 5.000000e-01 : f32
    %302 = vector.broadcast %cst_144 : f32 to vector<8x256xf32>
    %303 = arith.addf %301, %302 : vector<8x256xf32>
    %304 = vector.extract_strided_slice %303 {offsets = [0, 0], sizes = [8, 128], strides = [1, 1]} : vector<8x256xf32> to vector<8x128xf32>
    %305 = vector.extract_strided_slice %303 {offsets = [0, 128], sizes = [8, 128], strides = [1, 1]} : vector<8x256xf32> to vector<8x128xf32>
    %306 = vector.extract_strided_slice %288 {offsets = [0, 256], sizes = [8, 128], strides = [1, 1]} : vector<8x384xf32> to vector<8x128xf32>
    %307 = vector.extract_strided_slice %293 {offsets = [0, 256], sizes = [8, 128], strides = [1, 1]} : vector<8x384xf32> to vector<8x128xf32>
    %308 = arith.mulf %304, %307 : vector<8x128xf32>
    %309 = arith.addf %306, %308 : vector<8x128xf32>
    %310 = math.tanh %309 : vector<8x128xf32>
    %cst_145 = arith.constant 1.000000e+00 : f32
    %311 = vector.broadcast %cst_145 : f32 to vector<8x128xf32>
    %312 = arith.subf %311, %305 : vector<8x128xf32>
    %313 = arith.mulf %312, %310 : vector<8x128xf32>
    %314 = arith.mulf %305, %286 : vector<8x128xf32>
    %315 = arith.addf %313, %314 : vector<8x128xf32>
    %c8_146 = arith.constant 8 : index
    %c0_147 = arith.constant 0 : index
    %316 = vector.load %arg12[%c8_146, %c0_147] : memref<64x128xf32, #tpu.memory_space<vmem>>, vector<8x128xf32>
    tpu.vector_store %arg12[%c8_146, %c0_147], %315 {strides = array<i32>} : memref<64x128xf32, #tpu.memory_space<vmem>>, vector<8x128xf32>,
    %c16_148 = arith.constant 16 : index
    %c0_149 = arith.constant 0 : index
    %317 = vector.load %arg16[%c16_148, %c0_149] : memref<64x384xf32, #tpu.memory_space<vmem>>, vector<8x384xf32>
    %c0_150 = arith.constant 0 : index
    %c0_151 = arith.constant 0 : index
    %318 = vector.load %arg7[%c0_150, %c0_151] : memref<128x384xf32, #tpu.memory_space<vmem>>, vector<128x384xf32>
    %cst_152 = arith.constant dense<0.000000e+00> : vector<8x384xf32>
    %319 = tpu.matmul %315, %318, %cst_152 {dimension_numbers = #tpu.dot_dimension_numbers<[1], [0], [0], [1], [0, 0, 1, 1], [], []>} : vector<8x128xf32>, vector<128x384xf32>, vector<8x384xf32> -> vector<8x384xf32>
    %c0_153 = arith.constant 0 : index
    %c0_154 = arith.constant 0 : index
    %320 = vector.load %arg9[%c0_153, %c0_154] : memref<1x384xf32, #tpu.memory_space<vmem>>, vector<1x384xf32>
    %321 = vector.broadcast %320 : vector<1x384xf32> to vector<8x384xf32>
    %322 = arith.addf %319, %321 : vector<8x384xf32>
    %323 = vector.extract_strided_slice %317 {offsets = [0, 0], sizes = [8, 256], strides = [1, 1]} : vector<8x384xf32> to vector<8x256xf32>
    %324 = vector.extract_strided_slice %322 {offsets = [0, 0], sizes = [8, 256], strides = [1, 1]} : vector<8x384xf32> to vector<8x256xf32>
    %325 = arith.addf %323, %324 : vector<8x256xf32>
    %cst_155 = arith.constant 5.000000e-01 : f32
    %326 = vector.broadcast %cst_155 : f32 to vector<8x256xf32>
    %327 = arith.mulf %326, %325 : vector<8x256xf32>
    %328 = math.tanh %327 : vector<8x256xf32>
    %cst_156 = arith.constant 5.000000e-01 : f32
    %329 = vector.broadcast %cst_156 : f32 to vector<8x256xf32>
    %330 = arith.mulf %329, %328 : vector<8x256xf32>
    %cst_157 = arith.constant 5.000000e-01 : f32
    %331 = vector.broadcast %cst_157 : f32 to vector<8x256xf32>
    %332 = arith.addf %330, %331 : vector<8x256xf32>
    %333 = vector.extract_strided_slice %332 {offsets = [0, 0], sizes = [8, 128], strides = [1, 1]} : vector<8x256xf32> to vector<8x128xf32>
    %334 = vector.extract_strided_slice %332 {offsets = [0, 128], sizes = [8, 128], strides = [1, 1]} : vector<8x256xf32> to vector<8x128xf32>
    %335 = vector.extract_strided_slice %317 {offsets = [0, 256], sizes = [8, 128], strides = [1, 1]} : vector<8x384xf32> to vector<8x128xf32>
    %336 = vector.extract_strided_slice %322 {offsets = [0, 256], sizes = [8, 128], strides = [1, 1]} : vector<8x384xf32> to vector<8x128xf32>
    %337 = arith.mulf %333, %336 : vector<8x128xf32>
    %338 = arith.addf %335, %337 : vector<8x128xf32>
    %339 = math.tanh %338 : vector<8x128xf32>
    %cst_158 = arith.constant 1.000000e+00 : f32
    %340 = vector.broadcast %cst_158 : f32 to vector<8x128xf32>
    %341 = arith.subf %340, %334 : vector<8x128xf32>
    %342 = arith.mulf %341, %339 : vector<8x128xf32>
    %343 = arith.mulf %334, %315 : vector<8x128xf32>
    %344 = arith.addf %342, %343 : vector<8x128xf32>
    %c16_159 = arith.constant 16 : index
    %c0_160 = arith.constant 0 : index
    %345 = vector.load %arg12[%c16_159, %c0_160] : memref<64x128xf32, #tpu.memory_space<vmem>>, vector<8x128xf32>
    tpu.vector_store %arg12[%c16_159, %c0_160], %344 {strides = array<i32>} : memref<64x128xf32, #tpu.memory_space<vmem>>, vector<8x128xf32>,
    %c24_161 = arith.constant 24 : index
    %c0_162 = arith.constant 0 : index
    %346 = vector.load %arg16[%c24_161, %c0_162] : memref<64x384xf32, #tpu.memory_space<vmem>>, vector<8x384xf32>
    %c0_163 = arith.constant 0 : index
    %c0_164 = arith.constant 0 : index
    %347 = vector.load %arg7[%c0_163, %c0_164] : memref<128x384xf32, #tpu.memory_space<vmem>>, vector<128x384xf32>
    %cst_165 = arith.constant dense<0.000000e+00> : vector<8x384xf32>
    %348 = tpu.matmul %344, %347, %cst_165 {dimension_numbers = #tpu.dot_dimension_numbers<[1], [0], [0], [1], [0, 0, 1, 1], [], []>} : vector<8x128xf32>, vector<128x384xf32>, vector<8x384xf32> -> vector<8x384xf32>
    %c0_166 = arith.constant 0 : index
    %c0_167 = arith.constant 0 : index
    %349 = vector.load %arg9[%c0_166, %c0_167] : memref<1x384xf32, #tpu.memory_space<vmem>>, vector<1x384xf32>
    %350 = vector.broadcast %349 : vector<1x384xf32> to vector<8x384xf32>
    %351 = arith.addf %348, %350 : vector<8x384xf32>
    %352 = vector.extract_strided_slice %346 {offsets = [0, 0], sizes = [8, 256], strides = [1, 1]} : vector<8x384xf32> to vector<8x256xf32>
    %353 = vector.extract_strided_slice %351 {offsets = [0, 0], sizes = [8, 256], strides = [1, 1]} : vector<8x384xf32> to vector<8x256xf32>
    %354 = arith.addf %352, %353 : vector<8x256xf32>
    %cst_168 = arith.constant 5.000000e-01 : f32
    %355 = vector.broadcast %cst_168 : f32 to vector<8x256xf32>
    %356 = arith.mulf %355, %354 : vector<8x256xf32>
    %357 = math.tanh %356 : vector<8x256xf32>
    %cst_169 = arith.constant 5.000000e-01 : f32
    %358 = vector.broadcast %cst_169 : f32 to vector<8x256xf32>
    %359 = arith.mulf %358, %357 : vector<8x256xf32>
    %cst_170 = arith.constant 5.000000e-01 : f32
    %360 = vector.broadcast %cst_170 : f32 to vector<8x256xf32>
    %361 = arith.addf %359, %360 : vector<8x256xf32>
    %362 = vector.extract_strided_slice %361 {offsets = [0, 0], sizes = [8, 128], strides = [1, 1]} : vector<8x256xf32> to vector<8x128xf32>
    %363 = vector.extract_strided_slice %361 {offsets = [0, 128], sizes = [8, 128], strides = [1, 1]} : vector<8x256xf32> to vector<8x128xf32>
    %364 = vector.extract_strided_slice %346 {offsets = [0, 256], sizes = [8, 128], strides = [1, 1]} : vector<8x384xf32> to vector<8x128xf32>
    %365 = vector.extract_strided_slice %351 {offsets = [0, 256], sizes = [8, 128], strides = [1, 1]} : vector<8x384xf32> to vector<8x128xf32>
    %366 = arith.mulf %362, %365 : vector<8x128xf32>
    %367 = arith.addf %364, %366 : vector<8x128xf32>
    %368 = math.tanh %367 : vector<8x128xf32>
    %cst_171 = arith.constant 1.000000e+00 : f32
    %369 = vector.broadcast %cst_171 : f32 to vector<8x128xf32>
    %370 = arith.subf %369, %363 : vector<8x128xf32>
    %371 = arith.mulf %370, %368 : vector<8x128xf32>
    %372 = arith.mulf %363, %344 : vector<8x128xf32>
    %373 = arith.addf %371, %372 : vector<8x128xf32>
    %c24_172 = arith.constant 24 : index
    %c0_173 = arith.constant 0 : index
    %374 = vector.load %arg12[%c24_172, %c0_173] : memref<64x128xf32, #tpu.memory_space<vmem>>, vector<8x128xf32>
    tpu.vector_store %arg12[%c24_172, %c0_173], %373 {strides = array<i32>} : memref<64x128xf32, #tpu.memory_space<vmem>>, vector<8x128xf32>,
    %c32_174 = arith.constant 32 : index
    %c0_175 = arith.constant 0 : index
    %375 = vector.load %arg16[%c32_174, %c0_175] : memref<64x384xf32, #tpu.memory_space<vmem>>, vector<8x384xf32>
    %c0_176 = arith.constant 0 : index
    %c0_177 = arith.constant 0 : index
    %376 = vector.load %arg7[%c0_176, %c0_177] : memref<128x384xf32, #tpu.memory_space<vmem>>, vector<128x384xf32>
    %cst_178 = arith.constant dense<0.000000e+00> : vector<8x384xf32>
    %377 = tpu.matmul %373, %376, %cst_178 {dimension_numbers = #tpu.dot_dimension_numbers<[1], [0], [0], [1], [0, 0, 1, 1], [], []>} : vector<8x128xf32>, vector<128x384xf32>, vector<8x384xf32> -> vector<8x384xf32>
    %c0_179 = arith.constant 0 : index
    %c0_180 = arith.constant 0 : index
    %378 = vector.load %arg9[%c0_179, %c0_180] : memref<1x384xf32, #tpu.memory_space<vmem>>, vector<1x384xf32>
    %379 = vector.broadcast %378 : vector<1x384xf32> to vector<8x384xf32>
    %380 = arith.addf %377, %379 : vector<8x384xf32>
    %381 = vector.extract_strided_slice %375 {offsets = [0, 0], sizes = [8, 256], strides = [1, 1]} : vector<8x384xf32> to vector<8x256xf32>
    %382 = vector.extract_strided_slice %380 {offsets = [0, 0], sizes = [8, 256], strides = [1, 1]} : vector<8x384xf32> to vector<8x256xf32>
    %383 = arith.addf %381, %382 : vector<8x256xf32>
    %cst_181 = arith.constant 5.000000e-01 : f32
    %384 = vector.broadcast %cst_181 : f32 to vector<8x256xf32>
    %385 = arith.mulf %384, %383 : vector<8x256xf32>
    %386 = math.tanh %385 : vector<8x256xf32>
    %cst_182 = arith.constant 5.000000e-01 : f32
    %387 = vector.broadcast %cst_182 : f32 to vector<8x256xf32>
    %388 = arith.mulf %387, %386 : vector<8x256xf32>
    %cst_183 = arith.constant 5.000000e-01 : f32
    %389 = vector.broadcast %cst_183 : f32 to vector<8x256xf32>
    %390 = arith.addf %388, %389 : vector<8x256xf32>
    %391 = vector.extract_strided_slice %390 {offsets = [0, 0], sizes = [8, 128], strides = [1, 1]} : vector<8x256xf32> to vector<8x128xf32>
    %392 = vector.extract_strided_slice %390 {offsets = [0, 128], sizes = [8, 128], strides = [1, 1]} : vector<8x256xf32> to vector<8x128xf32>
    %393 = vector.extract_strided_slice %375 {offsets = [0, 256], sizes = [8, 128], strides = [1, 1]} : vector<8x384xf32> to vector<8x128xf32>
    %394 = vector.extract_strided_slice %380 {offsets = [0, 256], sizes = [8, 128], strides = [1, 1]} : vector<8x384xf32> to vector<8x128xf32>
    %395 = arith.mulf %391, %394 : vector<8x128xf32>
    %396 = arith.addf %393, %395 : vector<8x128xf32>
    %397 = math.tanh %396 : vector<8x128xf32>
    %cst_184 = arith.constant 1.000000e+00 : f32
    %398 = vector.broadcast %cst_184 : f32 to vector<8x128xf32>
    %399 = arith.subf %398, %392 : vector<8x128xf32>
    %400 = arith.mulf %399, %397 : vector<8x128xf32>
    %401 = arith.mulf %392, %373 : vector<8x128xf32>
    %402 = arith.addf %400, %401 : vector<8x128xf32>
    %c32_185 = arith.constant 32 : index
    %c0_186 = arith.constant 0 : index
    %403 = vector.load %arg12[%c32_185, %c0_186] : memref<64x128xf32, #tpu.memory_space<vmem>>, vector<8x128xf32>
    tpu.vector_store %arg12[%c32_185, %c0_186], %402 {strides = array<i32>} : memref<64x128xf32, #tpu.memory_space<vmem>>, vector<8x128xf32>,
    %c40_187 = arith.constant 40 : index
    %c0_188 = arith.constant 0 : index
    %404 = vector.load %arg16[%c40_187, %c0_188] : memref<64x384xf32, #tpu.memory_space<vmem>>, vector<8x384xf32>
    %c0_189 = arith.constant 0 : index
    %c0_190 = arith.constant 0 : index
    %405 = vector.load %arg7[%c0_189, %c0_190] : memref<128x384xf32, #tpu.memory_space<vmem>>, vector<128x384xf32>
    %cst_191 = arith.constant dense<0.000000e+00> : vector<8x384xf32>
    %406 = tpu.matmul %402, %405, %cst_191 {dimension_numbers = #tpu.dot_dimension_numbers<[1], [0], [0], [1], [0, 0, 1, 1], [], []>} : vector<8x128xf32>, vector<128x384xf32>, vector<8x384xf32> -> vector<8x384xf32>
    %c0_192 = arith.constant 0 : index
    %c0_193 = arith.constant 0 : index
    %407 = vector.load %arg9[%c0_192, %c0_193] : memref<1x384xf32, #tpu.memory_space<vmem>>, vector<1x384xf32>
    %408 = vector.broadcast %407 : vector<1x384xf32> to vector<8x384xf32>
    %409 = arith.addf %406, %408 : vector<8x384xf32>
    %410 = vector.extract_strided_slice %404 {offsets = [0, 0], sizes = [8, 256], strides = [1, 1]} : vector<8x384xf32> to vector<8x256xf32>
    %411 = vector.extract_strided_slice %409 {offsets = [0, 0], sizes = [8, 256], strides = [1, 1]} : vector<8x384xf32> to vector<8x256xf32>
    %412 = arith.addf %410, %411 : vector<8x256xf32>
    %cst_194 = arith.constant 5.000000e-01 : f32
    %413 = vector.broadcast %cst_194 : f32 to vector<8x256xf32>
    %414 = arith.mulf %413, %412 : vector<8x256xf32>
    %415 = math.tanh %414 : vector<8x256xf32>
    %cst_195 = arith.constant 5.000000e-01 : f32
    %416 = vector.broadcast %cst_195 : f32 to vector<8x256xf32>
    %417 = arith.mulf %416, %415 : vector<8x256xf32>
    %cst_196 = arith.constant 5.000000e-01 : f32
    %418 = vector.broadcast %cst_196 : f32 to vector<8x256xf32>
    %419 = arith.addf %417, %418 : vector<8x256xf32>
    %420 = vector.extract_strided_slice %419 {offsets = [0, 0], sizes = [8, 128], strides = [1, 1]} : vector<8x256xf32> to vector<8x128xf32>
    %421 = vector.extract_strided_slice %419 {offsets = [0, 128], sizes = [8, 128], strides = [1, 1]} : vector<8x256xf32> to vector<8x128xf32>
    %422 = vector.extract_strided_slice %404 {offsets = [0, 256], sizes = [8, 128], strides = [1, 1]} : vector<8x384xf32> to vector<8x128xf32>
    %423 = vector.extract_strided_slice %409 {offsets = [0, 256], sizes = [8, 128], strides = [1, 1]} : vector<8x384xf32> to vector<8x128xf32>
    %424 = arith.mulf %420, %423 : vector<8x128xf32>
    %425 = arith.addf %422, %424 : vector<8x128xf32>
    %426 = math.tanh %425 : vector<8x128xf32>
    %cst_197 = arith.constant 1.000000e+00 : f32
    %427 = vector.broadcast %cst_197 : f32 to vector<8x128xf32>
    %428 = arith.subf %427, %421 : vector<8x128xf32>
    %429 = arith.mulf %428, %426 : vector<8x128xf32>
    %430 = arith.mulf %421, %402 : vector<8x128xf32>
    %431 = arith.addf %429, %430 : vector<8x128xf32>
    %c40_198 = arith.constant 40 : index
    %c0_199 = arith.constant 0 : index
    %432 = vector.load %arg12[%c40_198, %c0_199] : memref<64x128xf32, #tpu.memory_space<vmem>>, vector<8x128xf32>
    tpu.vector_store %arg12[%c40_198, %c0_199], %431 {strides = array<i32>} : memref<64x128xf32, #tpu.memory_space<vmem>>, vector<8x128xf32>,
    %c48_200 = arith.constant 48 : index
    %c0_201 = arith.constant 0 : index
    %433 = vector.load %arg16[%c48_200, %c0_201] : memref<64x384xf32, #tpu.memory_space<vmem>>, vector<8x384xf32>
    %c0_202 = arith.constant 0 : index
    %c0_203 = arith.constant 0 : index
    %434 = vector.load %arg7[%c0_202, %c0_203] : memref<128x384xf32, #tpu.memory_space<vmem>>, vector<128x384xf32>
    %cst_204 = arith.constant dense<0.000000e+00> : vector<8x384xf32>
    %435 = tpu.matmul %431, %434, %cst_204 {dimension_numbers = #tpu.dot_dimension_numbers<[1], [0], [0], [1], [0, 0, 1, 1], [], []>} : vector<8x128xf32>, vector<128x384xf32>, vector<8x384xf32> -> vector<8x384xf32>
    %c0_205 = arith.constant 0 : index
    %c0_206 = arith.constant 0 : index
    %436 = vector.load %arg9[%c0_205, %c0_206] : memref<1x384xf32, #tpu.memory_space<vmem>>, vector<1x384xf32>
    %437 = vector.broadcast %436 : vector<1x384xf32> to vector<8x384xf32>
    %438 = arith.addf %435, %437 : vector<8x384xf32>
    %439 = vector.extract_strided_slice %433 {offsets = [0, 0], sizes = [8, 256], strides = [1, 1]} : vector<8x384xf32> to vector<8x256xf32>
    %440 = vector.extract_strided_slice %438 {offsets = [0, 0], sizes = [8, 256], strides = [1, 1]} : vector<8x384xf32> to vector<8x256xf32>
    %441 = arith.addf %439, %440 : vector<8x256xf32>
    %cst_207 = arith.constant 5.000000e-01 : f32
    %442 = vector.broadcast %cst_207 : f32 to vector<8x256xf32>
    %443 = arith.mulf %442, %441 : vector<8x256xf32>
    %444 = math.tanh %443 : vector<8x256xf32>
    %cst_208 = arith.constant 5.000000e-01 : f32
    %445 = vector.broadcast %cst_208 : f32 to vector<8x256xf32>
    %446 = arith.mulf %445, %444 : vector<8x256xf32>
    %cst_209 = arith.constant 5.000000e-01 : f32
    %447 = vector.broadcast %cst_209 : f32 to vector<8x256xf32>
    %448 = arith.addf %446, %447 : vector<8x256xf32>
    %449 = vector.extract_strided_slice %448 {offsets = [0, 0], sizes = [8, 128], strides = [1, 1]} : vector<8x256xf32> to vector<8x128xf32>
    %450 = vector.extract_strided_slice %448 {offsets = [0, 128], sizes = [8, 128], strides = [1, 1]} : vector<8x256xf32> to vector<8x128xf32>
    %451 = vector.extract_strided_slice %433 {offsets = [0, 256], sizes = [8, 128], strides = [1, 1]} : vector<8x384xf32> to vector<8x128xf32>
    %452 = vector.extract_strided_slice %438 {offsets = [0, 256], sizes = [8, 128], strides = [1, 1]} : vector<8x384xf32> to vector<8x128xf32>
    %453 = arith.mulf %449, %452 : vector<8x128xf32>
    %454 = arith.addf %451, %453 : vector<8x128xf32>
    %455 = math.tanh %454 : vector<8x128xf32>
    %cst_210 = arith.constant 1.000000e+00 : f32
    %456 = vector.broadcast %cst_210 : f32 to vector<8x128xf32>
    %457 = arith.subf %456, %450 : vector<8x128xf32>
    %458 = arith.mulf %457, %455 : vector<8x128xf32>
    %459 = arith.mulf %450, %431 : vector<8x128xf32>
    %460 = arith.addf %458, %459 : vector<8x128xf32>
    %c48_211 = arith.constant 48 : index
    %c0_212 = arith.constant 0 : index
    %461 = vector.load %arg12[%c48_211, %c0_212] : memref<64x128xf32, #tpu.memory_space<vmem>>, vector<8x128xf32>
    tpu.vector_store %arg12[%c48_211, %c0_212], %460 {strides = array<i32>} : memref<64x128xf32, #tpu.memory_space<vmem>>, vector<8x128xf32>,
    %c56_213 = arith.constant 56 : index
    %c0_214 = arith.constant 0 : index
    %462 = vector.load %arg16[%c56_213, %c0_214] : memref<64x384xf32, #tpu.memory_space<vmem>>, vector<8x384xf32>
    %c0_215 = arith.constant 0 : index
    %c0_216 = arith.constant 0 : index
    %463 = vector.load %arg7[%c0_215, %c0_216] : memref<128x384xf32, #tpu.memory_space<vmem>>, vector<128x384xf32>
    %cst_217 = arith.constant dense<0.000000e+00> : vector<8x384xf32>
    %464 = tpu.matmul %460, %463, %cst_217 {dimension_numbers = #tpu.dot_dimension_numbers<[1], [0], [0], [1], [0, 0, 1, 1], [], []>} : vector<8x128xf32>, vector<128x384xf32>, vector<8x384xf32> -> vector<8x384xf32>
    %c0_218 = arith.constant 0 : index
    %c0_219 = arith.constant 0 : index
    %465 = vector.load %arg9[%c0_218, %c0_219] : memref<1x384xf32, #tpu.memory_space<vmem>>, vector<1x384xf32>
    %466 = vector.broadcast %465 : vector<1x384xf32> to vector<8x384xf32>
    %467 = arith.addf %464, %466 : vector<8x384xf32>
    %468 = vector.extract_strided_slice %462 {offsets = [0, 0], sizes = [8, 256], strides = [1, 1]} : vector<8x384xf32> to vector<8x256xf32>
    %469 = vector.extract_strided_slice %467 {offsets = [0, 0], sizes = [8, 256], strides = [1, 1]} : vector<8x384xf32> to vector<8x256xf32>
    %470 = arith.addf %468, %469 : vector<8x256xf32>
    %cst_220 = arith.constant 5.000000e-01 : f32
    %471 = vector.broadcast %cst_220 : f32 to vector<8x256xf32>
    %472 = arith.mulf %471, %470 : vector<8x256xf32>
    %473 = math.tanh %472 : vector<8x256xf32>
    %cst_221 = arith.constant 5.000000e-01 : f32
    %474 = vector.broadcast %cst_221 : f32 to vector<8x256xf32>
    %475 = arith.mulf %474, %473 : vector<8x256xf32>
    %cst_222 = arith.constant 5.000000e-01 : f32
    %476 = vector.broadcast %cst_222 : f32 to vector<8x256xf32>
    %477 = arith.addf %475, %476 : vector<8x256xf32>
    %478 = vector.extract_strided_slice %477 {offsets = [0, 0], sizes = [8, 128], strides = [1, 1]} : vector<8x256xf32> to vector<8x128xf32>
    %479 = vector.extract_strided_slice %477 {offsets = [0, 128], sizes = [8, 128], strides = [1, 1]} : vector<8x256xf32> to vector<8x128xf32>
    %480 = vector.extract_strided_slice %462 {offsets = [0, 256], sizes = [8, 128], strides = [1, 1]} : vector<8x384xf32> to vector<8x128xf32>
    %481 = vector.extract_strided_slice %467 {offsets = [0, 256], sizes = [8, 128], strides = [1, 1]} : vector<8x384xf32> to vector<8x128xf32>
    %482 = arith.mulf %478, %481 : vector<8x128xf32>
    %483 = arith.addf %480, %482 : vector<8x128xf32>
    %484 = math.tanh %483 : vector<8x128xf32>
    %cst_223 = arith.constant 1.000000e+00 : f32
    %485 = vector.broadcast %cst_223 : f32 to vector<8x128xf32>
    %486 = arith.subf %485, %479 : vector<8x128xf32>
    %487 = arith.mulf %486, %484 : vector<8x128xf32>
    %488 = arith.mulf %479, %460 : vector<8x128xf32>
    %489 = arith.addf %487, %488 : vector<8x128xf32>
    %c56_224 = arith.constant 56 : index
    %c0_225 = arith.constant 0 : index
    %490 = vector.load %arg12[%c56_224, %c0_225] : memref<64x128xf32, #tpu.memory_space<vmem>>, vector<8x128xf32>
    tpu.vector_store %arg12[%c56_224, %c0_225], %489 {strides = array<i32>} : memref<64x128xf32, #tpu.memory_space<vmem>>, vector<8x128xf32>,
    %c0_226 = arith.constant 0 : index
    %c0_227 = arith.constant 0 : index
    %491 = vector.load %arg13[%c0_226, %c0_227] : memref<8x128xf32, #tpu.memory_space<vmem>>, vector<8x128xf32>
    tpu.vector_store %arg13[%c0_226, %c0_227], %489 {strides = array<i32>} : memref<8x128xf32, #tpu.memory_space<vmem>>, vector<8x128xf32>,
    %c0_228 = arith.constant 0 : index
    %c0_229 = arith.constant 0 : index
    %492 = vector.load %arg10[%c0_228, %c0_229] : memref<128x128xf32, #tpu.memory_space<vmem>>, vector<128x128xf32>
    %cst_230 = arith.constant dense<0.000000e+00> : vector<8x128xf32>
    %493 = tpu.matmul %489, %492, %cst_230 {dimension_numbers = #tpu.dot_dimension_numbers<[1], [0], [0], [1], [0, 0, 1, 1], [], []>} : vector<8x128xf32>, vector<128x128xf32>, vector<8x128xf32> -> vector<8x128xf32>
    %c0_231 = arith.constant 0 : index
    %c0_232 = arith.constant 0 : index
    %494 = vector.load %arg11[%c0_231, %c0_232] : memref<1x128xf32, #tpu.memory_space<vmem>>, vector<1x128xf32>
    %495 = vector.broadcast %494 : vector<1x128xf32> to vector<8x128xf32>
    %496 = arith.addf %493, %495 : vector<8x128xf32>
    %c0_233 = arith.constant 0 : index
    %c0_234 = arith.constant 0 : index
    %497 = vector.load %arg14[%c0_233, %c0_234] : memref<8x128xf32, #tpu.memory_space<vmem>>, vector<8x128xf32>
    tpu.vector_store %arg14[%c0_233, %c0_234], %496 {strides = array<i32>} : memref<8x128xf32, #tpu.memory_space<vmem>>, vector<8x128xf32>,
    return
  }
}

</mosaic_0001>

<bundles_post_ra>
// kernel: single_encoder_text_forward.1
= control target key start
LH: loop header
LB: loop body
LE: loop exit
PB: predicated region body
PF: predicated region fallthrough
CT: control target
= control target key end

     0   :  { %20 = vsyncpa [#allocation5], 0  ;;  %s9099_s0 = inlined_call_operand.vmem [shape: s32[64,1], index: 0, kind: input, shape index: {}]   ;;  %s9100_s1 = inlined_call_operand.hbm [shape: f32[128,384], index: 1, kind: input, shape index: {}]   ;;  %s9101_s2 = inlined_call_operand.hbm [shape: bf16[384,384], index: 2, kind: input, shape index: {}]   ;;  %s9102_s3 = inlined_call_operand.hbm [shape: f32[128,384], index: 3, kind: input, shape index: {}]   ;;  %s9103_s4 = inlined_call_operand.vmem [shape: f32[1,384], index: 4, kind: input, shape index: {}]   ;;  %s9104_s5 = inlined_call_operand.vmem [shape: f32[1,384], index: 5, kind: input, shape index: {}]   ;;  %s9105_s6 = inlined_call_operand.hbm [shape: bf16[128,384], index: 6, kind: input, shape index: {}]   ;;  %s9106_s7 = inlined_call_operand.hbm [shape: f32[128,384], index: 7, kind: input, shape index: {}]   ;;  %s9107_s8 = inlined_call_operand.vmem [shape: f32[1,384], index: 8, kind: input, shape index: {}]   ;;  %s9108_s9 = inlined_call_operand.vmem [shape: f32[1,384], index: 9, kind: input, shape index: {}]   ;;  %s9109_s10 = inlined_call_operand.hbm [shape: f32[128,128], index: 10, kind: input, shape index: {}]   ;;  %s9110_s11 = inlined_call_operand.vmem [shape: f32[1,128], index: 11, kind: input, shape index: {}]   ;;  %s9111_s12 = inlined_call_operand.vmem [shape: f32[64,128], index: 12, kind: output, shape index: {0}]   ;;  %s9112_s13 = inlined_call_operand.vmem [shape: f32[8,128], index: 13, kind: output, shape index: {1}]   ;;  %s9113_s14 = inlined_call_operand.vmem [shape: f32[8,128], index: 14, kind: output, shape index: {2}]  }
   0x1   :  { %21 = vsyncpa [#allocation7], 0 }
   0x2   :  { %22 = vsyncpa [#allocation10], 0 }
   0x3   :  { %23 = vsyncpa [#allocation13], 0  ;;  %s6957_s29 = smov [#allocation6]  }
   0x4   :  { %s43_s30 = sshll.u32 %s6957_s29, 4  ;;  %s44_s30 = int_to_ptr.vmem [resolvable:$true] %s43_s30 }
   0x5   :  { %s6837_s15 = scalar_lea.vmem %s44_s30, 9216  ;;  %p6842_p1 = scmp.lt.s32.totalorder %s44_s30, %s44_s30 }
   0x6   :  { %p6838_p0 = scmp.ne.s32.totalorder %s44_s30, %s6837_s15  ;;  %p6843_p2 = scmp.lt.s32.totalorder %s6837_s15, %s6837_s15 }
   0x8   :  { %p6844_p3 = por %p6843_p2, %p6842_p1 }
   0xa   :  { %p6845_p4 = pnand %p6844_p3, %p6838_p0 }
   0xc   :  { %6848 = shalt.err (!%p6845_p4)
}
   0xd   :  { %s6958_s16 = smov 192   ;;  %s6959_s17 = smov 12  }
   0xe   :  { %49 = dma.hbm_to_vmem [thread:$0]  %s9101_s2, 9216, %s44_s30, [#allocation7], %s6958_s16, %s6958_s16, %s6959_s17  }
   0xf   :  { %s6960_s20 = smov [#allocation9]   ;;  %s6961_s22 = smov [#allocation4]  }
  0x10   :  { %s71_s21 = sshll.u32 %s6960_s20, 4  ;;  %s31_s23 = sshll.u32 %s6961_s22, 4  ;;  %s72_s21 = int_to_ptr.vmem [resolvable:$true] %s71_s21  ;;  %s32_s23 = int_to_ptr.vmem [resolvable:$true] %s31_s23 }
  0x11   :  { %s6857_s24 = scalar_lea.vmem %s72_s21, 3072  ;;  %p6862_p6 = scmp.lt.s32.totalorder %s72_s21, %s72_s21 }
  0x12   :  { %p6858_p5 = scmp.ne.s32.totalorder %s72_s21, %s6857_s24  ;;  %p6863_p7 = scmp.lt.s32.totalorder %s6857_s24, %s6857_s24 }
  0x14   :  { %p6864_p8 = por %p6863_p7, %p6862_p6 }
  0x16   :  { %p6865_p9 = pnand %p6864_p8, %p6858_p5 }
  0x18   :  { %6868 = shalt.err (!%p6865_p9)
}
  0x19   :  { %77 = dma.hbm_to_vmem [thread:$0]  %s9105_s6, 3072, %s72_s21, [#allocation10], %s6958_s16, %s6958_s16, %s6959_s17  }
  0x1a   :  { %s6877_s27 = scalar_lea.vmem %s32_s23, 6144  ;;  %p6882_p11 = scmp.lt.s32.totalorder %s32_s23, %s32_s23 }
  0x1b   :  { %p6878_p10 = scmp.ne.s32.totalorder %s32_s23, %s6877_s27  ;;  %p6883_p12 = scmp.lt.s32.totalorder %s6877_s27, %s6877_s27 }
  0x1d   :  { %p6884_p13 = por %p6883_p12, %p6882_p11 }
  0x1f   :  { %p6885_p0 = pnand %p6884_p13, %p6878_p10 }
  0x21   :  { %6888 = shalt.err (!%p6885_p0)
}
  0x22   :  { %s6962_s2 = smov 384   ;;  %s6963_s28 = smov 24  }
  0x23   :  { %37 = dma.hbm_to_vmem [thread:$0]  %s9100_s1, 6144, %s32_s23, [#allocation5], %s6962_s2, %s6962_s2, %s6963_s28  }
  0x24   :  { %s6964_s15 = smov [#allocation8]   ;;  %s6965_s19 = smov [#allocation11]  }
  0x25   :  { %s55_s18 = sshll.u32 %s6964_s15, 4  ;;  %s83_s20 = sshll.u32 %s6965_s19, 4  ;;  %s56_s18 = int_to_ptr.vmem [resolvable:$true] %s55_s18  ;;  %s84_s20 = int_to_ptr.vmem [resolvable:$true] %s83_s20 }
  0x26   :  { %s6897_s6 = scalar_lea.vmem %s56_s18, 6144  ;;  %p6902_p2 = scmp.lt.s32.totalorder %s56_s18, %s56_s18 }
  0x27   :  { %p6898_p1 = scmp.ne.s32.totalorder %s56_s18, %s6897_s6  ;;  %p6903_p3 = scmp.lt.s32.totalorder %s6897_s6, %s6897_s6 }
  0x29   :  { %p6904_p4 = por %p6903_p3, %p6902_p2 }
  0x2b   :  { %p6905_p5 = pnand %p6904_p4, %p6898_p1 }
  0x2d   :  { %6908 = shalt.err (!%p6905_p5)
}
  0x2e   :  { %61 = dma.hbm_to_vmem [thread:$0]  %s9102_s3, 6144, %s56_s18, [#allocation7], %s6962_s2, %s6962_s2, %s6963_s28  }
  0x2f   :  { %s6917_s21 = scalar_lea.vmem %s84_s20, 6144  ;;  %p6922_p7 = scmp.lt.s32.totalorder %s84_s20, %s84_s20 }
  0x30   :  { %p6918_p6 = scmp.ne.s32.totalorder %s84_s20, %s6917_s21  ;;  %p6923_p8 = scmp.lt.s32.totalorder %s6917_s21, %s6917_s21 }
  0x32   :  { %p6924_p9 = por %p6923_p8, %p6922_p7 }
  0x34   :  { %p6925_p10 = pnand %p6924_p9, %p6918_p6 }
  0x36   :  { %6928 = shalt.err (!%p6925_p10)
}
  0x37   :  { %89 = dma.hbm_to_vmem [thread:$0]  %s9106_s7, 6144, %s84_s20, [#allocation10], %s6962_s2, %s6962_s2, %s6963_s28  }
  0x38   :  { %s6966_s23 = smov [#allocation12]  }
  0x39   :  { %s99_s24 = sshll.u32 %s6966_s23, 4  ;;  %s100_s24 = int_to_ptr.vmem [resolvable:$true] %s99_s24 }
  0x3a   :  { %s6937_s25 = scalar_lea.vmem %s100_s24, 2048  ;;  %p6942_p12 = scmp.lt.s32.totalorder %s100_s24, %s100_s24 }
  0x3b   :  { %p6938_p11 = scmp.ne.s32.totalorder %s100_s24, %s6937_s25  ;;  %p6943_p13 = scmp.lt.s32.totalorder %s6937_s25, %s6937_s25 }
  0x3d   :  { %p6944_p0 = por %p6943_p13, %p6942_p12 }
  0x3f   :  { %p6945_p1 = pnand %p6944_p0, %p6938_p11 }
  0x41   :  { %6948 = shalt.err (!%p6945_p1)
}
  0x42   :  { %s6967_s3 = smov 128   ;;  %s6968_s26 = smov 8  }
  0x43   :  { %105 = dma.hbm_to_vmem [thread:$0]  %s9109_s10, 2048, %s100_s24, [#allocation13], %s6967_s3, %s6967_s3, %s6968_s26  }
  0x44   :  { %6949 = dma.done.wait [#allocation5], 6144  }
  0x45   :  { %6950 = vsyncadd [#allocation5], 4294961152 }
  0x46   :  { %6951 = dma.done.wait [#allocation7], 15360  }
  0x47   :  { %6952 = vsyncadd [#allocation7], 4294951936 }
  0x48   :  { %6953 = dma.done.wait [#allocation10], 9216  }
  0x49   :  { %6954 = vsyncadd [#allocation10], 4294958080 }
  0x4a   :  { %6955 = dma.done.wait [#allocation13], 2048  }
  0x4b   :  { %6956 = vsyncadd [#allocation13], 4294965248  ;;  %v9114_v0 = vmov 0   ;;  %v9116_v1 = vmov 0.0   ;;  %v129_v2 = vld [vmem:[%s9099_s0 + $0x10] sm:$0xff]  ;;  %v127_v3 = vld [vmem:[%s9099_s0] sm:$0xff]  ;;  %v135_v60 = vlaneseq }
  0x4c   :  { %6604 = vset.pattern.permute.xlu1 %v9114_v0  ;;  %6603 = vset.pattern.permute.xlu0 %v9114_v0  ;;  %v130_v4 = vld [vmem:[%s9099_s0 + $0x18] sm:$0xff]  ;;  %v128_v5 = vld [vmem:[%s9099_s0 + $0x8] sm:$0xff]  ;;  %v231_v6 = vld [vmem:[#allocation4 + $0x170] sm:$0xff]  ;;  %vm6972_vm8 = vmmov 0  }
  0x4d   :  { %297 = vmatprep.mubr.f32.mxu0 %v9116_v1  ;;  %144 = vperm.xlu1 %6604, %v129_v2   ;;  %v230_v7 = vld [vmem:[#allocation4 + $0x168] sm:$0xff]  ;;  %v228_v8 = vld [vmem:[#allocation4 + $0x158] sm:$0xff]  ;;  %v227_v9 = vld [vmem:[#allocation4 + $0x150] sm:$0xff]  ;;  %v7094_v61 = vand.u32 127, %v135_v60 }
  0x4e   :  { %138 = vperm.xlu0 %6603, %v127_v3   ;;  %233 = vmatprep.subr.mxu0 %v231_v6  ;;  %v232_v10 = vld [vmem:[#allocation4 + $0x178] sm:$0xff]  ;;  %v225_v11 = vld [vmem:[#allocation4 + $0x140] sm:$0xff]  ;;  %v132_v13 = vld [vmem:[%s9099_s0 + $0x28] sm:$0xff] }
  0x4f   :  { %234 = vmatpush1.msra.mxu0 %v230_v7  ;;  %v229_v12 = vld [vmem:[#allocation4 + $0x160] sm:$0xff]  ;;  %5900 = vmatprep.subr.mxu1 %v232_v10  ;;  %v224_v15 = vld [vmem:[#allocation4 + $0x138] sm:$0xff]  ;;  %v222_v16 = vld [vmem:[#allocation4 + $0x128] sm:$0xff] }
  0x50   :  { %v131_v14 = vld [vmem:[%s9099_s0 + $0x20] sm:$0xff]  ;;  %235 = vmatprep.subr.mxu0 %v228_v8  ;;  %5901 = vmatpush3.msra.mxu1 %v232_v10  ;;  %v226_v17 = vld [vmem:[#allocation4 + $0x148] sm:$0xff]  ;;  %v134_v19 = vld [vmem:[%s9099_s0 + $0x38] sm:$0xff] }
  0x51   :  { %147 = vperm.xlu1 %6604, %v130_v4   ;;  %236 = vmatpush1.msra.mxu0 %v227_v9  ;;  %v221_v18 = vld [vmem:[#allocation4 + $0x120] sm:$0xff]  ;;  %v133_v20 = vld [vmem:[%s9099_s0 + $0x30] sm:$0xff]  ;;  %v218_v23 = vld [vmem:[#allocation4 + $0x108] sm:$0xff]  ;;  %v6971_v4 = vmov 1.0  }
  0x52   :  { %141 = vperm.xlu0 %6603, %v128_v5   ;;  %237 = vmatprep.subr.mxu0 %v225_v11  ;;  %v219_v21 = vld [vmem:[#allocation4 + $0x110] sm:$0xff]  ;;  %v216_v24 = vld [vmem:[#allocation4 + $0xf8] sm:$0xff]  ;;  %v213_v27 = vld [vmem:[#allocation4 + $0xe0] sm:$0xff] }
  0x53   :  { %5902 = vmatprep.subr.mxu1 %v229_v12  ;;  %238 = vmatpush1.msra.mxu0 %v224_v15  ;;  %v223_v22 = vld [vmem:[#allocation4 + $0x130] sm:$0xff]  ;;  %v220_v25 = vld [vmem:[#allocation4 + $0x118] sm:$0xff]  ;;  %v217_v28 = vld [vmem:[#allocation4 + $0x100] sm:$0xff] }
  0x54   :  { %5903 = vmatpush3.msra.mxu1 %v229_v12  ;;  %239 = vmatprep.subr.mxu0 %v222_v16  ;;  %v215_v26 = vld [vmem:[#allocation4 + $0xf0] sm:$0xff]  ;;  %v212_v29 = vld [vmem:[#allocation4 + $0xd8] sm:$0xff]  ;;  %v210_v30 = vld [vmem:[#allocation4 + $0xc8] sm:$0xff] }
  0x55   :  { %153 = vperm.xlu1 %6604, %v132_v13   ;;  %5904 = vmatprep.subr.mxu1 %v226_v17  ;;  %v209_v31 = vld [vmem:[#allocation4 + $0xc0] sm:$0xff]  ;;  %v207_v32 = vld [vmem:[#allocation4 + $0xb0] sm:$0xff]  ;;  %v214_v33 = vld [vmem:[#allocation4 + $0xe8] sm:$0xff] }
  0x56   :  { %150 = vperm.xlu0 %6603, %v131_v14   ;;  %240 = vmatpush1.msra.mxu0 %v221_v18  ;;  %v206_v34 = vld [vmem:[#allocation4 + $0xa8] sm:$0xff]  ;;  %v211_v35 = vld [vmem:[#allocation4 + $0xd0] sm:$0xff]  ;;  %v204_v36 = vld [vmem:[#allocation4 + $0x98] sm:$0xff] }
  0x57   :  { %5905 = vmatpush3.msra.mxu1 %v226_v17  ;;  %241 = vmatprep.subr.mxu0 %v219_v21  ;;  %v208_v37 = vld [vmem:[#allocation4 + $0xb8] sm:$0xff]  ;;  %v203_v38 = vld [vmem:[#allocation4 + $0x90] sm:$0xff]  ;;  %v201_v39 = vld [vmem:[#allocation4 + $0x80] sm:$0xff] }
  0x58   :  { %5906 = vmatprep.subr.mxu1 %v223_v22  ;;  %242 = vmatpush1.msra.mxu0 %v218_v23  ;;  %v205_v40 = vld [vmem:[#allocation4 + $0xa0] sm:$0xff]  ;;  %v200_v41 = vld [vmem:[#allocation4 + $0x78] sm:$0xff]  ;;  %v198_v42 = vld [vmem:[#allocation4 + $0x68] sm:$0xff] }
  0x59   :  { %159 = vperm.xlu1 %6604, %v134_v19   ;;  %5907 = vmatpush3.msra.mxu1 %v223_v22  ;;  %v202_v43 = vld [vmem:[#allocation4 + $0x88] sm:$0xff]  ;;  %v197_v44 = vld [vmem:[#allocation4 + $0x60] sm:$0xff]  ;;  %v195_v45 = vld [vmem:[#allocation4 + $0x50] sm:$0xff] }
  0x5a   :  { %156 = vperm.xlu0 %6603, %v133_v20   ;;  %243 = vmatprep.subr.mxu0 %v216_v24  ;;  %v199_v46 = vld [vmem:[#allocation4 + $0x70] sm:$0xff]  ;;  %v194_v47 = vld [vmem:[#allocation4 + $0x48] sm:$0xff]  ;;  %v192_v48 = vld [vmem:[#allocation4 + $0x38] sm:$0xff] }
  0x5b   :  { %5908 = vmatprep.subr.mxu1 %v220_v25  ;;  %244 = vmatpush1.msra.mxu0 %v215_v26  ;;  %v196_v49 = vld [vmem:[#allocation4 + $0x58] sm:$0xff]  ;;  %v191_v50 = vld [vmem:[#allocation4 + $0x30] sm:$0xff]  ;;  %v189_v51 = vld [vmem:[#allocation4 + $0x20] sm:$0xff] }
  0x5c   :  { %5909 = vmatpush3.msra.mxu1 %v220_v25  ;;  %245 = vmatprep.subr.mxu0 %v213_v27  ;;  %v193_v52 = vld [vmem:[#allocation4 + $0x40] sm:$0xff]  ;;  %v188_v53 = vld [vmem:[#allocation4 + $0x18] sm:$0xff]  ;;  %v186_v54 = vld [vmem:[#allocation4 + $0x8] sm:$0xff] }
  0x5d   :  { %5910 = vmatprep.subr.mxu1 %v217_v28  ;;  %246 = vmatpush1.msra.mxu0 %v212_v29  ;;  %v185_v55 = vld [vmem:[#allocation4] sm:$0xff]  ;;  %v190_v56 = vld [vmem:[#allocation4 + $0x28] sm:$0xff]  ;;  %v187_v57 = vld [vmem:[#allocation4 + $0x10] sm:$0xff] }
  0x5e   :  { %5911 = vmatpush3.msra.mxu1 %v217_v28  ;;  %247 = vmatprep.subr.mxu0 %v210_v30  ;;  %v6607_v58 = vld [vmem:[#allocation6 + $0xac] ss:$12 sps:$4 sm:$0xff]   ;;  %v6605_v62 = vld [vmem:[#allocation6 + $0xa8] ss:$12 sps:$4 sm:$0xff]   ;;  %v6608_v7 = vld [vmem:[#allocation6 + $0x90] ss:$12 sps:$4 sm:$0xff]  }
  0x5f   :  { %5912 = vmatprep.subr.mxu1 %v214_v33  ;;  %248 = vmatpush1.msra.mxu0 %v209_v31  ;;  %v6631_v59 = vld [vmem:[#allocation6 + $0x22c] ss:$12 sps:$4 sm:$0xff]   ;;  %v6610_v3 = vld [vmem:[#allocation6 + $0x94] ss:$12 sps:$4 sm:$0xff]   ;;  %v6613_v9 = vld [vmem:[#allocation6 + $0x7c] ss:$12 sps:$4 sm:$0xff]  }
  0x60   :  { %5913 = vmatpush3.msra.mxu1 %v214_v33  ;;  %249 = vmatprep.subr.mxu0 %v207_v32  ;;  %v6629_v8 = vld [vmem:[#allocation6 + $0x228] ss:$12 sps:$4 sm:$0xff]   ;;  %v6611_v13 = vld [vmem:[#allocation6 + $0x78] ss:$12 sps:$4 sm:$0xff]   ;;  %v6635_v14 = vld [vmem:[#allocation6 + $0x210] ss:$12 sps:$4 sm:$0xff]  }
  0x61   :  { %5914 = vmatprep.subr.mxu1 %v211_v35  ;;  %250 = vmatpush1.msra.mxu0 %v206_v34  ;;  %v6637_v10 = vld [vmem:[#allocation6 + $0x214] ss:$12 sps:$4 sm:$0xff]   ;;  %v6616_v15 = vld [vmem:[#allocation6 + $0x64] ss:$12 sps:$4 sm:$0xff]   ;;  %v6643_v16 = vld [vmem:[#allocation6 + $0x1fc] ss:$12 sps:$4 sm:$0xff]  }
  0x62   :  { %5915 = vmatpush3.msra.mxu1 %v211_v35  ;;  %251 = vmatprep.subr.mxu0 %v204_v36  ;;  %v6614_v18 = vld [vmem:[#allocation6 + $0x60] ss:$12 sps:$4 sm:$0xff]   ;;  %v6641_v19 = vld [vmem:[#allocation6 + $0x1f8] ss:$12 sps:$4 sm:$0xff]   ;;  %v6617_v23 = vld [vmem:[#allocation6 + $0x48] ss:$12 sps:$4 sm:$0xff]  }
  0x63   :  { %5916 = vmatprep.subr.mxu1 %v208_v37  ;;  %252 = vmatpush1.msra.mxu0 %v203_v38  ;;  %v6619_v20 = vld [vmem:[#allocation6 + $0x4c] ss:$12 sps:$4 sm:$0xff]   ;;  %v6649_v21 = vld [vmem:[#allocation6 + $0x1e4] ss:$12 sps:$4 sm:$0xff]   ;;  %v6622_v25 = vld [vmem:[#allocation6 + $0x34] ss:$12 sps:$4 sm:$0xff]  }
  0x64   :  { %5917 = vmatpush3.msra.mxu1 %v208_v37  ;;  %253 = vmatprep.subr.mxu0 %v201_v39  ;;  %v6647_v24 = vld [vmem:[#allocation6 + $0x1e0] ss:$12 sps:$4 sm:$0xff]   ;;  %v6620_v27 = vld [vmem:[#allocation6 + $0x30] ss:$12 sps:$4 sm:$0xff]   ;;  %v6653_v28 = vld [vmem:[#allocation6 + $0x1c8] ss:$12 sps:$4 sm:$0xff]  }
  0x65   :  { %5918 = vmatprep.subr.mxu1 %v205_v40  ;;  %254 = vmatpush1.msra.mxu0 %v200_v41  ;;  %v6655_v26 = vld [vmem:[#allocation6 + $0x1cc] ss:$12 sps:$4 sm:$0xff]   ;;  %v6625_v29 = vld [vmem:[#allocation6 + $0x1c] ss:$12 sps:$4 sm:$0xff]   ;;  %v6661_v30 = vld [vmem:[#allocation6 + $0x1b4] ss:$12 sps:$4 sm:$0xff]  }
  0x66   :  { %5919 = vmatpush3.msra.mxu1 %v205_v40  ;;  %255 = vmatprep.subr.mxu0 %v198_v42  ;;  %v6623_v31 = vld [vmem:[#allocation6 + $0x18] ss:$12 sps:$4 sm:$0xff]   ;;  %v6659_v32 = vld [vmem:[#allocation6 + $0x1b0] ss:$12 sps:$4 sm:$0xff]   ;;  %v6626_v34 = vld [vmem:[#allocation6] ss:$12 sps:$4 sm:$0xff]  }
  0x67   :  { %5920 = vmatprep.subr.mxu1 %v202_v43  ;;  %256 = vmatpush1.msra.mxu0 %v197_v44  ;;  %v6628_v33 = vld [vmem:[#allocation6 + $0x4] ss:$12 sps:$4 sm:$0xff]   ;;  %v6634_v35 = vld [vmem:[#allocation6 + $0x16c] ss:$12 sps:$4 sm:$0xff]   ;;  %v6632_v36 = vld [vmem:[#allocation6 + $0x168] ss:$12 sps:$4 sm:$0xff]  }
  0x68   :  { %5921 = vmatpush3.msra.mxu1 %v202_v43  ;;  %257 = vmatprep.subr.mxu0 %v195_v45  ;;  %v6640_v37 = vld [vmem:[#allocation6 + $0x154] ss:$12 sps:$4 sm:$0xff]   ;;  %v6638_v38 = vld [vmem:[#allocation6 + $0x150] ss:$12 sps:$4 sm:$0xff]   ;;  %v6644_v40 = vld [vmem:[#allocation6 + $0x138] ss:$12 sps:$4 sm:$0xff]  }
  0x69   :  { %5922 = vmatprep.subr.mxu1 %v199_v46  ;;  %258 = vmatpush1.msra.mxu0 %v194_v47  ;;  %v6646_v39 = vld [vmem:[#allocation6 + $0x13c] ss:$12 sps:$4 sm:$0xff]   ;;  %v6652_v41 = vld [vmem:[#allocation6 + $0x124] ss:$12 sps:$4 sm:$0xff]   ;;  %v6650_v42 = vld [vmem:[#allocation6 + $0x120] ss:$12 sps:$4 sm:$0xff]  }
  0x6a   :  { %5923 = vmatpush3.msra.mxu1 %v199_v46  ;;  %259 = vmatprep.subr.mxu0 %v192_v48  ;;  %v6658_v43 = vld [vmem:[#allocation6 + $0x10c] ss:$12 sps:$4 sm:$0xff]   ;;  %v6656_v44 = vld [vmem:[#allocation6 + $0x108] ss:$12 sps:$4 sm:$0xff]   ;;  %v6662_v46 = vld [vmem:[#allocation6 + $0xf0] ss:$12 sps:$4 sm:$0xff]  }
  0x6b   :  { %5924 = vmatprep.subr.mxu1 %v196_v49  ;;  %260 = vmatpush1.msra.mxu0 %v191_v50  ;;  %v6664_v45 = vld [vmem:[#allocation6 + $0xf4] ss:$12 sps:$4 sm:$0xff]   ;;  %v6667_v47 = vld [vmem:[#allocation6 + $0x19c] ss:$12 sps:$4 sm:$0xff]   ;;  %v6665_v48 = vld [vmem:[#allocation6 + $0x198] ss:$12 sps:$4 sm:$0xff]  }
  0x6c   :  { %5925 = vmatpush3.msra.mxu1 %v196_v49  ;;  %261 = vmatprep.subr.mxu0 %v189_v51  ;;  %v6670_v49 = vld [vmem:[#allocation6 + $0xdc] ss:$12 sps:$4 sm:$0xff]   ;;  %v6668_v50 = vld [vmem:[#allocation6 + $0xd8] ss:$12 sps:$4 sm:$0xff]  }
  0x6d   :  { %5926 = vmatprep.subr.mxu1 %v193_v52  ;;  %262 = vmatpush1.msra.mxu0 %v188_v53  ;;  %v6673_v51 = vld [vmem:[#allocation6 + $0x184] ss:$12 sps:$4 sm:$0xff]  }
  0x6e   :  { %5927 = vmatpush3.msra.mxu1 %v193_v52  ;;  %263 = vmatprep.subr.mxu0 %v186_v54  ;;  %v6671_v52 = vld [vmem:[#allocation6 + $0x180] ss:$12 sps:$4 sm:$0xff]   ;;  %v6676_v53 = vld [vmem:[#allocation6 + $0xc4] ss:$12 sps:$4 sm:$0xff]  }
  0x6f   :  { %5928 = vmatprep.subr.mxu1 %v190_v56  ;;  %264 = vmatpush1.msra.mxu0 %v185_v55  ;;  %v6674_v54 = vld [vmem:[#allocation6 + $0xc0] ss:$12 sps:$4 sm:$0xff]   ;;  %v6677_v55 = vld [vmem:[#allocation6 + $0x170] ss:$12 sps:$4 sm:$0xff]  }
  0x70   :  { %5929 = vmatpush3.msra.mxu1 %v190_v56  ;;  %1008 = vmatprep.subr.bf16.mxu0 %v6607_v58  ;;  %v6679_v56 = vld [vmem:[#allocation6 + $0x230] ss:$12 sps:$4 sm:$0xff]  }
  0x71   :  { %5930 = vmatprep.subr.mxu1 %v187_v57 }
  0x72   :  { %5931 = vmatpush3.msra.mxu1 %v187_v57 }
  0x73   :  { %1081 = vmatprep.subr.bf16.mxu1 %v6631_v59 }
  0xc8   :  { %v145_v63 = vpop.permute.xlu1 %144 }
  0xc9   :  { %v139_v2 = vpop.permute.xlu0 %138  ;;  %vm163_vm1 = vcmp.eq.s32.totalorder %v145_v63, %v7094_v61 }
  0xca   :  { %vm161_vm0 = vcmp.eq.s32.totalorder %v139_v2, %v7094_v61  ;;  %v6678_v2 = vld [vmem:[#allocation6 + $0xb0] ss:$12 sps:$4 sm:$0xff]  }
  0xcb   :  { %5410 = vmatmul.mubr.msk.f32.vlgmr.msra.gmra.mxu0 %vm161_vm0, %v6971_v4  ;;  %5932 = vmatprep.mubr.msk.f32.mxu1 %vm161_vm0, %v6971_v4 }
  0xcc   :  { %303 = vmatprep.mubr.f32.mxu0 %v9116_v1  ;;  %1009 = vmatpush1.bf16.msra.mxu0 %v6605_v62  ;;  %v148_v5 = vpop.permute.xlu1 %147 }
  0xcd   :  { %v142_v6 = vpop.permute.xlu0 %141  ;;  %1010 = vmatprep.subr.bf16.mxu0 %v6610_v3  ;;  %vm164_vm3 = vcmp.eq.s32.totalorder %v148_v5, %v7094_v61  ;;  %v6680_v5 = vld [vmem:[#allocation6 + $0x158] ss:$12 sps:$4 sm:$0xff]  }
  0xce   :  { %vm162_vm2 = vcmp.eq.s32.totalorder %v142_v6, %v7094_v61 }
  0xcf   :  { %5411 = vmatmul.mubr.msk.f32.gmra.mxu0 %vm162_vm2, %v6971_v4  ;;  %5933 = vmatmul.mubr.msk.f32.vlgmr.msra.gmra.mxu1 %vm162_vm2, %v6971_v4 }
  0xd0   :  { %309 = vmatprep.mubr.f32.mxu0 %v9116_v1  ;;  %5935 = vmatprep.mubr.msk.f32.mxu1 %vm163_vm1, %v6971_v4  ;;  %v154_v11 = vpop.permute.xlu1 %153 }
  0xd1   :  { %v151_v12 = vpop.permute.xlu0 %150  ;;  %1011 = vmatpush1.bf16.msra.mxu0 %v6608_v7  ;;  %1082 = vmatpush1.bf16.msra.mxu1 %v6629_v8  ;;  %vm166_vm5 = vcmp.eq.s32.totalorder %v154_v11, %v7094_v61  ;;  %v6681_v11 = vld [vmem:[#allocation6 + $0x98] ss:$12 sps:$4 sm:$0xff]  }
  0xd2   :  { %vm165_vm4 = vcmp.eq.s32.totalorder %v151_v12, %v7094_v61  ;;  %1012 = vmatprep.subr.bf16.mxu0 %v6613_v9  ;;  %1083 = vmatprep.subr.bf16.mxu1 %v6637_v10  ;;  %v6682_v9 = vld [vmem:[#allocation6 + $0x218] ss:$12 sps:$4 sm:$0xff]   ;;  %v6683_v12 = vld [vmem:[#allocation6 + $0x140] ss:$12 sps:$4 sm:$0xff]  }
  0xd3   :  { %5412 = vmatmul.mubr.msk.f32.gmra.mxu0 %vm163_vm1, %v6971_v4  ;;  %5936 = vmatmul.mubr.msk.f32.gmra.mxu1 %vm164_vm3, %v6971_v4 }
  0xd4   :  { %5938 = vmatprep.mubr.msk.f32.mxu1 %vm165_vm4, %v6971_v4  ;;  %315 = vmatprep.mubr.f32.mxu0 %v9116_v1  ;;  %v160_v22 = vpop.permute.xlu1 %159 }
  0xd5   :  { %v157_v17 = vpop.permute.xlu0 %156  ;;  %1013 = vmatpush1.bf16.msra.mxu0 %v6611_v13  ;;  %1084 = vmatpush1.bf16.msra.mxu1 %v6635_v14  ;;  %vm168_vm7 = vcmp.eq.s32.totalorder %v160_v22, %v7094_v61 }
  0xd6   :  { %vm167_vm6 = vcmp.eq.s32.totalorder %v157_v17, %v7094_v61  ;;  %1014 = vmatprep.subr.bf16.mxu0 %v6616_v15  ;;  %1085 = vmatprep.subr.bf16.mxu1 %v6643_v16  ;;  %v6685_v15 = vld [vmem:[#allocation6 + $0x200] ss:$12 sps:$4 sm:$0xff]  }
  0xd7   :  { %5413 = vmatmul.mubr.msk.f32.gmra.mxu0 %vm164_vm3, %v6971_v4  ;;  %5939 = vmatmul.mubr.msk.f32.gmra.mxu1 %vm166_vm5, %v6971_v4  ;;  %v6684_v17 = vld [vmem:[#allocation6 + $0x80] ss:$12 sps:$4 sm:$0xff]  }
  0xd8   :  { %5941 = vmatprep.mubr.msk.f32.mxu1 %vm167_vm6, %v6971_v4  ;;  %321 = vmatprep.mubr.f32.mxu0 %v9116_v1 }
  0xd9   :  { %1015 = vmatpush1.bf16.msra.mxu0 %v6614_v18  ;;  %1086 = vmatpush1.bf16.msra.mxu1 %v6641_v19 }
  0xda   :  { %1016 = vmatprep.subr.bf16.mxu0 %v6619_v20  ;;  %1087 = vmatprep.subr.bf16.mxu1 %v6649_v21  ;;  %v6686_v20 = vld [vmem:[#allocation6 + $0x128] ss:$12 sps:$4 sm:$0xff]  }
  0xdb   :  { %5414 = vmatmul.mubr.msk.f32.gmra.mxu0 %vm165_vm4, %v6971_v4  ;;  %5942 = vmatmul.mubr.msk.f32.gmra.mxu1 %vm168_vm7, %v6971_v4 }
  0xdc   :  { %327 = vmatprep.mubr.f32.mxu0 %v9116_v1  ;;  %1113 = vmatprep.mubr.bf16.mxu1 %v9114_v0 }
  0xdd   :  { %1017 = vmatpush1.bf16.msra.mxu0 %v6617_v23  ;;  %1088 = vmatpush1.bf16.msra.mxu1 %v6647_v24  ;;  %v6688_v24 = vld [vmem:[#allocation6 + $0x1e8] ss:$12 sps:$4 sm:$0xff]  }
  0xde   :  { %1018 = vmatprep.subr.bf16.mxu0 %v6622_v25  ;;  %1089 = vmatprep.subr.bf16.mxu1 %v6655_v26  ;;  %v6687_v26 = vld [vmem:[#allocation6 + $0x68] ss:$12 sps:$4 sm:$0xff]  }
  0xdf   :  { %5415 = vmatmul.mubr.msk.f32.gmra.mxu0 %vm166_vm5, %v6971_v4 }
  0xe0   :  { %333 = vmatprep.mubr.f32.mxu0 %v9116_v1 }
  0xe1   :  { %1019 = vmatpush1.bf16.msra.mxu0 %v6620_v27  ;;  %1090 = vmatpush1.bf16.msra.mxu1 %v6653_v28  ;;  %v6689_v27 = vld [vmem:[#allocation6 + $0x110] ss:$12 sps:$4 sm:$0xff]  }
  0xe2   :  { %1020 = vmatprep.subr.bf16.mxu0 %v6625_v29  ;;  %1091 = vmatprep.subr.bf16.mxu1 %v6661_v30  ;;  %v6691_v30 = vld [vmem:[#allocation6 + $0x1d0] ss:$12 sps:$4 sm:$0xff]  }
  0xe3   :  { %5416 = vmatmul.mubr.msk.f32.gmra.mxu0 %vm167_vm6, %v6971_v4 }
  0xe4   :  { %339 = vmatprep.mubr.f32.mxu0 %v9116_v1 }
  0xe5   :  { %1021 = vmatpush1.bf16.msra.mxu0 %v6623_v31  ;;  %1092 = vmatpush1.bf16.msra.mxu1 %v6659_v32  ;;  %v6690_v32 = vld [vmem:[#allocation6 + $0x50] ss:$12 sps:$4 sm:$0xff]  }
  0xe6   :  { %1022 = vmatprep.subr.bf16.mxu0 %v6628_v33  ;;  %1093 = vmatprep.subr.bf16.mxu1 %v6667_v47  ;;  %v6696_v47 = vld [vmem:[#allocation6 + $0x20] ss:$12 sps:$4 sm:$0xff]  }
  0xe7   :  { %5417 = vmatmul.mubr.msk.f32.gmra.mxu0 %vm168_vm7, %v6971_v4 }
  0xe9   :  { %1023 = vmatpush1.bf16.msra.mxu0 %v6626_v34  ;;  %1094 = vmatpush1.bf16.msra.mxu1 %v6665_v48 }
  0xea   :  { %1024 = vmatprep.subr.bf16.mxu0 %v6634_v35  ;;  %1095 = vmatprep.subr.bf16.mxu1 %v6673_v51  ;;  %v6692_v35 = vld [vmem:[#allocation6 + $0xf8] ss:$12 sps:$4 sm:$0xff]   ;;  %v6698_v51 = vld [vmem:[#allocation6 + $0xc8] ss:$12 sps:$4 sm:$0xff]  }
  0xed   :  { %1025 = vmatpush2.bf16.msra.mxu0 %v6632_v36  ;;  %1096 = vmatpush1.bf16.msra.mxu1 %v6671_v52  ;;  %v6700_v52 = vld [vmem:[#allocation6 + $0x188] ss:$12 sps:$4 sm:$0xff]  }
  0xee   :  { %1026 = vmatprep.subr.bf16.mxu0 %v6640_v37  ;;  %5547 = vmatprep.subr.bf16.mxu1 %v6677_v55  ;;  %v7190_v55 = vld [vmem:[#allocation8 + $0x168] sm:$0xff] }
  0xf1   :  { %1027 = vmatpush2.bf16.msra.mxu0 %v6638_v38 }
  0xf2   :  { %1028 = vmatprep.subr.bf16.mxu0 %v6646_v39  ;;  %v6694_v39 = vld [vmem:[#allocation6 + $0x1b8] ss:$12 sps:$4 sm:$0xff]  }
  0xf5   :  { %1029 = vmatpush2.bf16.msra.mxu0 %v6644_v40 }
  0xf6   :  { %1030 = vmatprep.subr.bf16.mxu0 %v6652_v41  ;;  %v6693_v41 = vld [vmem:[#allocation6 + $0x38] ss:$12 sps:$4 sm:$0xff]  }
  0xf9   :  { %1031 = vmatpush2.bf16.msra.mxu0 %v6650_v42  ;;  %v6695_v42 = vld [vmem:[#allocation6 + $0xe0] ss:$12 sps:$4 sm:$0xff]  }
  0xfa   :  { %1032 = vmatprep.subr.bf16.mxu0 %v6658_v43 }
  0xfd   :  { %1033 = vmatpush2.bf16.msra.mxu0 %v6656_v44 }
  0xfe   :  { %1034 = vmatprep.subr.bf16.mxu0 %v6664_v45  ;;  %v6697_v45 = vld [vmem:[#allocation6 + $0x1a0] ss:$12 sps:$4 sm:$0xff]  }
 0x101   :  { %1035 = vmatpush2.bf16.msra.mxu0 %v6662_v46 }
 0x102   :  { %1036 = vmatprep.subr.bf16.mxu0 %v6670_v49 }
 0x105   :  { %1037 = vmatpush2.bf16.msra.mxu0 %v6668_v50 }
 0x106   :  { %1038 = vmatprep.subr.bf16.mxu0 %v6676_v53  ;;  %v6699_v53 = vld [vmem:[#allocation6 + $0x8] ss:$12 sps:$4 sm:$0xff]  }
 0x109   :  { %1039 = vmatpush2.bf16.msra.mxu0 %v6674_v54  ;;  %v7187_v54 = vld [vmem:[#allocation8 + $0x170] sm:$0xff] }
 0x10a   :  { %5944 = vmatprep.subr.bf16.mxu0 %v6679_v56 }
 0x18b   :  { %v299_v57 = vpop.f32.mrf.mxu0 }
 0x18d   :  { %v301_v58 = vpop.f32.mrf.mxu0 }
 0x18f   :  { %v305_v59 = vpop.f32.mrf.mxu0  ;;  %v5934_v61 = vpop.f32.mrf.mxu1 }
 0x190   :  { %v7156_v6 = vpack.c.bf16 %v305_v59, %v299_v57  ;;  %v7196_v57 = vld [vmem:[#allocation8 + $0x150] sm:$0xff]  ;;  %v7202_v59 = vld [vmem:[#allocation8 + $0x178] sm:$0xff] }
 0x191   :  { %v307_v62 = vpop.f32.mrf.mxu0  ;;  %v412_v63 = vpop.f32.mrf.mxu1 }
 0x192   :  { %v7152_v3 = vpack.c.bf16 %v307_v62, %v301_v58  ;;  %v7154_v4 = vpack.c.bf16 %v5934_v61, %v412_v63  ;;  %v7200_v58 = vld [vmem:[#allocation8 + $0x140] sm:$0xff]  ;;  %v7206_v61 = vld [vmem:[#allocation8 + $0x138] sm:$0xff]  ;;  %v7209_v62 = vld [vmem:[#allocation8 + $0x128] sm:$0xff] }
 0x193   :  { %v311_v7 = vpop.f32.mrf.mxu0  ;;  %v5937_v8 = vpop.f32.mrf.mxu1  ;;  %v7211_v63 = vld [vmem:[#allocation8 + $0x160] sm:$0xff] }
 0x194   :  { %1040 = vmatprep.mubr.bf16.mxu0 %v7152_v3  ;;  %1114 = vmatmul.mubr.bf16.vlgmr.msra.gmra.mxu1 %v7154_v4 }
 0x195   :  { %5548 = vmatpush3.bf16.msra.mxu1 %v6678_v2  ;;  %v313_v10 = vpop.f32.mrf.mxu0  ;;  %1041 = vmatmul.mubr.bf16.vlgmr.msra.gmra.mxu0 %v7156_v6  ;;  %v422_v13 = vpop.f32.mrf.mxu1  ;;  %v7214_v2 = vld [vmem:[#allocation8 + $0x120] sm:$0xff] }
 0x196   :  { %5945 = vmatpush3.bf16.msra.mxu0 %v6679_v56  ;;  %5549 = vmatprep.subr.bf16.mxu1 %v6680_v5  ;;  %v7162_v18 = vpack.c.bf16 %v5937_v8, %v422_v13  ;;  %v7192_v56 = vld [vmem:[#allocation8 + $0x158] sm:$0xff]  ;;  %v7237_v8 = vld [vmem:[#allocation8 + $0xe0] sm:$0xff] }
 0x197   :  { %v317_v14 = vpop.f32.mrf.mxu0  ;;  %5946 = vmatprep.subr.bf16.mxu0 %v6682_v9  ;;  %1123 = vmatprep.mubr.bf16.mxu1 %v9114_v0  ;;  %v5940_v22 = vpop.f32.mrf.mxu1  ;;  %v7226_v5 = vld [vmem:[#allocation8 + $0xf8] sm:$0xff] }
 0x198   :  { %v7166_v21 = vpack.c.bf16 %v317_v14, %v311_v7  ;;  %v7233_v7 = vld [vmem:[#allocation8 + $0x148] sm:$0xff]  ;;  %v7252_v13 = vld [vmem:[#allocation8 + $0x118] sm:$0xff]  ;;  %v7255_v14 = vld [vmem:[#allocation8 + $0xb0] sm:$0xff] }
 0x199   :  { %5550 = vmatpush3.bf16.msra.mxu1 %v6681_v11  ;;  %v319_v16 = vpop.f32.mrf.mxu0  ;;  %v432_v28 = vpop.f32.mrf.mxu1  ;;  %v7245_v11 = vld [vmem:[#allocation8 + $0xc8] sm:$0xff] }
 0x19a   :  { %v7164_v19 = vpack.c.bf16 %v319_v16, %v313_v10  ;;  %5947 = vmatpush3.bf16.msra.mxu0 %v6682_v9  ;;  %5551 = vmatprep.subr.bf16.mxu1 %v6683_v12  ;;  %v507_v33 = vpack.c.bf16 %v5940_v22, %v432_v28  ;;  %v7240_v9 = vld [vmem:[#allocation8 + $0xd8] sm:$0xff]  ;;  %v7242_v10 = vld [vmem:[#allocation8 + $0x130] sm:$0xff]  ;;  %v7249_v12 = vld [vmem:[#allocation8 + $0xc0] sm:$0xff] }
 0x19b   :  { %v323_v23 = vpop.f32.mrf.mxu0  ;;  %5948 = vmatprep.subr.bf16.mxu0 %v6685_v15  ;;  %v5943_v36 = vpop.f32.mrf.mxu1  ;;  %v7263_v16 = vld [vmem:[#allocation8 + $0x98] sm:$0xff]  ;;  %v7283_v22 = vld [vmem:[#allocation8 + $0x68] sm:$0xff]  ;;  %v7306_v28 = vld [vmem:[#allocation8 + $0x30] sm:$0xff] }
 0x19c   :  { %1050 = vmatprep.mubr.bf16.mxu0 %v7164_v19  ;;  %1124 = vmatmul.mubr.bf16.gmra.mxu1 %v7162_v18  ;;  %9210 = vst [vmem:[#allocation20_spill] sm:$0xff] %v7283_v22  ;;  %9215 = vst [vmem:[#allocation25_spill] sm:$0xff] %v7306_v28 }
 0x19d   :  { %5552 = vmatpush3.bf16.msra.mxu1 %v6684_v17  ;;  %v325_v25 = vpop.f32.mrf.mxu0  ;;  %1051 = vmatmul.mubr.bf16.gmra.mxu0 %v7166_v21  ;;  %v442_v43 = vpop.f32.mrf.mxu1  ;;  %v7268_v17 = vld [vmem:[#allocation8 + $0x90] sm:$0xff] }
 0x19e   :  { %5949 = vmatpush3.bf16.msra.mxu0 %v6685_v15  ;;  %5553 = vmatprep.subr.bf16.mxu1 %v6686_v20  ;;  %v510_v48 = vpack.c.bf16 %v5943_v36, %v442_v43  ;;  %v7259_v15 = vld [vmem:[#allocation8 + $0xa8] sm:$0xff]  ;;  %v7277_v20 = vld [vmem:[#allocation8 + $0x78] sm:$0xff]  ;;  %v7334_v36 = vld [vmem:[#allocation8 + $0x70] sm:$0xff] }
 0x19f   :  { %v329_v29 = vpop.f32.mrf.mxu0  ;;  %5950 = vmatprep.subr.bf16.mxu0 %v6688_v24  ;;  %1133 = vmatprep.mubr.bf16.mxu1 %v9114_v0  ;;  %9209 = vst [vmem:[#allocation19_spill] sm:$0xff] %v7277_v20  ;;  %9222 = vst [vmem:[#allocation32_spill] sm:$0xff] %v7334_v36 }
 0x1a0   :  { %v7174_v37 = vpack.c.bf16 %v329_v29, %v323_v23  ;;  %v7287_v23 = vld [vmem:[#allocation8 + $0x60] sm:$0xff]  ;;  %v7308_v29 = vld [vmem:[#allocation8 + $0xb8] sm:$0xff] }
 0x1a1   :  { %5554 = vmatpush3.bf16.msra.mxu1 %v6687_v26  ;;  %v331_v31 = vpop.f32.mrf.mxu0  ;;  %9211 = vst [vmem:[#allocation21_spill] sm:$0xff] %v7287_v23  ;;  %v7297_v26 = vld [vmem:[#allocation8 + $0x48] sm:$0xff] }
 0x1a2   :  { %v7172_v34 = vpack.c.bf16 %v331_v31, %v325_v25  ;;  %5951 = vmatpush3.bf16.msra.mxu0 %v6688_v24  ;;  %5555 = vmatprep.subr.bf16.mxu1 %v6689_v27  ;;  %v7290_v24 = vld [vmem:[#allocation8 + $0xd0] sm:$0xff]  ;;  %9213 = vst [vmem:[#allocation23_spill] sm:$0xff] %v7297_v26  ;;  %v7301_v27 = vld [vmem:[#allocation8 + $0x38] sm:$0xff] }
 0x1a3   :  { %v335_v38 = vpop.f32.mrf.mxu0  ;;  %5952 = vmatprep.subr.bf16.mxu0 %v6691_v30  ;;  %v7293_v25 = vld [vmem:[#allocation8 + $0x50] sm:$0xff]  ;;  %9214 = vst [vmem:[#allocation24_spill] sm:$0xff] %v7301_v27  ;;  %v7315_v31 = vld [vmem:[#allocation8 + $0x18] sm:$0xff] }
 0x1a4   :  { %1060 = vmatprep.mubr.bf16.mxu0 %v7172_v34  ;;  %1134 = vmatmul.mubr.bf16.gmra.mxu1 %v507_v33  ;;  %9212 = vst [vmem:[#allocation22_spill] sm:$0xff] %v7293_v25  ;;  %9217 = vst [vmem:[#allocation27_spill] sm:$0xff] %v7315_v31 }
 0x1a5   :  { %5556 = vmatpush3.bf16.msra.mxu1 %v6690_v32  ;;  %v337_v40 = vpop.f32.mrf.mxu0  ;;  %1061 = vmatmul.mubr.bf16.gmra.mxu0 %v7174_v37  ;;  %v7318_v32 = vld [vmem:[#allocation8 + $0xa0] sm:$0xff] }
 0x1a6   :  { %5953 = vmatpush3.bf16.msra.mxu0 %v6691_v30  ;;  %5557 = vmatprep.subr.bf16.mxu1 %v6692_v35  ;;  %v7311_v30 = vld [vmem:[#allocation8 + $0x20] sm:$0xff]  ;;  %9218 = vst [vmem:[#allocation28_spill] sm:$0xff] %v7318_v32  ;;  %v7328_v35 = vld [vmem:[#allocation8 + $0x88] sm:$0xff] }
 0x1a7   :  { %v341_v44 = vpop.f32.mrf.mxu0  ;;  %5954 = vmatprep.subr.bf16.mxu0 %v6694_v39  ;;  %1143 = vmatprep.mubr.bf16.mxu1 %v9114_v0  ;;  %9216 = vst [vmem:[#allocation26_spill] sm:$0xff] %v7311_v30  ;;  %9221 = vst [vmem:[#allocation31_spill] sm:$0xff] %v7328_v35 }
 0x1a8   :  { %v7181_v50 = vpack.c.bf16 %v341_v44, %v335_v38  ;;  %v7346_v38 = vld [vmem:[#allocation8 + $0x40] sm:$0xff] }
 0x1a9   :  { %5558 = vmatpush3.bf16.msra.mxu1 %v6693_v41  ;;  %v343_v46 = vpop.f32.mrf.mxu0  ;;  %9224 = vst [vmem:[#allocation34_spill] sm:$0xff] %v7346_v38  ;;  %v7430_v41 = vshrl.u32 %v135_v60, 7  ;;  %v7440_v44 = vld [vmem:[%s9103_s4] sm:$0x7] }
 0x1aa   :  { %v7179_v49 = vpack.c.bf16 %v343_v46, %v337_v40  ;;  %5955 = vmatpush3.bf16.msra.mxu0 %v6694_v39  ;;  %5559 = vmatprep.subr.bf16.mxu1 %v6695_v42  ;;  %v7352_v39 = vld [vmem:[#allocation8 + $0x28] sm:$0xff]  ;;  %v7358_v40 = vld [vmem:[#allocation8 + $0x10] sm:$0xff] }
 0x1ab   :  { %5956 = vmatprep.subr.bf16.mxu0 %v6697_v45  ;;  %9225 = vst [vmem:[#allocation35_spill] sm:$0xff] %v7352_v39  ;;  %9226 = vst [vmem:[#allocation36_spill] sm:$0xff] %v7358_v40  ;;  %v7433_v42 = vsub.s32 0, %v7430_v41  ;;  %v7445_v46 = vsub.s32 1, %v7430_v41 }
 0x1ac   :  { %1070 = vmatprep.mubr.bf16.mxu0 %v7179_v49  ;;  %1144 = vmatmul.mubr.bf16.gmra.mxu1 %v510_v48 }
 0x1ad   :  { %5560 = vmatpush3.bf16.msra.mxu1 %v6696_v47  ;;  %1071 = vmatmul.mubr.bf16.gmra.mxu0 %v7181_v50  ;;  %9227 = vst [vmem:[#allocation37_spill] sm:$0xff] %v7433_v42  ;;  %9228 = vst [vmem:[#allocation38_spill] sm:$0xff] %v7445_v46  ;;  %v7453_v60 = vrot.slane %v7440_v44, %v7433_v42 }
 0x1ae   :  { %1186 = vmatprep.mubr.bf16.mxu1 %v7152_v3  ;;  %5957 = vmatpush3.bf16.msra.mxu0 %v6697_v45  ;;  %v7218_v3 = vld [vmem:[#allocation8 + $0x110] sm:$0xff] }
 0x1af   :  { %5960 = vmatprep.mubr.bf16.mxu0 %v7154_v4  ;;  %5561 = vmatprep.subr.bf16.mxu1 %v6698_v51  ;;  %v7222_v4 = vld [vmem:[#allocation8 + $0x108] sm:$0xff]  ;;  %v7457_v51 = vrot.slane %v7440_v44, %v7445_v46 }
 0x1b0   :  { %5958 = vmatprep.subr.bf16.mxu0 %v6700_v52 }
 0x1b1   :  { %5562 = vmatpush3.bf16.msra.mxu1 %v6699_v53 }
 0x1b2   :  { %5959 = vmatpush3.bf16.msra.mxu0 %v6700_v52  ;;  %1376 = vmatprep.subr.mxu1 %v7187_v54 }
 0x1b3   :  { %5968 = vmatprep.subr.mxu0 %v9116_v1 }
 0x1b4   :  { %1187 = vmatmul.mubr.bf16.vlgmr.msra.gmra.mxu1 %v7156_v6  ;;  %v7231_v6 = vld [vmem:[#allocation8 + $0xf0] sm:$0xff] }
 0x1b5   :  { %1377 = vmatpush1.msra.mxu1 %v7190_v55  ;;  %1194 = vmatprep.mubr.bf16.mxu1 %v7164_v19  ;;  %v7274_v19 = vld [vmem:[#allocation8 + $0x80] sm:$0xff] }
 0x1b6   :  { %5961 = vmatmul.mubr.bf16.vlgmr.msra.gmra.mxu0 %v7162_v18  ;;  %1378 = vmatprep.subr.mxu1 %v7192_v56  ;;  %v7270_v18 = vld [vmem:[#allocation8 + $0x100] sm:$0xff]  ;;  %9208 = vst [vmem:[#allocation18_spill] sm:$0xff] %v7274_v19 }
 0x1b7   :  { %5964 = vmatprep.mubr.bf16.mxu0 %v507_v33  ;;  %1379 = vmatpush1.msra.mxu1 %v7196_v57  ;;  %v7321_v33 = vld [vmem:[#allocation8 + $0x8] sm:$0xff] }
 0x1b8   :  { %1380 = vmatprep.subr.mxu1 %v7200_v58  ;;  %5969 = vmatpush3.msra.mxu0 %v7202_v59  ;;  %9219 = vst [vmem:[#allocation29_spill] sm:$0xff] %v7321_v33 }
 0x1b9   :  { %1381 = vmatpush1.msra.mxu1 %v7206_v61  ;;  %5970 = vmatprep.subr.mxu0 %v9116_v1 }
 0x1ba   :  { %1382 = vmatprep.subr.mxu1 %v7209_v62  ;;  %5971 = vmatpush3.msra.mxu0 %v7211_v63 }
 0x1bb   :  { %1383 = vmatpush1.msra.mxu1 %v7214_v2  ;;  %5972 = vmatprep.subr.mxu0 %v9116_v1 }
 0x1bc   :  { %1384 = vmatprep.subr.mxu1 %v7218_v3  ;;  %1195 = vmatmul.mubr.bf16.gmra.mxu1 %v7166_v21  ;;  %v7280_v21 = vld [vmem:[#allocation8 + $0xe8] sm:$0xff] }
 0x1bd   :  { %1385 = vmatpush1.msra.mxu1 %v7222_v4  ;;  %1202 = vmatprep.mubr.bf16.mxu1 %v7172_v34  ;;  %v7325_v34 = vld [vmem:[#allocation8] sm:$0xff] }
 0x1be   :  { %5965 = vmatmul.mubr.bf16.gmra.mxu0 %v510_v48  ;;  %1386 = vmatprep.subr.mxu1 %v7226_v5  ;;  %9220 = vst [vmem:[#allocation30_spill] sm:$0xff] %v7325_v34 }
 0x1bf   :  { %1387 = vmatpush1.msra.mxu1 %v7231_v6  ;;  %5973 = vmatpush3.msra.mxu0 %v7233_v7 }
 0x1c0   :  { %1388 = vmatprep.subr.mxu1 %v7237_v8  ;;  %5974 = vmatprep.subr.mxu0 %v9116_v1 }
 0x1c1   :  { %1389 = vmatpush1.msra.mxu1 %v7240_v9  ;;  %5975 = vmatpush3.msra.mxu0 %v7242_v10 }
 0x1c2   :  { %1390 = vmatprep.subr.mxu1 %v7245_v11  ;;  %5976 = vmatprep.subr.mxu0 %v9116_v1 }
 0x1c3   :  { %1391 = vmatpush1.msra.mxu1 %v7249_v12  ;;  %5977 = vmatpush3.msra.mxu0 %v7252_v13 }
 0x1c4   :  { %1392 = vmatprep.subr.mxu1 %v7255_v14  ;;  %1203 = vmatmul.mubr.bf16.gmra.mxu1 %v7174_v37  ;;  %v7340_v37 = vld [vmem:[#allocation8 + $0x58] sm:$0xff] }
 0x1c5   :  { %1393 = vmatpush1.msra.mxu1 %v7259_v15  ;;  %1210 = vmatprep.mubr.bf16.mxu1 %v7179_v49  ;;  %9223 = vst [vmem:[#allocation33_spill] sm:$0xff] %v7340_v37 }
 0x1c6   :  { %1394 = vmatprep.subr.mxu1 %v7263_v16  ;;  %5978 = vmatprep.subr.mxu0 %v9116_v1 }
 0x1c7   :  { %1395 = vmatpush1.msra.mxu1 %v7268_v17  ;;  %5979 = vmatpush3.msra.mxu0 %v7270_v18 }
 0x1c8   :  { %1396 = vmatprep.subr.mxu1 %v7274_v19  ;;  %5980 = vmatprep.subr.mxu0 %v9116_v1 }
 0x1c9   :  { %1397 = vmatpush1.msra.mxu1 %v7277_v20  ;;  %5981 = vmatpush3.msra.mxu0 %v7280_v21 }
 0x1ca   :  { %1398 = vmatprep.subr.mxu1 %v7283_v22  ;;  %5982 = vmatprep.subr.mxu0 %v9116_v1 }
 0x1cb   :  { %1399 = vmatpush1.msra.mxu1 %v7287_v23  ;;  %5983 = vmatpush3.msra.mxu0 %v7290_v24 }
 0x1cc   :  { %1400 = vmatprep.subr.mxu1 %v7293_v25  ;;  %1211 = vmatmul.mubr.bf16.gmra.mxu1 %v7181_v50 }
 0x1cd   :  { %1401 = vmatpush1.msra.mxu1 %v7297_v26  ;;  %1440 = vmatprep.mubr.f32.mxu1 %v9116_v1 }
 0x1ce   :  { %1402 = vmatprep.subr.mxu1 %v7301_v27  ;;  %5984 = vmatprep.subr.mxu0 %v9116_v1 }
 0x1cf   :  { %1403 = vmatpush1.msra.mxu1 %v7306_v28  ;;  %5985 = vmatpush3.msra.mxu0 %v7308_v29 }
 0x1d0   :  { %1404 = vmatprep.subr.mxu1 %v7311_v30  ;;  %5986 = vmatprep.subr.mxu0 %v9116_v1 }
 0x1d1   :  { %1405 = vmatpush1.msra.mxu1 %v7315_v31  ;;  %5987 = vmatpush3.msra.mxu0 %v7318_v32 }
 0x1d2   :  { %1406 = vmatprep.subr.mxu1 %v7321_v33  ;;  %5988 = vmatprep.subr.mxu0 %v9116_v1 }
 0x1d3   :  { %1407 = vmatpush1.msra.mxu1 %v7325_v34  ;;  %5989 = vmatpush3.msra.mxu0 %v7328_v35 }
 0x1d4   :  { %1441 = vmatmul.mubr.f32.vlgmr.msra.gmra.mxu1 %v9116_v1  ;;  %5990 = vmatprep.subr.mxu0 %v9116_v1 }
 0x1d5   :  { %5991 = vmatpush3.msra.mxu0 %v7334_v36  ;;  %6000 = vmatprep.mubr.msk.f32.mxu0 %vm6972_vm8, %v9116_v1 }
 0x1d6   :  { %5992 = vmatprep.subr.mxu0 %v9116_v1  ;;  %1603 = vmatprep.subr.mxu1 %v7187_v54 }
 0x1d7   :  { %5993 = vmatpush3.msra.mxu0 %v7340_v37  ;;  %1604 = vmatpush1.msra.mxu1 %v7190_v55 }
 0x1d8   :  { %5994 = vmatprep.subr.mxu0 %v9116_v1  ;;  %1605 = vmatprep.subr.mxu1 %v7192_v56 }
 0x1d9   :  { %5995 = vmatpush3.msra.mxu0 %v7346_v38  ;;  %1606 = vmatpush1.msra.mxu1 %v7196_v57 }
 0x1da   :  { %5996 = vmatprep.subr.mxu0 %v9116_v1  ;;  %1607 = vmatprep.subr.mxu1 %v7200_v58 }
 0x1db   :  { %5997 = vmatpush3.msra.mxu0 %v7352_v39  ;;  %1608 = vmatpush1.msra.mxu1 %v7206_v61 }
 0x1dc   :  { %5998 = vmatprep.subr.mxu0 %v9116_v1  ;;  %1609 = vmatprep.subr.mxu1 %v7209_v62 }
 0x1dd   :  { %5999 = vmatpush3.msra.mxu0 %v7358_v40  ;;  %1610 = vmatpush1.msra.mxu1 %v7214_v2 }
 0x1de   :  { %6001 = vmatmul.mubr.f32.vlgmr.msra.gmra.mxu0 %v9116_v1  ;;  %6003 = vmatprep.subr.mxu0 %v9116_v1 }
 0x1df   :  { %6004 = vmatpush3.msra.mxu0 %v7202_v59  ;;  %1611 = vmatprep.subr.mxu1 %v7218_v3 }
 0x1e0   :  { %6005 = vmatprep.subr.mxu0 %v9116_v1  ;;  %1612 = vmatpush1.msra.mxu1 %v7222_v4 }
 0x1e1   :  { %6006 = vmatpush3.msra.mxu0 %v7211_v63  ;;  %1613 = vmatprep.subr.mxu1 %v7226_v5 }
 0x1e2   :  { %6007 = vmatprep.subr.mxu0 %v9116_v1  ;;  %1614 = vmatpush1.msra.mxu1 %v7231_v6 }
 0x1e3   :  { %6008 = vmatpush3.msra.mxu0 %v7233_v7  ;;  %1615 = vmatprep.subr.mxu1 %v7237_v8 }
 0x1e4   :  { %6009 = vmatprep.subr.mxu0 %v9116_v1  ;;  %1616 = vmatpush1.msra.mxu1 %v7240_v9 }
 0x1e5   :  { %6010 = vmatpush3.msra.mxu0 %v7242_v10  ;;  %1617 = vmatprep.subr.mxu1 %v7245_v11 }
 0x1e6   :  { %6011 = vmatprep.subr.mxu0 %v9116_v1  ;;  %1618 = vmatpush1.msra.mxu1 %v7249_v12 }
 0x1e7   :  { %6012 = vmatpush3.msra.mxu0 %v7252_v13  ;;  %1619 = vmatprep.subr.mxu1 %v7255_v14 }
 0x1e8   :  { %6013 = vmatprep.subr.mxu0 %v9116_v1  ;;  %1620 = vmatpush1.msra.mxu1 %v7259_v15 }
 0x1e9   :  { %6014 = vmatpush3.msra.mxu0 %v7270_v18  ;;  %1621 = vmatprep.subr.mxu1 %v7263_v16 }
 0x1ea   :  { %6015 = vmatprep.subr.mxu0 %v9116_v1  ;;  %1622 = vmatpush1.msra.mxu1 %v7268_v17 }
 0x1eb   :  { %6016 = vmatpush3.msra.mxu0 %v7280_v21  ;;  %1623 = vmatprep.subr.mxu1 %v7274_v19 }
 0x1ec   :  { %6017 = vmatprep.subr.mxu0 %v9116_v1  ;;  %1624 = vmatpush1.msra.mxu1 %v7277_v20 }
 0x1ed   :  { %6018 = vmatpush3.msra.mxu0 %v7290_v24  ;;  %1625 = vmatprep.subr.mxu1 %v7283_v22 }
 0x1ee   :  { %6019 = vmatprep.subr.mxu0 %v9116_v1  ;;  %1626 = vmatpush1.msra.mxu1 %v7287_v23 }
 0x1ef   :  { %6020 = vmatpush3.msra.mxu0 %v7308_v29  ;;  %1627 = vmatprep.subr.mxu1 %v7293_v25 }
 0x1f0   :  { %6021 = vmatprep.subr.mxu0 %v9116_v1  ;;  %1628 = vmatpush1.msra.mxu1 %v7297_v26 }
 0x1f1   :  { %6022 = vmatpush3.msra.mxu0 %v7318_v32  ;;  %1629 = vmatprep.subr.mxu1 %v7301_v27 }
 0x1f2   :  { %6023 = vmatprep.subr.mxu0 %v9116_v1  ;;  %1630 = vmatpush1.msra.mxu1 %v7306_v28 }
 0x1f3   :  { %6024 = vmatpush3.msra.mxu0 %v7328_v35  ;;  %1631 = vmatprep.subr.mxu1 %v7311_v30 }
 0x1f4   :  { %6025 = vmatprep.subr.mxu0 %v9116_v1  ;;  %1632 = vmatpush1.msra.mxu1 %v7315_v31 }
 0x1f5   :  { %6026 = vmatpush3.msra.mxu0 %v7334_v36  ;;  %1633 = vmatprep.subr.mxu1 %v7321_v33 }
 0x1f6   :  { %6027 = vmatprep.subr.mxu0 %v9116_v1  ;;  %1634 = vmatpush1.msra.mxu1 %v7325_v34 }
 0x1f7   :  { %6028 = vmatpush3.msra.mxu0 %v7340_v37  ;;  %1667 = vmatprep.mubr.f32.mxu1 %v9116_v1 }
 0x1f8   :  { %6029 = vmatprep.subr.mxu0 %v9116_v1  ;;  %6035 = vmatprep.mubr.msk.f32.mxu0 %vm6972_vm8, %v9116_v1 }
 0x1f9   :  { %6030 = vmatpush3.msra.mxu0 %v7346_v38  ;;  %1830 = vmatprep.subr.mxu1 %v7187_v54 }
 0x1fa   :  { %6031 = vmatprep.subr.mxu0 %v9116_v1 }
 0x1fb   :  { %6032 = vmatpush3.msra.mxu0 %v7352_v39 }
 0x1fc   :  { %6033 = vmatprep.subr.mxu0 %v9116_v1 }
 0x1fd   :  { %6034 = vmatpush3.msra.mxu0 %v7358_v40 }
 0x1fe   :  { %6038 = vmatprep.subr.mxu0 %v9116_v1 }
 0x254   :  { %v7435_v43 = vpop.f32.mrf.mxu1 }
 0x255   :  { %v7442_v45 = vpop.f32.mrf.mxu0 }
 0x256   :  { %v7447_v47 = vpop.f32.mrf.mxu1 }
 0x257   :  { %v7449_v48 = vpop.f32.mrf.mxu0 }
 0x258   :  { %v1119_v49 = vpop.f32.mrf.mxu1 }
 0x259   :  { %v1046_v50 = vpop.f32.mrf.mxu0 }
 0x25a   :  { %v1047_v52 = vadd.f32 %v1046_v50, %v7453_v60  ;;  %v1121_v53 = vpop.f32.mrf.mxu1 }
 0x25b   :  { %v1048_v54 = vpop.f32.mrf.mxu0 }
 0x25c   :  { %v7460_v0 = vadd.f32 %v1119_v49, %v1047_v52  ;;  %v1049_v1 = vadd.f32 %v1048_v54, %v7457_v51  ;;  %v1125_v40 = vpop.f32.mrf.mxu1 }
 0x25d   :  { %v1052_v34 = vpop.f32.mrf.mxu0 }
 0x25e   :  { %9229 = vst [vmem:[#allocation39_spill] sm:$0xff] %v7460_v0  ;;  %v7463_v33 = vadd.f32 %v1121_v53, %v1049_v1  ;;  %v1053_v39 = vadd.f32 %v1052_v34, %v7453_v60  ;;  %v1127_v31 = vpop.f32.mrf.mxu1 }
 0x25f   :  { %v1054_v30 = vpop.f32.mrf.mxu0 }
 0x260   :  { %9230 = vst [vmem:[#allocation40_spill] sm:$0xff] %v7463_v33  ;;  %v7466_v38 = vadd.f32 %v1125_v40, %v1053_v39  ;;  %v1055_v28 = vadd.f32 %v1054_v30, %v7457_v51  ;;  %v1129_v27 = vpop.f32.mrf.mxu1 }
 0x261   :  { %v1056_v50 = vpop.f32.mrf.mxu0 }
 0x262   :  { %9231 = vst [vmem:[#allocation41_spill] sm:$0xff] %v7466_v38  ;;  %v7469_v37 = vadd.f32 %v1127_v31, %v1055_v28  ;;  %v1057_v49 = vadd.f32 %v1056_v50, %v7453_v60  ;;  %v1131_v52 = vpop.f32.mrf.mxu1 }
 0x263   :  { %v1058_v54 = vpop.f32.mrf.mxu0 }
 0x264   :  { %9232 = vst [vmem:[#allocation42_spill] sm:$0xff] %v7469_v37  ;;  %v7472_v0 = vadd.f32 %v1129_v27, %v1057_v49  ;;  %v1059_v1 = vadd.f32 %v1058_v54, %v7457_v51  ;;  %v1135_v53 = vpop.f32.mrf.mxu1 }
 0x265   :  { %v1062_v34 = vpop.f32.mrf.mxu0 }
 0x266   :  { %9233 = vst [vmem:[#allocation43_spill] sm:$0xff] %v7472_v0  ;;  %v7475_v33 = vadd.f32 %v1131_v52, %v1059_v1  ;;  %v1063_v39 = vadd.f32 %v1062_v34, %v7453_v60  ;;  %v1137_v40 = vpop.f32.mrf.mxu1 }
 0x267   :  { %v1064_v30 = vpop.f32.mrf.mxu0 }
 0x268   :  { %9234 = vst [vmem:[#allocation44_spill] sm:$0xff] %v7475_v33  ;;  %v7478_v38 = vadd.f32 %v1135_v53, %v1063_v39  ;;  %v1065_v28 = vadd.f32 %v1064_v30, %v7457_v51  ;;  %v1139_v31 = vpop.f32.mrf.mxu1 }
 0x269   :  { %v1066_v50 = vpop.f32.mrf.mxu0 }
 0x26a   :  { %9235 = vst [vmem:[#allocation45_spill] sm:$0xff] %v7478_v38  ;;  %v7481_v37 = vadd.f32 %v1137_v40, %v1065_v28  ;;  %v1067_v27 = vadd.f32 %v1066_v50, %v7453_v60  ;;  %v1141_v49 = vpop.f32.mrf.mxu1 }
 0x26b   :  { %v1068_v54 = vpop.f32.mrf.mxu0 }
 0x26c   :  { %9236 = vst [vmem:[#allocation46_spill] sm:$0xff] %v7481_v37  ;;  %v7484_v0 = vadd.f32 %v1139_v31, %v1067_v27  ;;  %v1069_v52 = vadd.f32 %v1068_v54, %v7457_v51  ;;  %v1145_v1 = vpop.f32.mrf.mxu1 }
 0x26d   :  { %v1072_v34 = vpop.f32.mrf.mxu0 }
 0x26e   :  { %9237 = vst [vmem:[#allocation47_spill] sm:$0xff] %v7484_v0  ;;  %v7487_v33 = vadd.f32 %v1141_v49, %v1069_v52  ;;  %v1073_v53 = vadd.f32 %v1072_v34, %v7453_v60  ;;  %v1147_v39 = vpop.f32.mrf.mxu1 }
 0x26f   :  { %v1074_v30 = vpop.f32.mrf.mxu0 }
 0x270   :  { %9238 = vst [vmem:[#allocation48_spill] sm:$0xff] %v7487_v33  ;;  %v7490_v38 = vadd.f32 %v1145_v1, %v1073_v53  ;;  %v1075_v40 = vadd.f32 %v1074_v30, %v7457_v51  ;;  %v1149_v28 = vpop.f32.mrf.mxu1  ;;  %v7506_v30 = vsub.s32 2, %v7430_v41 }
 0x271   :  { %v1076_v50 = vpop.f32.mrf.mxu0 }
 0x272   :  { %9239 = vst [vmem:[#allocation49_spill] sm:$0xff] %v7490_v38  ;;  %v7493_v37 = vadd.f32 %v1147_v39, %v1075_v40  ;;  %v1077_v31 = vadd.f32 %v1076_v50, %v7453_v60  ;;  %v1151_v27 = vpop.f32.mrf.mxu1 }
 0x273   :  { %v1078_v54 = vpop.f32.mrf.mxu0 }
 0x274   :  { %9240 = vst [vmem:[#allocation50_spill] sm:$0xff] %v7493_v37  ;;  %v7496_v0 = vadd.f32 %v1149_v28, %v1077_v31  ;;  %v1079_v49 = vadd.f32 %v1078_v54, %v7457_v51  ;;  %v7499_v52 = vpop.f32.mrf.mxu1  ;;  %v620_v28 = vrot.slane %v7440_v44, %v7506_v30 }
 0x276   :  { %9241 = vst [vmem:[#allocation51_spill] sm:$0xff] %v7496_v0  ;;  %v7501_v34 = vadd.f32 %v1151_v27, %v1079_v49  ;;  %v5962_v1 = vpop.f32.mrf.mxu0  ;;  %v7503_v53 = vpop.f32.mrf.mxu1 }
 0x278   :  { %9242 = vst [vmem:[#allocation52_spill] sm:$0xff] %v7501_v34  ;;  %v7508_v39 = vpop.f32.mrf.mxu0  ;;  %v5566_v40 = vpop.f32.mrf.mxu1 }
 0x27a   :  { %v5963_v50 = vpop.f32.mrf.mxu0  ;;  %v5567_v37 = vpop.f32.mrf.mxu1 }
 0x27b   :  { %v5568_v31 = vadd.f32 %v5567_v37, %v5566_v40 }
 0x27c   :  { %v5569_v54 = vpop.f32.mrf.mxu1  ;;  %v1256_v38 = vpop.f32.mrf.mxu0 }
 0x27d   :  { %v1192_v0 = vadd.f32 %v5568_v31, %v620_v28 }
 0x27e   :  { %v5570_v27 = vpop.f32.mrf.mxu1  ;;  %v5966_v41 = vpop.f32.mrf.mxu0 }
 0x27f   :  { %v7512_v49 = vadd.f32 %v1256_v38, %v1192_v0  ;;  %v5571_v34 = vadd.f32 %v5570_v27, %v5569_v54 }
 0x280   :  { %v5572_v33 = vpop.f32.mrf.mxu1  ;;  %v1269_v20 = vpop.f32.mrf.mxu0 }
 0x281   :  { %9243 = vst [vmem:[#allocation53_spill] sm:$0xff] %v7512_v49  ;;  %v1197_v26 = vadd.f32 %v5571_v34, %v620_v28 }
 0x282   :  { %v5573_v25 = vpop.f32.mrf.mxu1  ;;  %v5967_v32 = vpop.f32.mrf.mxu0 }
 0x283   :  { %v7514_v36 = vadd.f32 %v5962_v1, %v1197_v26  ;;  %v5574_v23 = vadd.f32 %v5573_v25, %v5572_v33 }
 0x284   :  { %v5575_v22 = vpop.f32.mrf.mxu1  ;;  %v1272_v49 = vpop.f32.mrf.mxu0 }
 0x285   :  { %v1200_v35 = vadd.f32 %v5574_v23, %v620_v28  ;;  %v1359_v23 = vld [vmem:[%s9104_s5] sm:$0x7] }
 0x286   :  { %v5576_v19 = vpop.f32.mrf.mxu1 }
 0x287   :  { %v7516_v44 = vadd.f32 %v5963_v50, %v1200_v35  ;;  %v5577_v37 = vadd.f32 %v5576_v19, %v5575_v22  ;;  %v1043_v19 = vadd.f32 %v7442_v45, %v7453_v60 }
 0x288   :  { %v5578_v40 = vpop.f32.mrf.mxu1 }
 0x289   :  { %9244 = vst [vmem:[#allocation54_spill] sm:$0xff] %v7516_v44  ;;  %v1205_v31 = vadd.f32 %v5577_v37, %v620_v28 }
 0x28a   :  { %v5579_v0 = vpop.f32.mrf.mxu1 }
 0x28b   :  { %v7518_v38 = vadd.f32 %v1269_v20, %v1205_v31  ;;  %v5580_v54 = vadd.f32 %v5579_v0, %v5578_v40  ;;  %v1364_v20 = vrot.slane %v1359_v23, %v7433_v42  ;;  %v1116_v31 = vadd.f32 %v7435_v43, %v1043_v19 }
 0x28c   :  { %v5581_v34 = vpop.f32.mrf.mxu1  ;;  %v5565_v19 = vadd.f32 %v7503_v53, %v7499_v52 }
 0x28d   :  { %9245 = vst [vmem:[#allocation55_spill] sm:$0xff] %v7518_v38  ;;  %v1208_v27 = vadd.f32 %v5580_v54, %v620_v28 }
 0x28e   :  { %v5582_v26 = vpop.f32.mrf.mxu1 }
 0x28f   :  { %v7523_v25 = vadd.f32 %v1272_v49, %v1208_v27  ;;  %v5583_v33 = vadd.f32 %v5582_v26, %v5581_v34  ;;  %v1368_v49 = vrot.slane %v1359_v23, %v7445_v46  ;;  %v1045_v34 = vadd.f32 %v7449_v48, %v7457_v51 }
 0x290   :  { %v5584_v35 = vpop.f32.mrf.mxu1  ;;  %v1189_v48 = vadd.f32 %v5565_v19, %v620_v28 }
 0x291   :  { %9246 = vst [vmem:[#allocation56_spill] sm:$0xff] %v7523_v25  ;;  %v1213_v22 = vadd.f32 %v5583_v33, %v620_v28 }
 0x292   :  { %v5585_v1 = vpop.f32.mrf.mxu1 }
 0x293   :  { %v7528_v50 = vadd.f32 %v5966_v41, %v1213_v22  ;;  %v5586_v37 = vadd.f32 %v5585_v1, %v5584_v35  ;;  %v1118_v41 = vadd.f32 %v7447_v47, %v1045_v34 }
 0x294   :  { %v1442_v40 = vpop.f32.mrf.mxu1 }
 0x295   :  { %9247 = vst [vmem:[#allocation57_spill] sm:$0xff] %v7528_v50  ;;  %v1216_v0 = vadd.f32 %v5586_v37, %v620_v28  ;;  %v1443_v54 = vadd.f32 %v1442_v40, %v1364_v20  ;;  %v1372_v20 = vrot.slane %v1359_v23, %v7506_v30 }
 0x296   :  { %v1444_v27 = vpop.f32.mrf.mxu1 }
 0x297   :  { %v7534_v26 = vadd.f32 %v5967_v32, %v1216_v0  ;;  %v1517_v45 = vadd.f32 %v1443_v54, %v1116_v31  ;;  %v1445_v33 = vadd.f32 %v1444_v27, %v1368_v49  ;;  %v1254_v31 = vadd.f32 %v7508_v39, %v1189_v48 }
 0x298   :  { %v9249_v39 = vmov 0.0  }
 0x299   :  { %9248 = vst [vmem:[#allocation58_spill] sm:$0xff] %v7534_v26  ;;  %v1519_v60 = vmul.f32 0.5, %v1517_v45  ;;  %v1518_v35 = vadd.f32 %v1445_v33, %v1118_v41  ;;  %v9282_v26 = vld [vmem:[#allocation42_spill] sm:$0xff] }
 0x29b   :  { %6733 = vtanh.f32 %v1519_v60  ;;  %v1520_v43 = vmul.f32 0.5, %v1518_v35 }
 0x29d   :  { %6735 = vtanh.f32 %v1520_v43 }
 0x29e   :  { %v1513_v22 = vpop.f32.mrf.mxu0 }
 0x29f   :  { %v1514_v32 = vadd.f32 %v1513_v22, %v1372_v20 }
 0x2a0   :  { %v6002_v1 = vpop.f32.mrf.mxu0 }
 0x2a1   :  { %v9269_v1 = vld [vmem:[#allocation39_spill] sm:$0xff] }
 0x2a8   :  { %v6734_v37 = vpop.eup %6733 }
 0x2a9   :  { %v1523_v51 = vmul.f32 0.5, %v6734_v37  ;;  %v9270_v37 = vld [vmem:[#allocation40_spill] sm:$0xff] }
 0x2aa   :  { %v6736_v54 = vpop.eup %6735 }
 0x2ab   :  { %v1525_v40 = vadd.f32 0.5, %v1523_v51  ;;  %v1524_v49 = vmul.f32 0.5, %v6736_v54 }
 0x2ad   :  { %v1527_v0 = vmul.f32 %v1525_v40, %v1514_v32  ;;  %v1526_v27 = vadd.f32 0.5, %v1524_v49  ;;  %v9271_v49 = vld [vmem:[#allocation53_spill] sm:$0xff] }
 0x2af   :  { %v1528_v47 = vadd.f32 %v1527_v0, %v1254_v31  ;;  %v1530_v34 = vsub.f32 1.0, %v1526_v27  ;;  %v1532_v52 = vmul.f32 0.0, %v1526_v27 }
 0x2b1   :  { %6737 = vtanh.f32 %v1528_v47 }
 0x2be   :  { %v6738_v45 = vpop.eup %6737 }
 0x2bf   :  { %v1531_v60 = vmul.f32 %v6738_v45, %v1530_v34 }
 0x2c1   :  { %v7541_v53 = vadd.f32 %v1532_v52, %v1531_v60 }
 0x2c3   :  { %1534 = vst [vmem:[%s9111_s12] sm:$0xff] %v7541_v53  ;;  %1668 = vmatmul.mubr.f32.vlgmr.msra.gmra.mxu1 %v7541_v53  ;;  %6036 = vmatmul.mubr.f32.vlgmr.msra.gmra.mxu0 %v7541_v53 }
 0x2c4   :  { %1831 = vmatpush1.msra.mxu1 %v7190_v55  ;;  %6039 = vmatpush3.msra.mxu0 %v7202_v59  ;;  %v9250_v55 = vld [vmem:[#allocation28_spill] sm:$0xff] }
 0x2c5   :  { %1832 = vmatprep.subr.mxu1 %v7192_v56  ;;  %6040 = vmatprep.subr.mxu0 %v9249_v39  ;;  %v9251_v56 = vld [vmem:[#allocation18_spill] sm:$0xff] }
 0x2c6   :  { %1833 = vmatpush1.msra.mxu1 %v7196_v57  ;;  %6041 = vmatpush3.msra.mxu0 %v7211_v63  ;;  %v9252_v57 = vld [vmem:[#allocation19_spill] sm:$0xff] }
 0x2c7   :  { %1834 = vmatprep.subr.mxu1 %v7200_v58  ;;  %6042 = vmatprep.subr.mxu0 %v9249_v39  ;;  %v9253_v58 = vld [vmem:[#allocation31_spill] sm:$0xff] }
 0x2c8   :  { %1835 = vmatpush1.msra.mxu1 %v7206_v61  ;;  %6043 = vmatpush3.msra.mxu0 %v7233_v7  ;;  %v9254_v61 = vld [vmem:[#allocation20_spill] sm:$0xff] }
 0x2c9   :  { %1836 = vmatprep.subr.mxu1 %v7209_v62  ;;  %6044 = vmatprep.subr.mxu0 %v9249_v39  ;;  %v9255_v62 = vld [vmem:[#allocation21_spill] sm:$0xff] }
 0x2ca   :  { %1837 = vmatpush1.msra.mxu1 %v7214_v2  ;;  %6045 = vmatpush3.msra.mxu0 %v7242_v10  ;;  %v9256_v2 = vld [vmem:[#allocation32_spill] sm:$0xff] }
 0x2cb   :  { %1838 = vmatprep.subr.mxu1 %v7218_v3  ;;  %6046 = vmatprep.subr.mxu0 %v9249_v39  ;;  %v9257_v3 = vld [vmem:[#allocation22_spill] sm:$0xff] }
 0x2cc   :  { %1839 = vmatpush1.msra.mxu1 %v7222_v4  ;;  %6047 = vmatpush3.msra.mxu0 %v7252_v13  ;;  %v9258_v4 = vld [vmem:[#allocation23_spill] sm:$0xff] }
 0x2cd   :  { %1840 = vmatprep.subr.mxu1 %v7226_v5  ;;  %6048 = vmatprep.subr.mxu0 %v9249_v39  ;;  %v9259_v5 = vld [vmem:[#allocation33_spill] sm:$0xff] }
 0x2ce   :  { %1841 = vmatpush1.msra.mxu1 %v7231_v6  ;;  %6049 = vmatpush3.msra.mxu0 %v7270_v18  ;;  %v9260_v6 = vld [vmem:[#allocation24_spill] sm:$0xff] }
 0x2cf   :  { %1842 = vmatprep.subr.mxu1 %v7237_v8  ;;  %6050 = vmatprep.subr.mxu0 %v9249_v39  ;;  %v9261_v8 = vld [vmem:[#allocation25_spill] sm:$0xff] }
 0x2d0   :  { %1843 = vmatpush1.msra.mxu1 %v7240_v9  ;;  %6051 = vmatpush3.msra.mxu0 %v7280_v21  ;;  %v9262_v9 = vld [vmem:[#allocation34_spill] sm:$0xff] }
 0x2d1   :  { %1844 = vmatprep.subr.mxu1 %v7245_v11  ;;  %6052 = vmatprep.subr.mxu0 %v9249_v39  ;;  %v9263_v11 = vld [vmem:[#allocation26_spill] sm:$0xff] }
 0x2d2   :  { %1845 = vmatpush1.msra.mxu1 %v7249_v12  ;;  %6053 = vmatpush3.msra.mxu0 %v7290_v24  ;;  %v9264_v12 = vld [vmem:[#allocation27_spill] sm:$0xff]  ;;  %v1586_v24 = vld [vmem:[%s9104_s5] sm:$0x7] }
 0x2d3   :  { %1846 = vmatprep.subr.mxu1 %v7255_v14  ;;  %6054 = vmatprep.subr.mxu0 %v9249_v39  ;;  %v9265_v14 = vld [vmem:[#allocation35_spill] sm:$0xff]  ;;  %v1595_v41 = vrot.slane %v1586_v24, %v7445_v46  ;;  %v1599_v51 = vrot.slane %v1586_v24, %v7506_v30 }
 0x2d4   :  { %1847 = vmatpush1.msra.mxu1 %v7259_v15  ;;  %6055 = vmatpush3.msra.mxu0 %v7308_v29  ;;  %v9266_v15 = vld [vmem:[#allocation29_spill] sm:$0xff]  ;;  %v1591_v29 = vrot.slane %v1586_v24, %v7433_v42  ;;  %v7718_v24 = vld [vmem:[#allocation8 + $0x80] sm:$0xff] }
 0x2d5   :  { %1848 = vmatprep.subr.mxu1 %v7263_v16  ;;  %6056 = vmatprep.subr.mxu0 %v9249_v39  ;;  %v9267_v16 = vld [vmem:[#allocation30_spill] sm:$0xff] }
 0x2d6   :  { %1849 = vmatpush1.msra.mxu1 %v7268_v17  ;;  %6057 = vmatpush3.msra.mxu0 %v9250_v55  ;;  %v9268_v17 = vld [vmem:[#allocation36_spill] sm:$0xff] }
 0x2d7   :  { %1850 = vmatprep.subr.mxu1 %v9251_v56  ;;  %6058 = vmatprep.subr.mxu0 %v9249_v39 }
 0x2d8   :  { %1851 = vmatpush1.msra.mxu1 %v9252_v57  ;;  %6059 = vmatpush3.msra.mxu0 %v9253_v58 }
 0x2d9   :  { %1852 = vmatprep.subr.mxu1 %v9254_v61  ;;  %6060 = vmatprep.subr.mxu0 %v9249_v39  ;;  %v7674_v61 = vld [vmem:[#allocation8 + $0x110] sm:$0xff] }
 0x2da   :  { %1853 = vmatpush1.msra.mxu1 %v9255_v62  ;;  %6061 = vmatpush3.msra.mxu0 %v9256_v2  ;;  %v7677_v62 = vld [vmem:[#allocation8 + $0x108] sm:$0xff]  ;;  %v7680_v2 = vld [vmem:[#allocation8 + $0xf8] sm:$0xff] }
 0x2db   :  { %1854 = vmatprep.subr.mxu1 %v9257_v3  ;;  %6062 = vmatprep.subr.mxu0 %v9249_v39  ;;  %v7683_v3 = vld [vmem:[#allocation8 + $0xf0] sm:$0xff] }
 0x2dc   :  { %1855 = vmatpush1.msra.mxu1 %v9258_v4  ;;  %6063 = vmatpush3.msra.mxu0 %v9259_v5  ;;  %v7686_v4 = vld [vmem:[#allocation8 + $0xe0] sm:$0xff]  ;;  %v7689_v5 = vld [vmem:[#allocation8 + $0xd8] sm:$0xff] }
 0x2dd   :  { %1856 = vmatprep.subr.mxu1 %v9260_v6  ;;  %6064 = vmatprep.subr.mxu0 %v9249_v39  ;;  %v7692_v6 = vld [vmem:[#allocation8 + $0xc8] sm:$0xff] }
 0x2de   :  { %1857 = vmatpush1.msra.mxu1 %v9261_v8  ;;  %6065 = vmatpush3.msra.mxu0 %v9262_v9  ;;  %v7694_v8 = vld [vmem:[#allocation8 + $0xc0] sm:$0xff]  ;;  %v7696_v9 = vld [vmem:[#allocation8 + $0xd0] sm:$0xff] }
 0x2df   :  { %1858 = vmatprep.subr.mxu1 %v9263_v11  ;;  %6066 = vmatprep.subr.mxu0 %v9249_v39  ;;  %v7700_v11 = vld [vmem:[#allocation8 + $0xb0] sm:$0xff] }
 0x2e0   :  { %1859 = vmatpush1.msra.mxu1 %v9264_v12  ;;  %6067 = vmatpush3.msra.mxu0 %v9265_v14  ;;  %v7702_v12 = vld [vmem:[#allocation8 + $0xa8] sm:$0xff]  ;;  %v7704_v14 = vld [vmem:[#allocation8 + $0xb8] sm:$0xff] }
 0x2e1   :  { %1860 = vmatprep.subr.mxu1 %v9266_v15  ;;  %6068 = vmatprep.subr.mxu0 %v9249_v39  ;;  %v7708_v15 = vld [vmem:[#allocation8 + $0x98] sm:$0xff] }
 0x2e2   :  { %1861 = vmatpush1.msra.mxu1 %v9267_v16  ;;  %1894 = vmatprep.mubr.f32.mxu1 %v9249_v39  ;;  %v7710_v16 = vld [vmem:[#allocation8 + $0xa0] sm:$0xff] }
 0x2e3   :  { %6069 = vmatpush3.msra.mxu0 %v9268_v17  ;;  %6070 = vmatprep.mubr.msk.f32.mxu0 %vm6972_vm8, %v9249_v39  ;;  %v7714_v17 = vld [vmem:[#allocation8 + $0x90] sm:$0xff] }
 0x2e4   :  { %6073 = vmatprep.subr.mxu0 %v9249_v39 }
 0x383   :  { %v1669_v28 = vpop.f32.mrf.mxu1  ;;  %v1740_v23 = vpop.f32.mrf.mxu0 }
 0x384   :  { %v1670_v33 = vadd.f32 %v1669_v28, %v1591_v29  ;;  %v1741_v0 = vadd.f32 %v1740_v23, %v1599_v51  ;;  %v7720_v29 = vld [vmem:[#allocation8 + $0x88] sm:$0xff]  ;;  %v7724_v28 = vld [vmem:[#allocation8 + $0x78] sm:$0xff] }
 0x385   :  { %v1671_v35 = vpop.f32.mrf.mxu1  ;;  %v6037_v22 = vpop.f32.mrf.mxu0  ;;  %v7728_v23 = vld [vmem:[#allocation8 + $0x68] sm:$0xff] }
 0x386   :  { %v1744_v43 = vadd.f32 %v1670_v33, %v9269_v1  ;;  %v1672_v20 = vadd.f32 %v1671_v35, %v1595_v41  ;;  %v7730_v33 = vld [vmem:[#allocation8 + $0x70] sm:$0xff]  ;;  %v7734_v41 = vld [vmem:[#allocation8 + $0x60] sm:$0xff]  ;;  %v7740_v22 = vld [vmem:[#allocation8 + $0x58] sm:$0xff] }
 0x387   :  { %v7738_v35 = vld [vmem:[#allocation8 + $0x50] sm:$0xff]  ;;  %v7744_v1 = vld [vmem:[#allocation8 + $0x48] sm:$0xff] }
 0x388   :  { %v1746_v19 = vmul.f32 0.5, %v1744_v43  ;;  %v1745_v48 = vadd.f32 %v1672_v20, %v9270_v37  ;;  %v7748_v43 = vld [vmem:[#allocation8 + $0x38] sm:$0xff]  ;;  %v7754_v20 = vld [vmem:[#allocation8 + $0x30] sm:$0xff]  ;;  %v7758_v37 = vld [vmem:[#allocation8 + $0x20] sm:$0xff] }
 0x389   :  { %9274 = vst [vmem:[#allocation19_spill] sm:$0xff] %v7754_v20  ;;  %9275 = vst [vmem:[#allocation31_spill] sm:$0xff] %v7758_v37  ;;  %v7768_v51 = vld [vmem:[#allocation8 + $0x8] sm:$0xff] }
 0x38a   :  { %6739 = vtanh.f32 %v1746_v19  ;;  %v1747_v32 = vmul.f32 0.5, %v1745_v48  ;;  %v7750_v19 = vld [vmem:[#allocation8 + $0x40] sm:$0xff]  ;;  %v7760_v48 = vld [vmem:[#allocation8 + $0x28] sm:$0xff]  ;;  %9278 = vst [vmem:[#allocation32_spill] sm:$0xff] %v7768_v51 }
 0x38b   :  { %9273 = vst [vmem:[#allocation18_spill] sm:$0xff] %v7750_v19  ;;  %9276 = vst [vmem:[#allocation20_spill] sm:$0xff] %v7760_v48 }
 0x38c   :  { %6741 = vtanh.f32 %v1747_v32  ;;  %v7764_v32 = vld [vmem:[#allocation8 + $0x18] sm:$0xff] }
 0x38d   :  { %9277 = vst [vmem:[#allocation21_spill] sm:$0xff] %v7764_v32 }
 0x397   :  { %v6740_v40 = vpop.eup %6739 }
 0x398   :  { %v1750_v31 = vmul.f32 0.5, %v6740_v40  ;;  %v7770_v40 = vld [vmem:[#allocation8 + $0x10] sm:$0xff] }
 0x399   :  { %v6742_v34 = vpop.eup %6741  ;;  %9279 = vst [vmem:[#allocation22_spill] sm:$0xff] %v7770_v40 }
 0x39a   :  { %v1752_v47 = vadd.f32 0.5, %v1750_v31  ;;  %v1751_v45 = vmul.f32 0.5, %v6742_v34  ;;  %v7774_v31 = vld [vmem:[#allocation8] sm:$0xff] }
 0x39b   :  { %9280 = vst [vmem:[#allocation23_spill] sm:$0xff] %v7774_v31 }
 0x39c   :  { %v1754_v54 = vmul.f32 %v1752_v47, %v1741_v0  ;;  %v1753_v60 = vadd.f32 0.5, %v1751_v45  ;;  %v1813_v0 = vld [vmem:[%s9104_s5] sm:$0x7] }
 0x39d   :  { %v1818_v47 = vrot.slane %v1813_v0, %v7433_v42  ;;  %v1822_v34 = vrot.slane %v1813_v0, %v7445_v46  ;;  %v1826_v38 = vrot.slane %v1813_v0, %v7506_v30  ;;  %v2040_v0 = vld [vmem:[%s9104_s5] sm:$0x7] }
 0x39e   :  { %v1755_v27 = vadd.f32 %v1754_v54, %v9271_v49  ;;  %v1757_v52 = vsub.f32 1.0, %v1753_v60  ;;  %v1759_v57 = vmul.f32 %v1753_v60, %v7541_v53  ;;  %v7671_v53 = vld [vmem:[#allocation8 + $0x120] sm:$0xff] }
 0x3a0   :  { %6743 = vtanh.f32 %v1755_v27 }
 0x3ad   :  { %v6744_v55 = vpop.eup %6743 }
 0x3ae   :  { %v1758_v56 = vmul.f32 %v6744_v55, %v1757_v52  ;;  %v9281_v52 = vld [vmem:[#allocation41_spill] sm:$0xff] }
 0x3b0   :  { %v7625_v58 = vadd.f32 %v1759_v57, %v1758_v56 }
 0x3b2   :  { %1761 = vst [vmem:[%s9111_s12 + $0x8] sm:$0xff] %v7625_v58  ;;  %1895 = vmatmul.mubr.f32.vlgmr.msra.gmra.mxu1 %v7625_v58  ;;  %6071 = vmatmul.mubr.f32.vlgmr.msra.gmra.mxu0 %v7625_v58 }
 0x3b3   :  { %6074 = vmatpush3.msra.mxu0 %v7202_v59  ;;  %2121 = vmatprep.mubr.f32.mxu1 %v9249_v39  ;;  %v7650_v59 = vld [vmem:[#allocation8 + $0x170] sm:$0xff] }
 0x3b4   :  { %6075 = vmatprep.subr.mxu0 %v9249_v39  ;;  %6105 = vmatprep.mubr.msk.f32.mxu0 %vm6972_vm8, %v9249_v39  ;;  %9272 = vst [vmem:[#allocation28_spill] sm:$0xff] %v7650_v59 }
 0x3b5   :  { %6076 = vmatpush3.msra.mxu0 %v7211_v63  ;;  %2057 = vmatprep.subr.mxu1 %v7650_v59  ;;  %v7653_v63 = vld [vmem:[#allocation8 + $0x168] sm:$0xff] }
 0x3b6   :  { %6077 = vmatprep.subr.mxu0 %v9249_v39  ;;  %2058 = vmatpush1.msra.mxu1 %v7653_v63 }
 0x3b7   :  { %6078 = vmatpush3.msra.mxu0 %v7233_v7  ;;  %v7656_v7 = vld [vmem:[#allocation8 + $0x158] sm:$0xff] }
 0x3b8   :  { %6079 = vmatprep.subr.mxu0 %v9249_v39  ;;  %2059 = vmatprep.subr.mxu1 %v7656_v7 }
 0x3b9   :  { %6080 = vmatpush3.msra.mxu0 %v7242_v10  ;;  %v7659_v10 = vld [vmem:[#allocation8 + $0x150] sm:$0xff] }
 0x3ba   :  { %6081 = vmatprep.subr.mxu0 %v9249_v39  ;;  %2060 = vmatpush1.msra.mxu1 %v7659_v10 }
 0x3bb   :  { %6082 = vmatpush3.msra.mxu0 %v7252_v13  ;;  %v7662_v13 = vld [vmem:[#allocation8 + $0x140] sm:$0xff] }
 0x3bc   :  { %6083 = vmatprep.subr.mxu0 %v9249_v39  ;;  %2061 = vmatprep.subr.mxu1 %v7662_v13 }
 0x3bd   :  { %6084 = vmatpush3.msra.mxu0 %v7270_v18  ;;  %v7665_v18 = vld [vmem:[#allocation8 + $0x138] sm:$0xff] }
 0x3be   :  { %6085 = vmatprep.subr.mxu0 %v9249_v39  ;;  %2062 = vmatpush1.msra.mxu1 %v7665_v18 }
 0x3bf   :  { %6086 = vmatpush3.msra.mxu0 %v7280_v21  ;;  %v7668_v21 = vld [vmem:[#allocation8 + $0x128] sm:$0xff] }
 0x3c0   :  { %6087 = vmatprep.subr.mxu0 %v9249_v39  ;;  %2063 = vmatprep.subr.mxu1 %v7668_v21 }
 0x3c1   :  { %2064 = vmatpush1.msra.mxu1 %v7671_v53  ;;  %6088 = vmatpush3.msra.mxu0 %v7696_v9 }
 0x3c2   :  { %2065 = vmatprep.subr.mxu1 %v7674_v61  ;;  %6089 = vmatprep.subr.mxu0 %v9249_v39 }
 0x3c3   :  { %2066 = vmatpush1.msra.mxu1 %v7677_v62  ;;  %6090 = vmatpush3.msra.mxu0 %v7704_v14 }
 0x3c4   :  { %2067 = vmatprep.subr.mxu1 %v7680_v2  ;;  %6091 = vmatprep.subr.mxu0 %v9249_v39 }
 0x3c5   :  { %2068 = vmatpush1.msra.mxu1 %v7683_v3  ;;  %6092 = vmatpush3.msra.mxu0 %v7710_v16 }
 0x3c6   :  { %2069 = vmatprep.subr.mxu1 %v7686_v4  ;;  %6093 = vmatprep.subr.mxu0 %v9249_v39 }
 0x3c7   :  { %2070 = vmatpush1.msra.mxu1 %v7689_v5  ;;  %6094 = vmatpush3.msra.mxu0 %v7720_v29 }
 0x3c8   :  { %2071 = vmatprep.subr.mxu1 %v7692_v6  ;;  %6095 = vmatprep.subr.mxu0 %v9249_v39 }
 0x3c9   :  { %2072 = vmatpush1.msra.mxu1 %v7694_v8  ;;  %6096 = vmatpush3.msra.mxu0 %v7730_v33 }
 0x3ca   :  { %2073 = vmatprep.subr.mxu1 %v7700_v11  ;;  %6097 = vmatprep.subr.mxu0 %v9249_v39 }
 0x3cb   :  { %2074 = vmatpush1.msra.mxu1 %v7702_v12  ;;  %6098 = vmatpush3.msra.mxu0 %v7740_v22 }
 0x3cc   :  { %2075 = vmatprep.subr.mxu1 %v7708_v15  ;;  %6099 = vmatprep.subr.mxu0 %v9249_v39 }
 0x3cd   :  { %2076 = vmatpush1.msra.mxu1 %v7714_v17  ;;  %6100 = vmatpush3.msra.mxu0 %v7750_v19 }
 0x3ce   :  { %2077 = vmatprep.subr.mxu1 %v7718_v24  ;;  %6101 = vmatprep.subr.mxu0 %v9249_v39 }
 0x3cf   :  { %2078 = vmatpush1.msra.mxu1 %v7724_v28  ;;  %6102 = vmatpush3.msra.mxu0 %v7760_v48 }
 0x3d0   :  { %2079 = vmatprep.subr.mxu1 %v7728_v23  ;;  %6103 = vmatprep.subr.mxu0 %v9249_v39 }
 0x3d1   :  { %2080 = vmatpush1.msra.mxu1 %v7734_v41  ;;  %6104 = vmatpush3.msra.mxu0 %v7770_v40 }
 0x3d2   :  { %2081 = vmatprep.subr.mxu1 %v7738_v35  ;;  %6108 = vmatprep.subr.mxu0 %v9249_v39 }
 0x3d3   :  { %2082 = vmatpush1.msra.mxu1 %v7744_v1 }
 0x3d4   :  { %2083 = vmatprep.subr.mxu1 %v7748_v43 }
 0x3d5   :  { %2084 = vmatpush1.msra.mxu1 %v7754_v20 }
 0x3d6   :  { %2085 = vmatprep.subr.mxu1 %v7758_v37 }
 0x3d7   :  { %2086 = vmatpush1.msra.mxu1 %v7764_v32 }
 0x3d8   :  { %2087 = vmatprep.subr.mxu1 %v7768_v51 }
 0x3d9   :  { %2088 = vmatpush1.msra.mxu1 %v7774_v31 }
 0x3da   :  { %2284 = vmatprep.subr.mxu1 %v7650_v59 }
 0x472   :  { %v1896_v54 = vpop.f32.mrf.mxu1  ;;  %v1967_v49 = vpop.f32.mrf.mxu0 }
 0x473   :  { %v1897_v27 = vadd.f32 %v1896_v54, %v1818_v47  ;;  %v1968_v40 = vadd.f32 %v1967_v49, %v1826_v38  ;;  %v7852_v38 = vld [vmem:[#allocation8 + $0x118] sm:$0xff] }
 0x474   :  { %v1898_v45 = vpop.f32.mrf.mxu1  ;;  %v6072_v60 = vpop.f32.mrf.mxu0  ;;  %v9285_v49 = vld [vmem:[#allocation37_spill] sm:$0xff] }
 0x475   :  { %v1971_v55 = vadd.f32 %v1897_v27, %v9281_v52  ;;  %v1899_v57 = vadd.f32 %v1898_v45, %v1822_v34 }
 0x477   :  { %v1973_v56 = vmul.f32 0.5, %v1971_v55  ;;  %v1972_v50 = vadd.f32 %v1899_v57, %v9282_v26  ;;  %v2045_v55 = vrot.slane %v2040_v0, %v9285_v49 }
 0x479   :  { %6745 = vtanh.f32 %v1973_v56  ;;  %v1974_v25 = vmul.f32 0.5, %v1972_v50 }
 0x47b   :  { %6747 = vtanh.f32 %v1974_v25  ;;  %v7856_v25 = vld [vmem:[#allocation8 + $0x100] sm:$0xff] }
 0x486   :  { %v6746_v44 = vpop.eup %6745 }
 0x487   :  { %v1977_v42 = vmul.f32 0.5, %v6746_v44  ;;  %v7848_v44 = vld [vmem:[#allocation8 + $0x130] sm:$0xff] }
 0x488   :  { %v6748_v60 = vpop.eup %6747 }
 0x489   :  { %v1979_v48 = vadd.f32 0.5, %v1977_v42  ;;  %v1978_v46 = vmul.f32 0.5, %v6748_v60  ;;  %v7840_v42 = vld [vmem:[#allocation8 + $0x160] sm:$0xff] }
 0x48b   :  { %v1981_v47 = vmul.f32 %v1979_v48, %v1968_v40  ;;  %v1980_v27 = vadd.f32 0.5, %v1978_v46  ;;  %v7844_v46 = vld [vmem:[#allocation8 + $0x148] sm:$0xff]  ;;  %v9283_v48 = vld [vmem:[#allocation20_spill] sm:$0xff]  ;;  %v9284_v40 = vld [vmem:[#allocation22_spill] sm:$0xff] }
 0x48d   :  { %v1982_v54 = vadd.f32 %v1981_v47, %v7514_v36  ;;  %v1984_v52 = vsub.f32 1.0, %v1980_v27  ;;  %v1986_v26 = vmul.f32 %v1980_v27, %v7625_v58  ;;  %v7836_v36 = vld [vmem:[#allocation8 + $0x178] sm:$0xff]  ;;  %v7860_v58 = vld [vmem:[#allocation8 + $0xe8] sm:$0xff] }
 0x48f   :  { %6749 = vtanh.f32 %v1982_v54  ;;  %v9286_v54 = vld [vmem:[#allocation38_spill] sm:$0xff] }
 0x490   :  { %v2049_v60 = vrot.slane %v2040_v0, %v9286_v54 }
 0x49c   :  { %v6750_v34 = vpop.eup %6749 }
 0x49d   :  { %v1985_v45 = vmul.f32 %v6750_v34, %v1984_v52  ;;  %v9287_v34 = vld [vmem:[#allocation43_spill] sm:$0xff] }
 0x49f   :  { %v7793_v50 = vadd.f32 %v1986_v26, %v1985_v45 }
 0x4a1   :  { %1988 = vst [vmem:[%s9111_s12 + $0x10] sm:$0xff] %v7793_v50  ;;  %2122 = vmatmul.mubr.f32.vlgmr.msra.gmra.mxu1 %v7793_v50  ;;  %6106 = vmatmul.mubr.f32.vlgmr.msra.gmra.mxu0 %v7793_v50 }
 0x4a2   :  { %2285 = vmatpush1.msra.mxu1 %v7653_v63  ;;  %2348 = vmatprep.mubr.f32.mxu1 %v9249_v39 }
 0x4a3   :  { %2286 = vmatprep.subr.mxu1 %v7656_v7  ;;  %6140 = vmatprep.mubr.msk.f32.mxu0 %vm6972_vm8, %v9249_v39 }
 0x4a4   :  { %2287 = vmatpush1.msra.mxu1 %v7659_v10  ;;  %6109 = vmatpush3.msra.mxu0 %v7836_v36 }
 0x4a5   :  { %2288 = vmatprep.subr.mxu1 %v7662_v13  ;;  %6110 = vmatprep.subr.mxu0 %v9249_v39 }
 0x4a6   :  { %2289 = vmatpush1.msra.mxu1 %v7665_v18  ;;  %6111 = vmatpush3.msra.mxu0 %v7840_v42 }
 0x4a7   :  { %2290 = vmatprep.subr.mxu1 %v7668_v21  ;;  %6112 = vmatprep.subr.mxu0 %v9249_v39 }
 0x4a8   :  { %2291 = vmatpush1.msra.mxu1 %v7671_v53  ;;  %6113 = vmatpush3.msra.mxu0 %v7844_v46 }
 0x4a9   :  { %2292 = vmatprep.subr.mxu1 %v7674_v61  ;;  %6114 = vmatprep.subr.mxu0 %v9249_v39 }
 0x4aa   :  { %2293 = vmatpush1.msra.mxu1 %v7677_v62  ;;  %6115 = vmatpush3.msra.mxu0 %v7848_v44 }
 0x4ab   :  { %2294 = vmatprep.subr.mxu1 %v7680_v2  ;;  %6116 = vmatprep.subr.mxu0 %v9249_v39 }
 0x4ac   :  { %2295 = vmatpush1.msra.mxu1 %v7683_v3  ;;  %6117 = vmatpush3.msra.mxu0 %v7852_v38 }
 0x4ad   :  { %2296 = vmatprep.subr.mxu1 %v7686_v4  ;;  %6118 = vmatprep.subr.mxu0 %v9249_v39 }
 0x4ae   :  { %2297 = vmatpush1.msra.mxu1 %v7689_v5  ;;  %6119 = vmatpush3.msra.mxu0 %v7856_v25 }
 0x4af   :  { %2298 = vmatprep.subr.mxu1 %v7692_v6  ;;  %6120 = vmatprep.subr.mxu0 %v9249_v39 }
 0x4b0   :  { %2299 = vmatpush1.msra.mxu1 %v7694_v8  ;;  %6121 = vmatpush3.msra.mxu0 %v7860_v58 }
 0x4b1   :  { %2300 = vmatprep.subr.mxu1 %v7700_v11  ;;  %6122 = vmatprep.subr.mxu0 %v9249_v39 }
 0x4b2   :  { %2301 = vmatpush1.msra.mxu1 %v7702_v12  ;;  %6123 = vmatpush3.msra.mxu0 %v7696_v9 }
 0x4b3   :  { %2302 = vmatprep.subr.mxu1 %v7708_v15  ;;  %6124 = vmatprep.subr.mxu0 %v9249_v39 }
 0x4b4   :  { %2303 = vmatpush1.msra.mxu1 %v7714_v17  ;;  %6125 = vmatpush3.msra.mxu0 %v7704_v14 }
 0x4b5   :  { %2304 = vmatprep.subr.mxu1 %v7718_v24  ;;  %6126 = vmatprep.subr.mxu0 %v9249_v39 }
 0x4b6   :  { %2305 = vmatpush1.msra.mxu1 %v7724_v28  ;;  %6127 = vmatpush3.msra.mxu0 %v7710_v16 }
 0x4b7   :  { %2306 = vmatprep.subr.mxu1 %v7728_v23  ;;  %6128 = vmatprep.subr.mxu0 %v9249_v39 }
 0x4b8   :  { %2307 = vmatpush1.msra.mxu1 %v7734_v41  ;;  %6129 = vmatpush3.msra.mxu0 %v7720_v29 }
 0x4b9   :  { %2308 = vmatprep.subr.mxu1 %v7738_v35  ;;  %6130 = vmatprep.subr.mxu0 %v9249_v39 }
 0x4ba   :  { %2309 = vmatpush1.msra.mxu1 %v7744_v1  ;;  %6131 = vmatpush3.msra.mxu0 %v7730_v33 }
 0x4bb   :  { %2310 = vmatprep.subr.mxu1 %v7748_v43  ;;  %6132 = vmatprep.subr.mxu0 %v9249_v39 }
 0x4bc   :  { %2311 = vmatpush1.msra.mxu1 %v7754_v20  ;;  %6133 = vmatpush3.msra.mxu0 %v7740_v22 }
 0x4bd   :  { %2312 = vmatprep.subr.mxu1 %v7758_v37  ;;  %6134 = vmatprep.subr.mxu0 %v9249_v39 }
 0x4be   :  { %2313 = vmatpush1.msra.mxu1 %v7764_v32  ;;  %6135 = vmatpush3.msra.mxu0 %v7750_v19 }
 0x4bf   :  { %2314 = vmatprep.subr.mxu1 %v7768_v51  ;;  %6136 = vmatprep.subr.mxu0 %v9249_v39 }
 0x4c0   :  { %2315 = vmatpush1.msra.mxu1 %v7774_v31  ;;  %6137 = vmatpush3.msra.mxu0 %v9283_v48  ;;  %v2053_v48 = vrot.slane %v2040_v0, %v7506_v30  ;;  %v9298_v0 = vld [vmem:[#allocation28_spill] sm:$0xff] }
 0x4c1   :  { %2511 = vmatprep.subr.mxu1 %v7650_v59  ;;  %6138 = vmatprep.subr.mxu0 %v9249_v39 }
 0x4c2   :  { %6139 = vmatpush3.msra.mxu0 %v9284_v40  ;;  %v9288_v40 = vld [vmem:[#allocation44_spill] sm:$0xff] }
 0x4c3   :  { %6143 = vmatprep.subr.mxu0 %v9249_v39 }
 0x561   :  { %v2123_v56 = vpop.f32.mrf.mxu1  ;;  %v2194_v57 = vpop.f32.mrf.mxu0 }
 0x562   :  { %v2124_v47 = vadd.f32 %v2123_v56, %v2045_v55  ;;  %v2195_v37 = vadd.f32 %v2194_v57, %v2053_v48  ;;  %v9289_v56 = vld [vmem:[#allocation54_spill] sm:$0xff]  ;;  %v9296_v48 = vld [vmem:[#allocation23_spill] sm:$0xff]  ;;  %v9299_v57 = vld [vmem:[#allocation37_spill] sm:$0xff] }
 0x563   :  { %v2125_v27 = vpop.f32.mrf.mxu1  ;;  %v6107_v52 = vpop.f32.mrf.mxu0 }
 0x564   :  { %v2198_v45 = vadd.f32 %v2124_v47, %v9287_v34  ;;  %v2126_v59 = vadd.f32 %v2125_v27, %v2049_v60 }
 0x566   :  { %v2200_v26 = vmul.f32 0.5, %v2198_v45  ;;  %v2199_v31 = vadd.f32 %v2126_v59, %v9288_v40  ;;  %v9297_v40 = vld [vmem:[#allocation22_spill] sm:$0xff] }
 0x568   :  { %6751 = vtanh.f32 %v2200_v26  ;;  %v2201_v51 = vmul.f32 0.5, %v2199_v31 }
 0x56a   :  { %6753 = vtanh.f32 %v2201_v51  ;;  %v9294_v51 = vld [vmem:[#allocation20_spill] sm:$0xff] }
 0x575   :  { %v6752_v32 = vpop.eup %6751 }
 0x576   :  { %v2204_v49 = vmul.f32 0.5, %v6752_v32  ;;  %v9293_v32 = vld [vmem:[#allocation21_spill] sm:$0xff] }
 0x577   :  { %v6754_v52 = vpop.eup %6753 }
 0x578   :  { %v2206_v19 = vadd.f32 0.5, %v2204_v49  ;;  %v2205_v20 = vmul.f32 0.5, %v6754_v52  ;;  %v2267_v49 = vld [vmem:[%s9104_s5] sm:$0x7] }
 0x57a   :  { %v2208_v55 = vmul.f32 %v2206_v19, %v2195_v37  ;;  %v2207_v47 = vadd.f32 0.5, %v2205_v20  ;;  %v9290_v19 = vld [vmem:[#allocation19_spill] sm:$0xff]  ;;  %v9291_v20 = vld [vmem:[#allocation18_spill] sm:$0xff] }
 0x57b   :  { %v9292_v37 = vld [vmem:[#allocation31_spill] sm:$0xff] }
 0x57c   :  { %v2209_v54 = vadd.f32 %v2208_v55, %v9289_v56  ;;  %v2211_v34 = vsub.f32 1.0, %v2207_v47  ;;  %v2213_v59 = vmul.f32 %v2207_v47, %v7793_v50  ;;  %v9295_v50 = vld [vmem:[#allocation32_spill] sm:$0xff]  ;;  %v9300_v56 = vld [vmem:[#allocation38_spill] sm:$0xff] }
 0x57d   :  { %v2276_v52 = vrot.slane %v2267_v49, %v9300_v56 }
 0x57e   :  { %6755 = vtanh.f32 %v2209_v54  ;;  %v2272_v54 = vrot.slane %v2267_v49, %v9299_v57 }
 0x58b   :  { %v6756_v60 = vpop.eup %6755 }
 0x58c   :  { %v2212_v27 = vmul.f32 %v6756_v60, %v2211_v34  ;;  %v9301_v60 = vld [vmem:[#allocation45_spill] sm:$0xff] }
 0x58e   :  { %v7892_v31 = vadd.f32 %v2213_v59, %v2212_v27 }
 0x590   :  { %2215 = vst [vmem:[%s9111_s12 + $0x18] sm:$0xff] %v7892_v31  ;;  %2349 = vmatmul.mubr.f32.vlgmr.msra.gmra.mxu1 %v7892_v31  ;;  %6141 = vmatmul.mubr.f32.vlgmr.msra.gmra.mxu0 %v7892_v31 }
 0x591   :  { %2512 = vmatpush1.msra.mxu1 %v7653_v63  ;;  %6144 = vmatpush3.msra.mxu0 %v7836_v36 }
 0x592   :  { %2513 = vmatprep.subr.mxu1 %v7656_v7  ;;  %6145 = vmatprep.subr.mxu0 %v9249_v39 }
 0x593   :  { %2514 = vmatpush1.msra.mxu1 %v7659_v10  ;;  %6146 = vmatpush3.msra.mxu0 %v7840_v42 }
 0x594   :  { %2515 = vmatprep.subr.mxu1 %v7662_v13  ;;  %6147 = vmatprep.subr.mxu0 %v9249_v39 }
 0x595   :  { %2516 = vmatpush1.msra.mxu1 %v7665_v18  ;;  %6148 = vmatpush3.msra.mxu0 %v7844_v46 }
 0x596   :  { %2517 = vmatprep.subr.mxu1 %v7668_v21  ;;  %6149 = vmatprep.subr.mxu0 %v9249_v39 }
 0x597   :  { %2518 = vmatpush1.msra.mxu1 %v7671_v53  ;;  %6150 = vmatpush3.msra.mxu0 %v7848_v44 }
 0x598   :  { %2519 = vmatprep.subr.mxu1 %v7674_v61  ;;  %6151 = vmatprep.subr.mxu0 %v9249_v39 }
 0x599   :  { %2520 = vmatpush1.msra.mxu1 %v7677_v62  ;;  %6152 = vmatpush3.msra.mxu0 %v7852_v38 }
 0x59a   :  { %2521 = vmatprep.subr.mxu1 %v7680_v2  ;;  %6153 = vmatprep.subr.mxu0 %v9249_v39 }
 0x59b   :  { %2522 = vmatpush1.msra.mxu1 %v7683_v3  ;;  %6154 = vmatpush3.msra.mxu0 %v7856_v25 }
 0x59c   :  { %2523 = vmatprep.subr.mxu1 %v7686_v4  ;;  %6155 = vmatprep.subr.mxu0 %v9249_v39 }
 0x59d   :  { %2524 = vmatpush1.msra.mxu1 %v7689_v5  ;;  %6156 = vmatpush3.msra.mxu0 %v7860_v58 }
 0x59e   :  { %2525 = vmatprep.subr.mxu1 %v7692_v6  ;;  %6157 = vmatprep.subr.mxu0 %v9249_v39 }
 0x59f   :  { %2526 = vmatpush1.msra.mxu1 %v7694_v8  ;;  %6158 = vmatpush3.msra.mxu0 %v7696_v9 }
 0x5a0   :  { %2527 = vmatprep.subr.mxu1 %v7700_v11  ;;  %6159 = vmatprep.subr.mxu0 %v9249_v39 }
 0x5a1   :  { %2528 = vmatpush1.msra.mxu1 %v7702_v12  ;;  %6160 = vmatpush3.msra.mxu0 %v7704_v14 }
 0x5a2   :  { %2529 = vmatprep.subr.mxu1 %v7708_v15  ;;  %6161 = vmatprep.subr.mxu0 %v9249_v39 }
 0x5a3   :  { %2530 = vmatpush1.msra.mxu1 %v7714_v17  ;;  %6162 = vmatpush3.msra.mxu0 %v7710_v16 }
 0x5a4   :  { %2531 = vmatprep.subr.mxu1 %v7718_v24  ;;  %6163 = vmatprep.subr.mxu0 %v9249_v39 }
 0x5a5   :  { %2532 = vmatpush1.msra.mxu1 %v7724_v28  ;;  %6164 = vmatpush3.msra.mxu0 %v7720_v29 }
 0x5a6   :  { %2533 = vmatprep.subr.mxu1 %v7728_v23  ;;  %6165 = vmatprep.subr.mxu0 %v9249_v39 }
 0x5a7   :  { %2534 = vmatpush1.msra.mxu1 %v7734_v41  ;;  %6166 = vmatpush3.msra.mxu0 %v7730_v33 }
 0x5a8   :  { %2535 = vmatprep.subr.mxu1 %v7738_v35  ;;  %6167 = vmatprep.subr.mxu0 %v9249_v39 }
 0x5a9   :  { %2536 = vmatpush1.msra.mxu1 %v7744_v1  ;;  %6168 = vmatpush3.msra.mxu0 %v7740_v22 }
 0x5aa   :  { %2537 = vmatprep.subr.mxu1 %v7748_v43  ;;  %6169 = vmatprep.subr.mxu0 %v9249_v39 }
 0x5ab   :  { %2538 = vmatpush1.msra.mxu1 %v9290_v19  ;;  %6170 = vmatpush3.msra.mxu0 %v9291_v20 }
 0x5ac   :  { %2539 = vmatprep.subr.mxu1 %v9292_v37  ;;  %6171 = vmatprep.subr.mxu0 %v9249_v39 }
 0x5ad   :  { %2540 = vmatpush1.msra.mxu1 %v9293_v32  ;;  %6172 = vmatpush3.msra.mxu0 %v9294_v51  ;;  %v2280_v51 = vrot.slane %v2267_v49, %v7506_v30 }
 0x5ae   :  { %2541 = vmatprep.subr.mxu1 %v9295_v50  ;;  %6173 = vmatprep.subr.mxu0 %v9249_v39 }
 0x5af   :  { %2542 = vmatpush1.msra.mxu1 %v9296_v48  ;;  %2575 = vmatprep.mubr.f32.mxu1 %v9249_v39 }
 0x5b0   :  { %6174 = vmatpush3.msra.mxu0 %v9297_v40  ;;  %6175 = vmatprep.mubr.msk.f32.mxu0 %vm6972_vm8, %v9249_v39 }
 0x5b1   :  { %2738 = vmatprep.subr.mxu1 %v9298_v0  ;;  %6178 = vmatprep.subr.mxu0 %v9249_v39  ;;  %v9302_v0 = vld [vmem:[#allocation46_spill] sm:$0xff] }
 0x650   :  { %v2350_v45 = vpop.f32.mrf.mxu1  ;;  %v2421_v26 = vpop.f32.mrf.mxu0 }
 0x651   :  { %v2351_v55 = vadd.f32 %v2350_v45, %v2272_v54  ;;  %v2422_v37 = vadd.f32 %v2421_v26, %v2280_v51  ;;  %v9303_v45 = vld [vmem:[#allocation55_spill] sm:$0xff]  ;;  %v2940_v26 = vld [vmem:[#allocation8 + $0x140] sm:$0xff] }
 0x652   :  { %v2352_v47 = vpop.f32.mrf.mxu1  ;;  %v6142_v34 = vpop.f32.mrf.mxu0 }
 0x653   :  { %v2425_v27 = vadd.f32 %v2351_v55, %v9301_v60  ;;  %v2353_v40 = vadd.f32 %v2352_v47, %v2276_v52 }
 0x655   :  { %v2427_v59 = vmul.f32 0.5, %v2425_v27  ;;  %v2426_v48 = vadd.f32 %v2353_v40, %v9302_v0  ;;  %v2934_v27 = vld [vmem:[#allocation8 + $0x110] sm:$0xff] }
 0x656   :  { %v2930_v0 = vld [vmem:[#allocation8 + $0xf0] sm:$0xff] }
 0x657   :  { %6757 = vtanh.f32 %v2427_v59  ;;  %v2428_v50 = vmul.f32 0.5, %v2426_v48  ;;  %v2931_v59 = vld [vmem:[#allocation8 + $0xf8] sm:$0xff] }
 0x659   :  { %6759 = vtanh.f32 %v2428_v50 }
 0x664   :  { %v6758_v32 = vpop.eup %6757 }
 0x665   :  { %v2431_v57 = vmul.f32 0.5, %v6758_v32 }
 0x666   :  { %v6760_v34 = vpop.eup %6759 }
 0x667   :  { %v2433_v20 = vadd.f32 0.5, %v2431_v57  ;;  %v2432_v19 = vmul.f32 0.5, %v6760_v34  ;;  %v2925_v34 = vld [vmem:[#allocation8 + $0xc8] sm:$0xff] }
 0x669   :  { %v2435_v54 = vmul.f32 %v2433_v20, %v2422_v37  ;;  %v2434_v55 = vadd.f32 0.5, %v2432_v19 }
 0x66b   :  { %v2436_v56 = vadd.f32 %v2435_v54, %v9303_v45  ;;  %v2438_v60 = vsub.f32 1.0, %v2434_v55  ;;  %v2440_v40 = vmul.f32 %v2434_v55, %v7892_v31  ;;  %v2928_v54 = vld [vmem:[#allocation8 + $0xe0] sm:$0xff]  ;;  %v2927_v45 = vld [vmem:[#allocation8 + $0xd8] sm:$0xff] }
 0x66c   :  { %v2924_v55 = vld [vmem:[#allocation8 + $0xc0] sm:$0xff] }
 0x66d   :  { %6761 = vtanh.f32 %v2436_v56  ;;  %v2937_v56 = vld [vmem:[#allocation8 + $0x128] sm:$0xff] }
 0x67a   :  { %v6762_v52 = vpop.eup %6761 }
 0x67b   :  { %v2439_v47 = vmul.f32 %v6762_v52, %v2438_v60  ;;  %v2926_v60 = vld [vmem:[#allocation8 + $0xd0] sm:$0xff] }
 0x67c   :  { %v2922_v52 = vld [vmem:[#allocation8 + $0xb0] sm:$0xff] }
 0x67d   :  { %v7977_v48 = vadd.f32 %v2440_v40, %v2439_v47  ;;  %v2921_v47 = vld [vmem:[#allocation8 + $0xa8] sm:$0xff]  ;;  %v2923_v40 = vld [vmem:[#allocation8 + $0xb8] sm:$0xff] }
 0x67f   :  { %2576 = vmatmul.mubr.f32.vlgmr.msra.gmra.mxu1 %v7977_v48  ;;  %6176 = vmatmul.mubr.f32.vlgmr.msra.gmra.mxu0 %v7977_v48 }
 0x680   :  { %2739 = vmatpush1.msra.mxu1 %v7653_v63  ;;  %6179 = vmatpush3.msra.mxu0 %v7836_v36  ;;  %v9304_v63 = vld [vmem:[#allocation19_spill] sm:$0xff] }
 0x681   :  { %2740 = vmatprep.subr.mxu1 %v7656_v7  ;;  %6180 = vmatprep.subr.mxu0 %v9249_v39  ;;  %v9305_v7 = vld [vmem:[#allocation18_spill] sm:$0xff] }
 0x682   :  { %2741 = vmatpush1.msra.mxu1 %v7659_v10  ;;  %6181 = vmatpush3.msra.mxu0 %v7840_v42  ;;  %v9306_v10 = vld [vmem:[#allocation31_spill] sm:$0xff] }
 0x683   :  { %2742 = vmatprep.subr.mxu1 %v7662_v13  ;;  %6182 = vmatprep.subr.mxu0 %v9249_v39  ;;  %v9307_v13 = vld [vmem:[#allocation21_spill] sm:$0xff] }
 0x684   :  { %2743 = vmatpush1.msra.mxu1 %v7665_v18  ;;  %6183 = vmatpush3.msra.mxu0 %v7844_v46  ;;  %v9308_v18 = vld [vmem:[#allocation20_spill] sm:$0xff] }
 0x685   :  { %2744 = vmatprep.subr.mxu1 %v7668_v21  ;;  %6184 = vmatprep.subr.mxu0 %v9249_v39  ;;  %v9309_v21 = vld [vmem:[#allocation32_spill] sm:$0xff] }
 0x686   :  { %2745 = vmatpush1.msra.mxu1 %v7671_v53  ;;  %6185 = vmatpush3.msra.mxu0 %v7848_v44  ;;  %v9310_v53 = vld [vmem:[#allocation23_spill] sm:$0xff] }
 0x687   :  { %2746 = vmatprep.subr.mxu1 %v7674_v61  ;;  %6186 = vmatprep.subr.mxu0 %v9249_v39  ;;  %v9311_v61 = vld [vmem:[#allocation22_spill] sm:$0xff] }
 0x688   :  { %2747 = vmatpush1.msra.mxu1 %v7677_v62  ;;  %6187 = vmatpush3.msra.mxu0 %v7852_v38  ;;  %v2494_v62 = vld [vmem:[%s9104_s5] sm:$0x7] }
 0x689   :  { %2748 = vmatprep.subr.mxu1 %v7680_v2  ;;  %6188 = vmatprep.subr.mxu0 %v9249_v39  ;;  %v9312_v2 = vld [vmem:[#allocation37_spill] sm:$0xff] }
 0x68a   :  { %2749 = vmatpush1.msra.mxu1 %v7683_v3  ;;  %6189 = vmatpush3.msra.mxu0 %v7856_v25  ;;  %v2499_v3 = vrot.slane %v2494_v62, %v9312_v2 }
 0x68b   :  { %2750 = vmatprep.subr.mxu1 %v7686_v4  ;;  %6190 = vmatprep.subr.mxu0 %v9249_v39 }
 0x68c   :  { %2751 = vmatpush1.msra.mxu1 %v7689_v5  ;;  %6191 = vmatpush3.msra.mxu0 %v7860_v58 }
 0x68d   :  { %2752 = vmatprep.subr.mxu1 %v7692_v6  ;;  %6192 = vmatprep.subr.mxu0 %v9249_v39 }
 0x68e   :  { %2753 = vmatpush1.msra.mxu1 %v7694_v8  ;;  %6193 = vmatpush3.msra.mxu0 %v7696_v9  ;;  %v9313_v8 = vld [vmem:[#allocation38_spill] sm:$0xff] }
 0x68f   :  { %2754 = vmatprep.subr.mxu1 %v7700_v11  ;;  %6194 = vmatprep.subr.mxu0 %v9249_v39  ;;  %v2503_v9 = vrot.slane %v2494_v62, %v9313_v8 }
 0x690   :  { %2755 = vmatpush1.msra.mxu1 %v7702_v12  ;;  %6195 = vmatpush3.msra.mxu0 %v7704_v14  ;;  %v9314_v14 = vld [vmem:[#allocation47_spill] sm:$0xff] }
 0x691   :  { %2756 = vmatprep.subr.mxu1 %v7708_v15  ;;  %6196 = vmatprep.subr.mxu0 %v9249_v39 }
 0x692   :  { %2757 = vmatpush1.msra.mxu1 %v7714_v17  ;;  %6197 = vmatpush3.msra.mxu0 %v7710_v16 }
 0x693   :  { %2758 = vmatprep.subr.mxu1 %v7718_v24  ;;  %6198 = vmatprep.subr.mxu0 %v9249_v39  ;;  %v9315_v24 = vld [vmem:[#allocation48_spill] sm:$0xff] }
 0x694   :  { %2759 = vmatpush1.msra.mxu1 %v7724_v28  ;;  %6199 = vmatpush3.msra.mxu0 %v7720_v29 }
 0x695   :  { %2760 = vmatprep.subr.mxu1 %v7728_v23  ;;  %6200 = vmatprep.subr.mxu0 %v9249_v39  ;;  %v2507_v23 = vrot.slane %v2494_v62, %v7506_v30  ;;  %v2914_v62 = vld [vmem:[#allocation8 + $0x70] sm:$0xff] }
 0x696   :  { %2761 = vmatpush1.msra.mxu1 %v7734_v41  ;;  %6201 = vmatpush3.msra.mxu0 %v7730_v33 }
 0x697   :  { %2762 = vmatprep.subr.mxu1 %v7738_v35  ;;  %6202 = vmatprep.subr.mxu0 %v9249_v39 }
 0x698   :  { %2763 = vmatpush1.msra.mxu1 %v7744_v1  ;;  %6203 = vmatpush3.msra.mxu0 %v7740_v22 }
 0x699   :  { %2764 = vmatprep.subr.mxu1 %v7748_v43  ;;  %6204 = vmatprep.subr.mxu0 %v9249_v39  ;;  %v9316_v43 = vld [vmem:[#allocation56_spill] sm:$0xff] }
 0x69a   :  { %2765 = vmatpush1.msra.mxu1 %v9304_v63  ;;  %6205 = vmatpush3.msra.mxu0 %v9305_v7  ;;  %v2919_v63 = vld [vmem:[#allocation8 + $0x98] sm:$0xff]  ;;  %v2918_v7 = vld [vmem:[#allocation8 + $0x90] sm:$0xff] }
 0x69b   :  { %2766 = vmatprep.subr.mxu1 %v9306_v10  ;;  %6206 = vmatprep.subr.mxu0 %v9249_v39  ;;  %v2920_v10 = vld [vmem:[#allocation8 + $0xa0] sm:$0xff] }
 0x69c   :  { %2767 = vmatpush1.msra.mxu1 %v9307_v13  ;;  %6207 = vmatpush3.msra.mxu0 %v9308_v18  ;;  %v2916_v13 = vld [vmem:[#allocation8 + $0x80] sm:$0xff]  ;;  %v2915_v18 = vld [vmem:[#allocation8 + $0x78] sm:$0xff] }
 0x69d   :  { %2768 = vmatprep.subr.mxu1 %v9309_v21  ;;  %6208 = vmatprep.subr.mxu0 %v9249_v39  ;;  %v2917_v21 = vld [vmem:[#allocation8 + $0x88] sm:$0xff] }
 0x69e   :  { %2769 = vmatpush1.msra.mxu1 %v9310_v53  ;;  %2802 = vmatprep.mubr.f32.mxu1 %v9249_v39  ;;  %v2913_v53 = vld [vmem:[#allocation8 + $0x68] sm:$0xff] }
 0x69f   :  { %6209 = vmatpush3.msra.mxu0 %v9311_v61  ;;  %6210 = vmatprep.mubr.msk.f32.mxu0 %vm6972_vm8, %v9249_v39  ;;  %v2912_v61 = vld [vmem:[#allocation8 + $0x60] sm:$0xff] }
 0x6a0   :  { %6213 = vmatprep.subr.mxu0 %v9249_v39 }
 0x73f   :  { %v2577_v4 = vpop.f32.mrf.mxu1  ;;  %v2648_v5 = vpop.f32.mrf.mxu0 }
 0x740   :  { %v2578_v6 = vadd.f32 %v2577_v4, %v2499_v3  ;;  %v2649_v35 = vadd.f32 %v2648_v5, %v2507_v23  ;;  %v2910_v3 = vld [vmem:[#allocation8 + $0x50] sm:$0xff]  ;;  %v2909_v4 = vld [vmem:[#allocation8 + $0x48] sm:$0xff]  ;;  %v2911_v5 = vld [vmem:[#allocation8 + $0x58] sm:$0xff] }
 0x741   :  { %v2579_v11 = vpop.f32.mrf.mxu1  ;;  %v6177_v12 = vpop.f32.mrf.mxu0  ;;  %v2721_v23 = vld [vmem:[%s9104_s5] sm:$0x7] }
 0x742   :  { %v2652_v15 = vadd.f32 %v2578_v6, %v9314_v14  ;;  %v2580_v17 = vadd.f32 %v2579_v11, %v2503_v9  ;;  %v2907_v6 = vld [vmem:[#allocation8 + $0x38] sm:$0xff]  ;;  %v2906_v9 = vld [vmem:[#allocation8 + $0x30] sm:$0xff]  ;;  %v2908_v11 = vld [vmem:[#allocation8 + $0x40] sm:$0xff] }
 0x743   :  { %v2904_v12 = vld [vmem:[#allocation8 + $0x20] sm:$0xff]  ;;  %v2903_v14 = vld [vmem:[#allocation8 + $0x18] sm:$0xff] }
 0x744   :  { %v2654_v16 = vmul.f32 0.5, %v2652_v15  ;;  %v2653_v29 = vadd.f32 %v2580_v17, %v9315_v24  ;;  %v2905_v15 = vld [vmem:[#allocation8 + $0x28] sm:$0xff]  ;;  %v2900_v17 = vld [vmem:[#allocation8] sm:$0xff]  ;;  %v2902_v24 = vld [vmem:[#allocation8 + $0x10] sm:$0xff] }
 0x746   :  { %6763 = vtanh.f32 %v2654_v16  ;;  %v2655_v28 = vmul.f32 0.5, %v2653_v29  ;;  %v2901_v16 = vld [vmem:[#allocation8 + $0x8] sm:$0xff] }
 0x747   :  { %v6703_v29 = vld [vmem:[#allocation9 + $0xac] ss:$12 sps:$4 sm:$0xff]  }
 0x748   :  { %6765 = vtanh.f32 %v2655_v28  ;;  %v6704_v28 = vld [vmem:[#allocation9 + $0xb0] ss:$12 sps:$4 sm:$0xff]  }
 0x753   :  { %v6764_v33 = vpop.eup %6763 }
 0x754   :  { %v2658_v41 = vmul.f32 0.5, %v6764_v33  ;;  %v2726_v33 = vrot.slane %v2721_v23, %v9312_v2 }
 0x755   :  { %v6766_v19 = vpop.eup %6765 }
 0x756   :  { %v2660_v22 = vadd.f32 0.5, %v2658_v41  ;;  %v2659_v20 = vmul.f32 0.5, %v6766_v19  ;;  %v9317_v19 = vld [vmem:[#allocation49_spill] sm:$0xff] }
 0x758   :  { %v2662_v1 = vmul.f32 %v2660_v22, %v2649_v35  ;;  %v2661_v37 = vadd.f32 0.5, %v2659_v20 }
 0x75a   :  { %v2663_v31 = vadd.f32 %v2662_v1, %v9316_v43  ;;  %v2665_v32 = vsub.f32 1.0, %v2661_v37  ;;  %v2667_v49 = vmul.f32 %v2661_v37, %v7977_v48  ;;  %v2730_v1 = vrot.slane %v2721_v23, %v9313_v8 }
 0x75c   :  { %6767 = vtanh.f32 %v2663_v31 }
 0x769   :  { %v6768_v51 = vpop.eup %6767 }
 0x76a   :  { %v2666_v50 = vmul.f32 %v6768_v51, %v2665_v32  ;;  %v9318_v51 = vld [vmem:[#allocation50_spill] sm:$0xff] }
 0x76c   :  { %v8057_v57 = vadd.f32 %v2667_v49, %v2666_v50 }
 0x76e   :  { %2803 = vmatmul.mubr.f32.vlgmr.msra.gmra.mxu1 %v8057_v57  ;;  %6211 = vmatmul.mubr.f32.vlgmr.msra.gmra.mxu0 %v8057_v57 }
 0x76f   :  { %6214 = vmatpush3.msra.mxu0 %v7836_v36  ;;  %3029 = vmatprep.mubr.f32.mxu1 %v9249_v39  ;;  %v2946_v36 = vld [vmem:[#allocation8 + $0x170] sm:$0xff] }
 0x770   :  { %6215 = vmatprep.subr.mxu0 %v9249_v39  ;;  %6245 = vmatprep.mubr.msk.f32.mxu0 %vm6972_vm8, %v9249_v39 }
 0x771   :  { %6216 = vmatpush3.msra.mxu0 %v7840_v42  ;;  %2965 = vmatprep.subr.mxu1 %v2946_v36  ;;  %v2945_v42 = vld [vmem:[#allocation8 + $0x168] sm:$0xff]  ;;  %v2734_v36 = vrot.slane %v2721_v23, %v7506_v30  ;;  %v3126_v23 = vld [vmem:[%s9111_s12 + $0x10] sm:$0xff] }
 0x772   :  { %6217 = vmatprep.subr.mxu0 %v9249_v39  ;;  %2966 = vmatpush1.msra.mxu1 %v2945_v42 }
 0x773   :  { %6218 = vmatpush3.msra.mxu0 %v7844_v46  ;;  %v2943_v46 = vld [vmem:[#allocation8 + $0x158] sm:$0xff] }
 0x774   :  { %6219 = vmatprep.subr.mxu0 %v9249_v39  ;;  %2967 = vmatprep.subr.mxu1 %v2943_v46 }
 0x775   :  { %6220 = vmatpush3.msra.mxu0 %v7848_v44  ;;  %v2942_v44 = vld [vmem:[#allocation8 + $0x150] sm:$0xff] }
 0x776   :  { %6221 = vmatprep.subr.mxu0 %v9249_v39  ;;  %2968 = vmatpush1.msra.mxu1 %v2942_v44 }
 0x777   :  { %6222 = vmatpush3.msra.mxu0 %v7852_v38  ;;  %2969 = vmatprep.subr.mxu1 %v2940_v26  ;;  %v2939_v38 = vld [vmem:[#allocation8 + $0x138] sm:$0xff] }
 0x778   :  { %6223 = vmatprep.subr.mxu0 %v9249_v39  ;;  %2970 = vmatpush1.msra.mxu1 %v2939_v38 }
 0x779   :  { %6224 = vmatpush3.msra.mxu0 %v7856_v25  ;;  %2971 = vmatprep.subr.mxu1 %v2937_v56  ;;  %v2936_v25 = vld [vmem:[#allocation8 + $0x120] sm:$0xff]  ;;  %v9319_v56 = vld [vmem:[#allocation57_spill] sm:$0xff] }
 0x77a   :  { %6225 = vmatprep.subr.mxu0 %v9249_v39  ;;  %2972 = vmatpush1.msra.mxu1 %v2936_v25 }
 0x77b   :  { %6226 = vmatpush3.msra.mxu0 %v7860_v58  ;;  %2973 = vmatprep.subr.mxu1 %v2934_v27  ;;  %v2933_v58 = vld [vmem:[#allocation8 + $0x108] sm:$0xff] }
 0x77c   :  { %6227 = vmatprep.subr.mxu0 %v9249_v39  ;;  %2974 = vmatpush1.msra.mxu1 %v2933_v58 }
 0x77d   :  { %2975 = vmatprep.subr.mxu1 %v2931_v59  ;;  %6228 = vmatpush3.msra.mxu0 %v2926_v60  ;;  %v3125_v60 = vld [vmem:[%s9111_s12 + $0x8] sm:$0xff] }
 0x77e   :  { %2976 = vmatpush1.msra.mxu1 %v2930_v0  ;;  %6229 = vmatprep.subr.mxu0 %v9249_v39 }
 0x77f   :  { %2977 = vmatprep.subr.mxu1 %v2928_v54  ;;  %6230 = vmatpush3.msra.mxu0 %v2923_v40  ;;  %v3124_v40 = vld [vmem:[%s9111_s12] sm:$0xff] }
 0x780   :  { %2978 = vmatpush1.msra.mxu1 %v2927_v45  ;;  %6231 = vmatprep.subr.mxu0 %v9249_v39 }
 0x781   :  { %2979 = vmatprep.subr.mxu1 %v2925_v34  ;;  %6232 = vmatpush3.msra.mxu0 %v2920_v10  ;;  %v6705_v10 = vld [vmem:[#allocation9 + $0x90] ss:$12 sps:$4 sm:$0xff]  }
 0x782   :  { %2980 = vmatpush1.msra.mxu1 %v2924_v55  ;;  %6233 = vmatprep.subr.mxu0 %v9249_v39  ;;  %v6701_v55 = vld [vmem:[#allocation9 + $0xa8] ss:$12 sps:$4 sm:$0xff]  }
 0x783   :  { %2981 = vmatprep.subr.mxu1 %v2922_v52  ;;  %6234 = vmatpush3.msra.mxu0 %v2917_v21  ;;  %v9320_v21 = vmov 0  }
 0x784   :  { %2982 = vmatpush1.msra.mxu1 %v2921_v47  ;;  %6235 = vmatprep.subr.mxu0 %v9249_v39  ;;  %v6707_v47 = vld [vmem:[#allocation9 + $0x94] ss:$12 sps:$4 sm:$0xff]  }
 0x785   :  { %2983 = vmatprep.subr.mxu1 %v2919_v63  ;;  %6236 = vmatpush3.msra.mxu0 %v2914_v62  ;;  %v6708_v63 = vld [vmem:[#allocation9 + $0x98] ss:$12 sps:$4 sm:$0xff]   ;;  %v6716_v62 = vld [vmem:[#allocation9 + $0x68] ss:$12 sps:$4 sm:$0xff]  }
 0x786   :  { %2984 = vmatpush1.msra.mxu1 %v2918_v7  ;;  %6237 = vmatprep.subr.mxu0 %v9249_v39  ;;  %v3132_v7 = vpack.c.bf16 %v3125_v60, %v3124_v40  ;;  %v8211_v60 = vld [vmem:[#allocation11 + $0x30] sm:$0xff]  ;;  %v8217_v40 = vld [vmem:[#allocation11 + $0x20] sm:$0xff] }
 0x787   :  { %2985 = vmatprep.subr.mxu1 %v2916_v13  ;;  %6238 = vmatpush3.msra.mxu0 %v2911_v5  ;;  %v6711_v13 = vld [vmem:[#allocation9 + $0x7c] ss:$12 sps:$4 sm:$0xff]   ;;  %9323 = vst [vmem:[#allocation25_spill] sm:$0xff] %v8211_v60  ;;  %9324 = vst [vmem:[#allocation34_spill] sm:$0xff] %v8217_v40 }
 0x788   :  { %2986 = vmatpush1.msra.mxu1 %v2915_v18  ;;  %6239 = vmatprep.subr.mxu0 %v9249_v39  ;;  %v6712_v18 = vld [vmem:[#allocation9 + $0x80] ss:$12 sps:$4 sm:$0xff]   ;;  %v6720_v5 = vld [vmem:[#allocation9 + $0x50] ss:$12 sps:$4 sm:$0xff]  }
 0x789   :  { %2987 = vmatprep.subr.mxu1 %v2913_v53  ;;  %6240 = vmatpush3.msra.mxu0 %v2908_v11  ;;  %v6709_v53 = vld [vmem:[#allocation9 + $0x78] ss:$12 sps:$4 sm:$0xff]  }
 0x78a   :  { %2988 = vmatpush1.msra.mxu1 %v2912_v61  ;;  %6241 = vmatprep.subr.mxu0 %v9249_v39  ;;  %v6715_v61 = vld [vmem:[#allocation9 + $0x64] ss:$12 sps:$4 sm:$0xff]  }
 0x78b   :  { %2989 = vmatprep.subr.mxu1 %v2910_v3  ;;  %6242 = vmatpush3.msra.mxu0 %v2905_v15  ;;  %v6713_v3 = vld [vmem:[#allocation9 + $0x60] ss:$12 sps:$4 sm:$0xff]   ;;  %v6724_v11 = vld [vmem:[#allocation9 + $0x38] ss:$12 sps:$4 sm:$0xff]  }
 0x78c   :  { %2990 = vmatpush1.msra.mxu1 %v2909_v4  ;;  %6243 = vmatprep.subr.mxu0 %v9249_v39  ;;  %v6719_v4 = vld [vmem:[#allocation9 + $0x4c] ss:$12 sps:$4 sm:$0xff]  }
 0x78d   :  { %2991 = vmatprep.subr.mxu1 %v2907_v6  ;;  %6244 = vmatpush3.msra.mxu0 %v2902_v24  ;;  %v6717_v6 = vld [vmem:[#allocation9 + $0x48] ss:$12 sps:$4 sm:$0xff]   ;;  %v6728_v15 = vld [vmem:[#allocation9 + $0x20] ss:$12 sps:$4 sm:$0xff]  }
 0x78e   :  { %2992 = vmatpush1.msra.mxu1 %v2906_v9  ;;  %6248 = vmatprep.subr.bf16.mxu0 %v6704_v28  ;;  %v6723_v9 = vld [vmem:[#allocation9 + $0x34] ss:$12 sps:$4 sm:$0xff]  }
 0x78f   :  { %2993 = vmatprep.subr.mxu1 %v2904_v12  ;;  %v6721_v12 = vld [vmem:[#allocation9 + $0x30] ss:$12 sps:$4 sm:$0xff]   ;;  %v6732_v24 = vld [vmem:[#allocation9 + $0x8] ss:$12 sps:$4 sm:$0xff]  }
 0x790   :  { %2994 = vmatpush1.msra.mxu1 %v2903_v14  ;;  %v6727_v14 = vld [vmem:[#allocation9 + $0x1c] ss:$12 sps:$4 sm:$0xff]  }
 0x791   :  { %2995 = vmatprep.subr.mxu1 %v2901_v16  ;;  %v6725_v16 = vld [vmem:[#allocation9 + $0x18] ss:$12 sps:$4 sm:$0xff]  }
 0x792   :  { %2996 = vmatpush1.msra.mxu1 %v2900_v17  ;;  %v6731_v17 = vld [vmem:[#allocation9 + $0x4] ss:$12 sps:$4 sm:$0xff]  }
 0x793   :  { %3313 = vmatprep.subr.bf16.mxu1 %v6703_v29  ;;  %v6729_v29 = vld [vmem:[#allocation9] ss:$12 sps:$4 sm:$0xff]  }
 0x82e   :  { %v2804_v41 = vpop.f32.mrf.mxu1  ;;  %v2875_v35 = vpop.f32.mrf.mxu0 }
 0x82f   :  { %v2805_v22 = vadd.f32 %v2804_v41, %v2726_v33  ;;  %v2876_v44 = vadd.f32 %v2875_v35, %v2734_v36  ;;  %v3134_v41 = vpack.c.bf16 %v8057_v57, %v7977_v48  ;;  %v8119_v35 = vld [vmem:[#allocation11 + $0x170] sm:$0xff]  ;;  %v8125_v48 = vld [vmem:[#allocation11 + $0x158] sm:$0xff]  ;;  %v8161_v36 = vld [vmem:[#allocation11 + $0xc8] sm:$0xff] }
 0x830   :  { %v2806_v43 = vpop.f32.mrf.mxu1  ;;  %v6212_v31 = vpop.f32.mrf.mxu0  ;;  %9321 = vst [vmem:[#allocation33_spill] sm:$0xff] %v8119_v35 }
 0x831   :  { %v2879_v20 = vadd.f32 %v2805_v22, %v9317_v19  ;;  %v2807_v32 = vadd.f32 %v2806_v43, %v2730_v1  ;;  %v8122_v22 = vld [vmem:[#allocation11 + $0x168] sm:$0xff]  ;;  %v8131_v1 = vld [vmem:[#allocation11 + $0x140] sm:$0xff]  ;;  %v8134_v43 = vld [vmem:[#allocation11 + $0x138] sm:$0xff] }
 0x832   :  { %v8137_v31 = vld [vmem:[#allocation11 + $0x128] sm:$0xff]  ;;  %v8140_v19 = vld [vmem:[#allocation11 + $0x120] sm:$0xff] }
 0x833   :  { %v2881_v37 = vmul.f32 0.5, %v2879_v20  ;;  %v2880_v50 = vadd.f32 %v2807_v32, %v9318_v51  ;;  %v8143_v20 = vld [vmem:[#allocation11 + $0x110] sm:$0xff]  ;;  %v8149_v32 = vld [vmem:[#allocation11 + $0xf8] sm:$0xff] }
 0x834   :  { %v8152_v51 = vld [vmem:[#allocation11 + $0xf0] sm:$0xff] }
 0x835   :  { %6769 = vtanh.f32 %v2881_v37  ;;  %v2882_v49 = vmul.f32 0.5, %v2880_v50  ;;  %v8146_v37 = vld [vmem:[#allocation11 + $0x108] sm:$0xff]  ;;  %v8155_v50 = vld [vmem:[#allocation11 + $0xe0] sm:$0xff] }
 0x837   :  { %6771 = vtanh.f32 %v2882_v49  ;;  %v8158_v49 = vld [vmem:[#allocation11 + $0xd8] sm:$0xff] }
 0x842   :  { %v6770_v42 = vpop.eup %6769 }
 0x843   :  { %v2885_v46 = vmul.f32 0.5, %v6770_v42  ;;  %v8164_v42 = vld [vmem:[#allocation11 + $0xc0] sm:$0xff] }
 0x844   :  { %v6772_v27 = vpop.eup %6771 }
 0x845   :  { %v2887_v26 = vadd.f32 0.5, %v2885_v46  ;;  %v2886_v58 = vmul.f32 0.5, %v6772_v27  ;;  %v8167_v46 = vld [vmem:[#allocation11 + $0xb0] sm:$0xff]  ;;  %v8184_v27 = vld [vmem:[#allocation11 + $0x178] sm:$0xff] }
 0x847   :  { %v2889_v38 = vmul.f32 %v2887_v26, %v2876_v44  ;;  %v2888_v59 = vadd.f32 0.5, %v2886_v58  ;;  %v8170_v44 = vld [vmem:[#allocation11 + $0xa8] sm:$0xff]  ;;  %v8173_v26 = vld [vmem:[#allocation11 + $0x98] sm:$0xff] }
 0x848   :  { %v8187_v58 = vld [vmem:[#allocation11 + $0x68] sm:$0xff] }
 0x849   :  { %v2890_v25 = vadd.f32 %v2889_v38, %v9319_v56  ;;  %v2892_v0 = vsub.f32 1.0, %v2888_v59  ;;  %v2894_v34 = vmul.f32 %v2888_v59, %v8057_v57  ;;  %v8128_v57 = vld [vmem:[#allocation11 + $0x150] sm:$0xff]  ;;  %v8179_v56 = vld [vmem:[#allocation11 + $0x80] sm:$0xff] }
 0x84a   :  { %v8176_v38 = vld [vmem:[#allocation11 + $0x90] sm:$0xff]  ;;  %v8191_v59 = vld [vmem:[#allocation11 + $0x60] sm:$0xff] }
 0x84b   :  { %6773 = vtanh.f32 %v2890_v25  ;;  %v8182_v25 = vld [vmem:[#allocation11 + $0x78] sm:$0xff] }
 0x858   :  { %v6774_v54 = vpop.eup %6773 }
 0x859   :  { %v2893_v45 = vmul.f32 %v6774_v54, %v2892_v0  ;;  %v8194_v0 = vld [vmem:[#allocation11 + $0x160] sm:$0xff]  ;;  %v8197_v54 = vld [vmem:[#allocation11 + $0x50] sm:$0xff] }
 0x85b   :  { %v8099_v52 = vadd.f32 %v2894_v34, %v2893_v45  ;;  %v8201_v45 = vld [vmem:[#allocation11 + $0x48] sm:$0xff] }
 0x85c   :  { %v8204_v34 = vld [vmem:[#allocation11 + $0x148] sm:$0xff] }
 0x85d   :  { %3030 = vmatmul.mubr.f32.vlgmr.msra.gmra.mxu1 %v8099_v52  ;;  %6246 = vmatmul.mubr.f32.vlgmr.msra.gmra.mxu0 %v8099_v52 }
 0x85e   :  { %3314 = vmatpush1.bf16.msra.mxu1 %v6701_v55  ;;  %6249 = vmatpush3.bf16.msra.mxu0 %v6704_v28  ;;  %v3127_v28 = vld [vmem:[%s9111_s12 + $0x18] sm:$0xff] }
 0x85f   :  { %6264 = vmatprep.mubr.bf16.mxu0 %v3132_v7  ;;  %3315 = vmatprep.subr.bf16.mxu1 %v6707_v47  ;;  %v3133_v33 = vpack.c.bf16 %v3127_v28, %v3126_v23  ;;  %v8207_v55 = vld [vmem:[#allocation11 + $0x38] sm:$0xff]  ;;  %v8214_v47 = vld [vmem:[#allocation11 + $0x130] sm:$0xff]  ;;  %v9332_v23 = vld [vmem:[#allocation51_spill] sm:$0xff] }
 0x860   :  { %6250 = vmatprep.subr.bf16.mxu0 %v6708_v63  ;;  %3345 = vmatprep.mubr.bf16.mxu1 %v9320_v21  ;;  %9322 = vst [vmem:[#allocation24_spill] sm:$0xff] %v8207_v55 }
 0x862   :  { %3316 = vmatpush1.bf16.msra.mxu1 %v6705_v10  ;;  %6251 = vmatpush3.bf16.msra.mxu0 %v6708_v63  ;;  %v8221_v63 = vld [vmem:[#allocation11 + $0x18] sm:$0xff]  ;;  %v8227_v10 = vld [vmem:[#allocation11 + $0x8] sm:$0xff] }
 0x863   :  { %3317 = vmatprep.subr.bf16.mxu1 %v6711_v13  ;;  %6252 = vmatprep.subr.bf16.mxu0 %v6712_v18  ;;  %9325 = vst [vmem:[#allocation26_spill] sm:$0xff] %v8221_v63  ;;  %9326 = vst [vmem:[#allocation27_spill] sm:$0xff] %v8227_v10  ;;  %v8230_v13 = vld [vmem:[#allocation11] sm:$0xff] }
 0x864   :  { %9327 = vst [vmem:[#allocation35_spill] sm:$0xff] %v8230_v13 }
 0x866   :  { %3318 = vmatpush1.bf16.msra.mxu1 %v6709_v53  ;;  %6253 = vmatpush3.bf16.msra.mxu0 %v6712_v18  ;;  %v8232_v18 = vld [vmem:[#allocation11 + $0x100] sm:$0xff]  ;;  %v8241_v53 = vld [vmem:[#allocation11 + $0xd0] sm:$0xff] }
 0x867   :  { %3319 = vmatprep.subr.bf16.mxu1 %v6715_v61  ;;  %6254 = vmatprep.subr.bf16.mxu0 %v6716_v62  ;;  %v8246_v61 = vld [vmem:[#allocation11 + $0xb8] sm:$0xff] }
 0x86a   :  { %3320 = vmatpush1.bf16.msra.mxu1 %v6713_v3  ;;  %6255 = vmatpush3.bf16.msra.mxu0 %v6716_v62  ;;  %v8250_v62 = vld [vmem:[#allocation11 + $0xa0] sm:$0xff]  ;;  %v8254_v3 = vld [vmem:[#allocation11 + $0x88] sm:$0xff] }
 0x86b   :  { %3321 = vmatprep.subr.bf16.mxu1 %v6719_v4  ;;  %6256 = vmatprep.subr.bf16.mxu0 %v6720_v5  ;;  %v8258_v4 = vld [vmem:[#allocation11 + $0x70] sm:$0xff] }
 0x86e   :  { %3322 = vmatpush1.bf16.msra.mxu1 %v6717_v6  ;;  %6257 = vmatpush3.bf16.msra.mxu0 %v6720_v5  ;;  %v8262_v5 = vld [vmem:[#allocation11 + $0x58] sm:$0xff]  ;;  %v8266_v6 = vld [vmem:[#allocation11 + $0x40] sm:$0xff] }
 0x86f   :  { %3323 = vmatprep.subr.bf16.mxu1 %v6723_v9  ;;  %6258 = vmatprep.subr.bf16.mxu0 %v6724_v11  ;;  %9328 = vst [vmem:[#allocation29_spill] sm:$0xff] %v8262_v5  ;;  %9329 = vst [vmem:[#allocation30_spill] sm:$0xff] %v8266_v6  ;;  %v8270_v9 = vld [vmem:[#allocation11 + $0x28] sm:$0xff] }
 0x870   :  { %9330 = vst [vmem:[#allocation36_spill] sm:$0xff] %v8270_v9 }
 0x872   :  { %3324 = vmatpush1.bf16.msra.mxu1 %v6721_v12  ;;  %6259 = vmatpush3.bf16.msra.mxu0 %v6724_v11  ;;  %v8274_v11 = vld [vmem:[#allocation11 + $0x10] sm:$0xff]  ;;  %v2948_v12 = vld [vmem:[%s9104_s5] sm:$0x7] }
 0x873   :  { %3325 = vmatprep.subr.bf16.mxu1 %v6727_v14  ;;  %6260 = vmatprep.subr.bf16.mxu0 %v6728_v15  ;;  %9331 = vst [vmem:[#allocation39_spill] sm:$0xff] %v8274_v11  ;;  %v2953_v14 = vrot.slane %v2948_v12, %v9312_v2 }
 0x876   :  { %3326 = vmatpush1.bf16.msra.mxu1 %v6725_v16  ;;  %6261 = vmatpush3.bf16.msra.mxu0 %v6728_v15 }
 0x877   :  { %3327 = vmatprep.subr.bf16.mxu1 %v6731_v17  ;;  %6262 = vmatprep.subr.bf16.mxu0 %v6732_v24 }
 0x87a   :  { %3328 = vmatpush1.bf16.msra.mxu1 %v6729_v29  ;;  %6263 = vmatpush3.bf16.msra.mxu0 %v6732_v24  ;;  %v2957_v24 = vrot.slane %v2948_v12, %v9313_v8 }
 0x87b   :  { %6272 = vmatprep.subr.mxu0 %v9249_v39  ;;  %3543 = vmatprep.subr.mxu1 %v8119_v35 }
 0x87d   :  { %3346 = vmatmul.mubr.bf16.vlgmr.msra.gmra.mxu1 %v3132_v7  ;;  %6265 = vmatmul.mubr.bf16.vlgmr.msra.gmra.mxu0 %v3133_v33  ;;  %v8224_v7 = vld [vmem:[#allocation11 + $0x118] sm:$0xff] }
 0x87e   :  { %6268 = vmatprep.mubr.bf16.mxu0 %v3134_v41  ;;  %3355 = vmatprep.mubr.bf16.mxu1 %v9320_v21 }
 0x87f   :  { %3544 = vmatpush1.msra.mxu1 %v8122_v22  ;;  %6273 = vmatpush3.msra.mxu0 %v8184_v27 }
 0x880   :  { %3545 = vmatprep.subr.mxu1 %v8125_v48  ;;  %6274 = vmatprep.subr.mxu0 %v9249_v39 }
 0x881   :  { %3546 = vmatpush1.msra.mxu1 %v8128_v57  ;;  %6275 = vmatpush3.msra.mxu0 %v8194_v0 }
 0x882   :  { %3547 = vmatprep.subr.mxu1 %v8131_v1  ;;  %6276 = vmatprep.subr.mxu0 %v9249_v39 }
 0x883   :  { %3548 = vmatpush1.msra.mxu1 %v8134_v43  ;;  %6277 = vmatpush3.msra.mxu0 %v8204_v34 }
 0x884   :  { %3549 = vmatprep.subr.mxu1 %v8137_v31  ;;  %6278 = vmatprep.subr.mxu0 %v9249_v39 }
 0x885   :  { %3356 = vmatmul.mubr.bf16.gmra.mxu1 %v3133_v33  ;;  %6279 = vmatpush3.msra.mxu0 %v8214_v47 }
 0x886   :  { %3365 = vmatprep.mubr.bf16.mxu1 %v9320_v21  ;;  %3550 = vmatpush1.msra.mxu1 %v8140_v19 }
 0x887   :  { %3551 = vmatprep.subr.mxu1 %v8143_v20  ;;  %6280 = vmatprep.subr.mxu0 %v9249_v39 }
 0x888   :  { %3552 = vmatpush1.msra.mxu1 %v8146_v37  ;;  %6281 = vmatpush3.msra.mxu0 %v8224_v7 }
 0x889   :  { %3553 = vmatprep.subr.mxu1 %v8149_v32  ;;  %6282 = vmatprep.subr.mxu0 %v9249_v39 }
 0x88a   :  { %3554 = vmatpush1.msra.mxu1 %v8152_v51  ;;  %6283 = vmatpush3.msra.mxu0 %v8232_v18 }
 0x88b   :  { %3555 = vmatprep.subr.mxu1 %v8155_v50  ;;  %6284 = vmatprep.subr.mxu0 %v9249_v39 }
 0x88c   :  { %3556 = vmatpush1.msra.mxu1 %v8158_v49 }
 0x88d   :  { %3366 = vmatmul.mubr.bf16.gmra.mxu1 %v3134_v41  ;;  %3557 = vmatprep.subr.mxu1 %v8161_v36 }
 0x88e   :  { %3375 = vmatprep.mubr.bf16.mxu1 %v9320_v21  ;;  %3558 = vmatpush1.msra.mxu1 %v8164_v42  ;;  %v8238_v21 = vld [vmem:[#allocation11 + $0xe8] sm:$0xff] }
 0x88f   :  { %3559 = vmatprep.subr.mxu1 %v8167_v46  ;;  %6285 = vmatpush3.msra.mxu0 %v8238_v21 }
 0x890   :  { %3560 = vmatpush1.msra.mxu1 %v8170_v44  ;;  %6286 = vmatprep.subr.mxu0 %v9249_v39 }
 0x891   :  { %3561 = vmatprep.subr.mxu1 %v8173_v26  ;;  %6287 = vmatpush3.msra.mxu0 %v8241_v53 }
 0x892   :  { %3562 = vmatpush1.msra.mxu1 %v8176_v38  ;;  %6288 = vmatprep.subr.mxu0 %v9249_v39 }
 0x893   :  { %3563 = vmatprep.subr.mxu1 %v8179_v56  ;;  %6289 = vmatpush3.msra.mxu0 %v8246_v61 }
 0x894   :  { %3564 = vmatpush1.msra.mxu1 %v8182_v25  ;;  %6290 = vmatprep.subr.mxu0 %v9249_v39 }
 0x895   :  { %3565 = vmatprep.subr.mxu1 %v8187_v58  ;;  %6291 = vmatpush3.msra.mxu0 %v8250_v62 }
 0x896   :  { %3566 = vmatpush1.msra.mxu1 %v8191_v59  ;;  %6292 = vmatprep.subr.mxu0 %v9249_v39 }
 0x897   :  { %3567 = vmatprep.subr.mxu1 %v8197_v54  ;;  %6293 = vmatpush3.msra.mxu0 %v8254_v3 }
 0x898   :  { %3568 = vmatpush1.msra.mxu1 %v8201_v45  ;;  %6294 = vmatprep.subr.mxu0 %v9249_v39 }
 0x899   :  { %3569 = vmatprep.subr.mxu1 %v8207_v55  ;;  %6295 = vmatpush3.msra.mxu0 %v8258_v4 }
 0x89a   :  { %3570 = vmatpush1.msra.mxu1 %v8211_v60  ;;  %6296 = vmatprep.subr.mxu0 %v9249_v39 }
 0x89b   :  { %3571 = vmatprep.subr.mxu1 %v8217_v40  ;;  %6297 = vmatpush3.msra.mxu0 %v8262_v5 }
 0x89c   :  { %3572 = vmatpush1.msra.mxu1 %v8221_v63  ;;  %6298 = vmatprep.subr.mxu0 %v9249_v39 }
 0x89d   :  { %3573 = vmatprep.subr.mxu1 %v8227_v10  ;;  %6299 = vmatpush3.msra.mxu0 %v8266_v6 }
 0x89e   :  { %3574 = vmatpush1.msra.mxu1 %v8230_v13  ;;  %6300 = vmatprep.subr.mxu0 %v9249_v39 }
 0x89f   :  { %3770 = vmatprep.subr.mxu1 %v8119_v35  ;;  %6301 = vmatpush3.msra.mxu0 %v8270_v9  ;;  %v2961_v9 = vrot.slane %v2948_v12, %v7506_v30 }
 0x8a0   :  { %6302 = vmatprep.subr.mxu0 %v9249_v39 }
 0x8a1   :  { %6303 = vmatpush3.msra.mxu0 %v8274_v11  ;;  %v9333_v11 = vld [vmem:[#allocation52_spill] sm:$0xff] }
 0x8a2   :  { %6307 = vmatprep.subr.mxu0 %v9249_v39 }
 0x91d   :  { %v3031_v15 = vpop.f32.mrf.mxu1  ;;  %v3102_v16 = vpop.f32.mrf.mxu0 }
 0x91e   :  { %v3032_v17 = vadd.f32 %v3031_v15, %v2953_v14  ;;  %v3103_v40 = vadd.f32 %v3102_v16, %v2961_v9  ;;  %v9334_v15 = vld [vmem:[#allocation58_spill] sm:$0xff]  ;;  %v9342_v9 = vld [vmem:[#allocation39_spill] sm:$0xff] }
 0x91f   :  { %v3033_v29 = vpop.f32.mrf.mxu1  ;;  %v6247_v28 = vpop.f32.mrf.mxu0 }
 0x920   :  { %v3106_v33 = vadd.f32 %v3032_v17, %v9332_v23  ;;  %v3034_v35 = vadd.f32 %v3033_v29, %v2957_v24 }
 0x922   :  { %v3108_v41 = vmul.f32 0.5, %v3106_v33  ;;  %v3107_v13 = vadd.f32 %v3034_v35, %v9333_v11  ;;  %v9343_v11 = vld [vmem:[#allocation33_spill] sm:$0xff] }
 0x924   :  { %6775 = vtanh.f32 %v3108_v41  ;;  %v3109_v10 = vmul.f32 0.5, %v3107_v13 }
 0x926   :  { %6777 = vtanh.f32 %v3109_v10 }
 0x931   :  { %v6776_v63 = vpop.eup %6775 }
 0x932   :  { %v3112_v2 = vmul.f32 0.5, %v6776_v63  ;;  %v9340_v63 = vld [vmem:[#allocation27_spill] sm:$0xff] }
 0x933   :  { %v6778_v28 = vpop.eup %6777 }
 0x934   :  { %v3114_v6 = vadd.f32 0.5, %v3112_v2  ;;  %v3113_v60 = vmul.f32 0.5, %v6778_v28  ;;  %v9335_v2 = vld [vmem:[#allocation25_spill] sm:$0xff] }
 0x936   :  { %v3116_v14 = vmul.f32 %v3114_v6, %v3103_v40  ;;  %v3115_v17 = vadd.f32 0.5, %v3113_v60  ;;  %v9338_v60 = vld [vmem:[#allocation26_spill] sm:$0xff]  ;;  %v9339_v40 = vld [vmem:[#allocation36_spill] sm:$0xff]  ;;  %v9341_v6 = vld [vmem:[#allocation35_spill] sm:$0xff] }
 0x938   :  { %v3117_v8 = vadd.f32 %v3116_v14, %v9334_v15  ;;  %v3119_v23 = vsub.f32 1.0, %v3115_v17  ;;  %v3121_v35 = vmul.f32 %v3115_v17, %v8099_v52 }
 0x93a   :  { %6779 = vtanh.f32 %v3117_v8  ;;  %v9336_v8 = vld [vmem:[#allocation30_spill] sm:$0xff] }
 0x93d   :  { %v3347_v12 = vpop.f32.mrf.mxu1 }
 0x93f   :  { %v3349_v16 = vpop.f32.mrf.mxu1 }
 0x941   :  { %v8363_v33 = vpop.f32.mrf.mxu1 }
 0x942   :  { %9344 = vst [vmem:[#allocation40_spill] sm:$0xff] %v8363_v33 }
 0x943   :  { %v8365_v41 = vpop.f32.mrf.mxu1 }
 0x944   :  { %9345 = vst [vmem:[#allocation53_spill] sm:$0xff] %v8365_v41 }
 0x945   :  { %v8367_v14 = vpop.f32.mrf.mxu1 }
 0x946   :  { %9346 = vst [vmem:[#allocation41_spill] sm:$0xff] %v8367_v14 }
 0x947   :  { %v6780_v24 = vpop.eup %6779  ;;  %v8369_v15 = vpop.f32.mrf.mxu1 }
 0x948   :  { %v3120_v29 = vmul.f32 %v6780_v24, %v3119_v23  ;;  %9347 = vst [vmem:[#allocation42_spill] sm:$0xff] %v8369_v15  ;;  %v8375_v23 = vpop.f32.mrf.mxu0 }
 0x949   :  { %v8371_v28 = vpop.f32.mrf.mxu1  ;;  %9350 = vst [vmem:[#allocation54_spill] sm:$0xff] %v8375_v23 }
 0x94a   :  { %v3122_v13 = vadd.f32 %v3121_v35, %v3120_v29  ;;  %9348 = vst [vmem:[#allocation43_spill] sm:$0xff] %v8371_v28  ;;  %v3420_v29 = vpop.f32.mrf.mxu0 }
 0x94b   :  { %v8373_v17 = vpop.f32.mrf.mxu1 }
 0x94c   :  { %v3135_v10 = vpack.c.bf16 %v3122_v13, %v8099_v52  ;;  %v9337_v52 = vld [vmem:[#allocation34_spill] sm:$0xff]  ;;  %9349 = vst [vmem:[#allocation44_spill] sm:$0xff] %v8373_v17  ;;  %v8381_v13 = vpop.f32.mrf.mxu0 }
 0x94d   :  { %v8377_v24 = vpop.f32.mrf.mxu1  ;;  %9353 = vst [vmem:[#allocation46_spill] sm:$0xff] %v8381_v13  ;;  %v3168_v17 = vld [vmem:[%s9107_s8] sm:$0x7] }
 0x94e   :  { %3376 = vmatmul.mubr.bf16.gmra.mxu1 %v3135_v10  ;;  %6269 = vmatmul.mubr.bf16.gmra.mxu0 %v3135_v10  ;;  %9351 = vst [vmem:[#allocation28_spill] sm:$0xff] %v8377_v24  ;;  %v8385_v41 = vpop.f32.mrf.mxu0 }
 0x94f   :  { %3607 = vmatprep.mubr.f32.mxu1 %v9249_v39  ;;  %6304 = vmatprep.mubr.msk.f32.mxu0 %vm6972_vm8, %v9249_v39  ;;  %v8379_v35 = vpop.f32.mrf.mxu1  ;;  %9355 = vst [vmem:[#allocation19_spill] sm:$0xff] %v8385_v41 }
 0x950   :  { %9352 = vst [vmem:[#allocation45_spill] sm:$0xff] %v8379_v35 }
 0x951   :  { %v8383_v10 = vpop.f32.mrf.mxu1 }
 0x952   :  { %9354 = vst [vmem:[#allocation55_spill] sm:$0xff] %v8383_v10  ;;  %v3526_v10 = vld [vmem:[%s9108_s9] sm:$0x7] }
 0x953   :  { %v8387_v14 = vpop.f32.mrf.mxu1 }
 0x954   :  { %9356 = vst [vmem:[#allocation18_spill] sm:$0xff] %v8387_v14  ;;  %v9363_v14 = vld [vmem:[#allocation37_spill] sm:$0xff] }
 0x956   :  { %3608 = vmatmul.mubr.f32.vlgmr.msra.gmra.mxu1 %v9249_v39  ;;  %6305 = vmatmul.mubr.f32.vlgmr.msra.gmra.mxu0 %v9249_v39 }
 0x957   :  { %3771 = vmatpush1.msra.mxu1 %v8122_v22  ;;  %6308 = vmatpush3.msra.mxu0 %v8184_v27 }
 0x958   :  { %3772 = vmatprep.subr.mxu1 %v8125_v48  ;;  %6309 = vmatprep.subr.mxu0 %v9249_v39 }
 0x959   :  { %3773 = vmatpush1.msra.mxu1 %v8128_v57  ;;  %6310 = vmatpush3.msra.mxu0 %v8194_v0 }
 0x95a   :  { %3774 = vmatprep.subr.mxu1 %v8131_v1  ;;  %6311 = vmatprep.subr.mxu0 %v9249_v39 }
 0x95b   :  { %3775 = vmatpush1.msra.mxu1 %v8134_v43  ;;  %6312 = vmatpush3.msra.mxu0 %v8204_v34 }
 0x95c   :  { %3776 = vmatprep.subr.mxu1 %v8137_v31  ;;  %6313 = vmatprep.subr.mxu0 %v9249_v39 }
 0x95d   :  { %3777 = vmatpush1.msra.mxu1 %v8140_v19  ;;  %6314 = vmatpush3.msra.mxu0 %v8214_v47 }
 0x95e   :  { %3778 = vmatprep.subr.mxu1 %v8143_v20  ;;  %6315 = vmatprep.subr.mxu0 %v9249_v39 }
 0x95f   :  { %3779 = vmatpush1.msra.mxu1 %v8146_v37  ;;  %6316 = vmatpush3.msra.mxu0 %v8224_v7 }
 0x960   :  { %3780 = vmatprep.subr.mxu1 %v8149_v32  ;;  %6317 = vmatprep.subr.mxu0 %v9249_v39 }
 0x961   :  { %3781 = vmatpush1.msra.mxu1 %v8152_v51  ;;  %6318 = vmatpush3.msra.mxu0 %v8232_v18 }
 0x962   :  { %3782 = vmatprep.subr.mxu1 %v8155_v50  ;;  %6319 = vmatprep.subr.mxu0 %v9249_v39 }
 0x963   :  { %3783 = vmatpush1.msra.mxu1 %v8158_v49  ;;  %6320 = vmatpush3.msra.mxu0 %v8238_v21 }
 0x964   :  { %3784 = vmatprep.subr.mxu1 %v8161_v36  ;;  %6321 = vmatprep.subr.mxu0 %v9249_v39 }
 0x965   :  { %3785 = vmatpush1.msra.mxu1 %v8164_v42  ;;  %6322 = vmatpush3.msra.mxu0 %v8241_v53 }
 0x966   :  { %3786 = vmatprep.subr.mxu1 %v8167_v46  ;;  %6323 = vmatprep.subr.mxu0 %v9249_v39 }
 0x967   :  { %3787 = vmatpush1.msra.mxu1 %v8170_v44  ;;  %6324 = vmatpush3.msra.mxu0 %v8246_v61 }
 0x968   :  { %3788 = vmatprep.subr.mxu1 %v8173_v26  ;;  %6325 = vmatprep.subr.mxu0 %v9249_v39 }
 0x969   :  { %3789 = vmatpush1.msra.mxu1 %v8176_v38  ;;  %6326 = vmatpush3.msra.mxu0 %v8250_v62 }
 0x96a   :  { %3790 = vmatprep.subr.mxu1 %v8179_v56  ;;  %6327 = vmatprep.subr.mxu0 %v9249_v39 }
 0x96b   :  { %3791 = vmatpush1.msra.mxu1 %v8182_v25  ;;  %6328 = vmatpush3.msra.mxu0 %v8254_v3 }
 0x96c   :  { %3792 = vmatprep.subr.mxu1 %v8187_v58  ;;  %6329 = vmatprep.subr.mxu0 %v9249_v39 }
 0x96d   :  { %3793 = vmatpush1.msra.mxu1 %v8191_v59  ;;  %6330 = vmatpush3.msra.mxu0 %v8258_v4 }
 0x96e   :  { %3794 = vmatprep.subr.mxu1 %v8197_v54  ;;  %6331 = vmatprep.subr.mxu0 %v9249_v39 }
 0x96f   :  { %3795 = vmatpush1.msra.mxu1 %v8201_v45  ;;  %6332 = vmatpush3.msra.mxu0 %v8262_v5 }
 0x970   :  { %3796 = vmatprep.subr.mxu1 %v8207_v55  ;;  %6333 = vmatprep.subr.mxu0 %v9249_v39 }
 0x971   :  { %3797 = vmatpush1.msra.mxu1 %v9335_v2  ;;  %6334 = vmatpush3.msra.mxu0 %v9336_v8  ;;  %v3539_v2 = vrot.slane %v3526_v10, %v7506_v30 }
 0x972   :  { %3798 = vmatprep.subr.mxu1 %v9337_v52  ;;  %6335 = vmatprep.subr.mxu0 %v9249_v39 }
 0x973   :  { %3799 = vmatpush1.msra.mxu1 %v9338_v60  ;;  %6336 = vmatpush3.msra.mxu0 %v9339_v40 }
 0x974   :  { %3800 = vmatprep.subr.mxu1 %v9340_v63  ;;  %6337 = vmatprep.subr.mxu0 %v9249_v39 }
 0x975   :  { %3801 = vmatpush1.msra.mxu1 %v9341_v6  ;;  %3834 = vmatprep.mubr.f32.mxu1 %v9249_v39  ;;  %v9367_v6 = vld [vmem:[#allocation38_spill] sm:$0xff] }
 0x976   :  { %6338 = vmatpush3.msra.mxu0 %v9342_v9  ;;  %6339 = vmatprep.mubr.msk.f32.mxu0 %vm6972_vm8, %v9249_v39  ;;  %v3535_v63 = vrot.slane %v3526_v10, %v9367_v6 }
 0x977   :  { %3997 = vmatprep.subr.mxu1 %v9343_v11  ;;  %6342 = vmatprep.subr.mxu0 %v9249_v39 }
 0xa0e   :  { %v8389_v15 = vpop.f32.mrf.mxu1  ;;  %v8391_v28 = vpop.f32.mrf.mxu0 }
 0xa0f   :  { %9357 = vst [vmem:[#allocation31_spill] sm:$0xff] %v8389_v15  ;;  %9358 = vst [vmem:[#allocation21_spill] sm:$0xff] %v8391_v28  ;;  %v8408_v15 = vrot.slane %v3168_v17, %v9363_v14  ;;  %v3531_v28 = vrot.slane %v3526_v10, %v9363_v14  ;;  %v9374_v10 = vld [vmem:[#allocation35_spill] sm:$0xff] }
 0xa10   :  { %v8396_v24 = vpop.f32.mrf.mxu1  ;;  %v8398_v23 = vpop.f32.mrf.mxu0 }
 0xa11   :  { %9359 = vst [vmem:[#allocation20_spill] sm:$0xff] %v8396_v24  ;;  %9360 = vst [vmem:[#allocation32_spill] sm:$0xff] %v8398_v23  ;;  %v3348_v23 = vadd.f32 %v3347_v12, %v8408_v15 }
 0xa12   :  { %v8403_v35 = vpop.f32.mrf.mxu1  ;;  %v8405_v13 = vpop.f32.mrf.mxu0  ;;  %9364 = vst [vmem:[#allocation47_spill] sm:$0xff] %v8408_v15  ;;  %v8423_v15 = vrot.slane %v3168_v17, %v7506_v30 }
 0xa13   :  { %9361 = vst [vmem:[#allocation23_spill] sm:$0xff] %v8403_v35  ;;  %9362 = vst [vmem:[#allocation22_spill] sm:$0xff] %v8405_v13  ;;  %v8418_v13 = vrot.slane %v3168_v17, %v9367_v6  ;;  %v9371_v17 = vld [vmem:[#allocation26_spill] sm:$0xff] }
 0xa14   :  { %v8411_v41 = vpop.f32.mrf.mxu1  ;;  %v8413_v33 = vpop.f32.mrf.mxu0  ;;  %v3421_v6 = vadd.f32 %v3420_v29, %v8423_v15  ;;  %v9373_v29 = vld [vmem:[#allocation27_spill] sm:$0xff] }
 0xa15   :  { %9365 = vst [vmem:[#allocation48_spill] sm:$0xff] %v8411_v41  ;;  %9366 = vst [vmem:[#allocation56_spill] sm:$0xff] %v8413_v33  ;;  %v3350_v14 = vadd.f32 %v3349_v16, %v8418_v13 }
 0xa16   :  { %v3609_v24 = vpop.f32.mrf.mxu1  ;;  %v3680_v11 = vpop.f32.mrf.mxu0 }
 0xa17   :  { %v3610_v9 = vadd.f32 %v3609_v24, %v3531_v28  ;;  %v3681_v28 = vadd.f32 %v3680_v11, %v3539_v2  ;;  %v9368_v2 = vld [vmem:[#allocation25_spill] sm:$0xff]  ;;  %v9370_v11 = vld [vmem:[#allocation34_spill] sm:$0xff] }
 0xa18   :  { %v3611_v40 = vpop.f32.mrf.mxu1  ;;  %v6306_v35 = vpop.f32.mrf.mxu0 }
 0xa19   :  { %v3684_v60 = vadd.f32 %v3610_v9, %v3348_v23  ;;  %v3612_v8 = vadd.f32 %v3611_v40, %v3535_v63  ;;  %v9372_v23 = vld [vmem:[#allocation36_spill] sm:$0xff] }
 0xa1b   :  { %v3686_v52 = vmul.f32 0.5, %v3684_v60  ;;  %v3685_v41 = vadd.f32 %v3612_v8, %v3350_v14 }
 0xa1d   :  { %6781 = vtanh.f32 %v3686_v52  ;;  %v3687_v33 = vmul.f32 0.5, %v3685_v41 }
 0xa1f   :  { %6783 = vtanh.f32 %v3687_v33 }
 0xa2a   :  { %v6782_v12 = vpop.eup %6781 }
 0xa2b   :  { %v3690_v24 = vmul.f32 0.5, %v6782_v12  ;;  %v9375_v12 = vld [vmem:[#allocation39_spill] sm:$0xff] }
 0xa2c   :  { %v6784_v40 = vpop.eup %6783 }
 0xa2d   :  { %v3692_v35 = vadd.f32 0.5, %v3690_v24  ;;  %v3691_v63 = vmul.f32 0.5, %v6784_v40  ;;  %v3753_v24 = vld [vmem:[%s9108_s9] sm:$0x7] }
 0xa2f   :  { %v3694_v9 = vmul.f32 %v3692_v35, %v3681_v28  ;;  %v3693_v52 = vadd.f32 0.5, %v3691_v63  ;;  %v9376_v28 = vld [vmem:[#allocation33_spill] sm:$0xff]  ;;  %v9378_v63 = vld [vmem:[#allocation47_spill] sm:$0xff] }
 0xa30   :  { %v9377_v35 = vld [vmem:[#allocation37_spill] sm:$0xff] }
 0xa31   :  { %v3695_v60 = vadd.f32 %v3694_v9, %v3421_v6  ;;  %v3697_v8 = vsub.f32 1.0, %v3693_v52  ;;  %v3699_v41 = vmul.f32 0.0, %v3693_v52  ;;  %v9369_v6 = vld [vmem:[#allocation30_spill] sm:$0xff]  ;;  %v3758_v9 = vrot.slane %v3753_v24, %v9377_v35  ;;  %v9379_v52 = vld [vmem:[#allocation40_spill] sm:$0xff] }
 0xa32   :  { %v3766_v35 = vrot.slane %v3753_v24, %v7506_v30 }
 0xa33   :  { %6785 = vtanh.f32 %v3695_v60 }
 0xa40   :  { %v6786_v16 = vpop.eup %6785 }
 0xa41   :  { %v3698_v33 = vmul.f32 %v6786_v16, %v3697_v8  ;;  %v3352_v8 = vadd.f32 %v9379_v52, %v9378_v63 }
 0xa43   :  { %v8426_v14 = vadd.f32 %v3699_v41, %v3698_v33  ;;  %v9380_v33 = vld [vmem:[#allocation38_spill] sm:$0xff] }
 0xa44   :  { %v3762_v41 = vrot.slane %v3753_v24, %v9380_v33 }
 0xa45   :  { %3701 = vst [vmem:[%s9111_s12] sm:$0xff] %v8426_v14  ;;  %3835 = vmatmul.mubr.f32.vlgmr.msra.gmra.mxu1 %v8426_v14  ;;  %6340 = vmatmul.mubr.f32.vlgmr.msra.gmra.mxu0 %v8426_v14 }
 0xa46   :  { %3998 = vmatpush1.msra.mxu1 %v8122_v22  ;;  %6343 = vmatpush3.msra.mxu0 %v8184_v27 }
 0xa47   :  { %3999 = vmatprep.subr.mxu1 %v8125_v48  ;;  %6344 = vmatprep.subr.mxu0 %v9249_v39 }
 0xa48   :  { %4000 = vmatpush1.msra.mxu1 %v8128_v57  ;;  %6345 = vmatpush3.msra.mxu0 %v8194_v0 }
 0xa49   :  { %4001 = vmatprep.subr.mxu1 %v8131_v1  ;;  %6346 = vmatprep.subr.mxu0 %v9249_v39 }
 0xa4a   :  { %4002 = vmatpush1.msra.mxu1 %v8134_v43  ;;  %6347 = vmatpush3.msra.mxu0 %v8204_v34 }
 0xa4b   :  { %4003 = vmatprep.subr.mxu1 %v8137_v31  ;;  %6348 = vmatprep.subr.mxu0 %v9249_v39 }
 0xa4c   :  { %4004 = vmatpush1.msra.mxu1 %v8140_v19  ;;  %6349 = vmatpush3.msra.mxu0 %v8214_v47 }
 0xa4d   :  { %4005 = vmatprep.subr.mxu1 %v8143_v20  ;;  %6350 = vmatprep.subr.mxu0 %v9249_v39 }
 0xa4e   :  { %4006 = vmatpush1.msra.mxu1 %v8146_v37  ;;  %6351 = vmatpush3.msra.mxu0 %v8224_v7 }
 0xa4f   :  { %4007 = vmatprep.subr.mxu1 %v8149_v32  ;;  %6352 = vmatprep.subr.mxu0 %v9249_v39 }
 0xa50   :  { %4008 = vmatpush1.msra.mxu1 %v8152_v51  ;;  %6353 = vmatpush3.msra.mxu0 %v8232_v18 }
 0xa51   :  { %4009 = vmatprep.subr.mxu1 %v8155_v50  ;;  %6354 = vmatprep.subr.mxu0 %v9249_v39 }
 0xa52   :  { %4010 = vmatpush1.msra.mxu1 %v8158_v49  ;;  %6355 = vmatpush3.msra.mxu0 %v8238_v21 }
 0xa53   :  { %4011 = vmatprep.subr.mxu1 %v8161_v36  ;;  %6356 = vmatprep.subr.mxu0 %v9249_v39 }
 0xa54   :  { %4012 = vmatpush1.msra.mxu1 %v8164_v42  ;;  %6357 = vmatpush3.msra.mxu0 %v8241_v53 }
 0xa55   :  { %4013 = vmatprep.subr.mxu1 %v8167_v46  ;;  %6358 = vmatprep.subr.mxu0 %v9249_v39 }
 0xa56   :  { %4014 = vmatpush1.msra.mxu1 %v8170_v44  ;;  %6359 = vmatpush3.msra.mxu0 %v8246_v61 }
 0xa57   :  { %4015 = vmatprep.subr.mxu1 %v8173_v26  ;;  %6360 = vmatprep.subr.mxu0 %v9249_v39 }
 0xa58   :  { %4016 = vmatpush1.msra.mxu1 %v8176_v38  ;;  %6361 = vmatpush3.msra.mxu0 %v8250_v62 }
 0xa59   :  { %4017 = vmatprep.subr.mxu1 %v8179_v56  ;;  %6362 = vmatprep.subr.mxu0 %v9249_v39 }
 0xa5a   :  { %4018 = vmatpush1.msra.mxu1 %v8182_v25  ;;  %6363 = vmatpush3.msra.mxu0 %v8254_v3 }
 0xa5b   :  { %4019 = vmatprep.subr.mxu1 %v8187_v58  ;;  %6364 = vmatprep.subr.mxu0 %v9249_v39 }
 0xa5c   :  { %4020 = vmatpush1.msra.mxu1 %v8191_v59  ;;  %6365 = vmatpush3.msra.mxu0 %v8258_v4 }
 0xa5d   :  { %4021 = vmatprep.subr.mxu1 %v8197_v54  ;;  %6366 = vmatprep.subr.mxu0 %v9249_v39 }
 0xa5e   :  { %4022 = vmatpush1.msra.mxu1 %v8201_v45  ;;  %6367 = vmatpush3.msra.mxu0 %v8262_v5 }
 0xa5f   :  { %4023 = vmatprep.subr.mxu1 %v8207_v55  ;;  %6368 = vmatprep.subr.mxu0 %v9249_v39 }
 0xa60   :  { %4024 = vmatpush1.msra.mxu1 %v9368_v2  ;;  %6369 = vmatpush3.msra.mxu0 %v9369_v6 }
 0xa61   :  { %4025 = vmatprep.subr.mxu1 %v9370_v11  ;;  %6370 = vmatprep.subr.mxu0 %v9249_v39 }
 0xa62   :  { %4026 = vmatpush1.msra.mxu1 %v9371_v17  ;;  %6371 = vmatpush3.msra.mxu0 %v9372_v23  ;;  %v9381_v17 = vld [vmem:[#allocation53_spill] sm:$0xff] }
 0xa63   :  { %4027 = vmatprep.subr.mxu1 %v9373_v29  ;;  %6372 = vmatprep.subr.mxu0 %v9249_v39  ;;  %v3354_v11 = vadd.f32 %v9381_v17, %v8418_v13 }
 0xa64   :  { %4028 = vmatpush1.msra.mxu1 %v9374_v10  ;;  %4061 = vmatprep.mubr.f32.mxu1 %v9249_v39 }
 0xa65   :  { %6373 = vmatpush3.msra.mxu0 %v9375_v12  ;;  %6374 = vmatprep.mubr.msk.f32.mxu0 %vm6972_vm8, %v9249_v39 }
 0xa66   :  { %4224 = vmatprep.subr.mxu1 %v9376_v28  ;;  %6377 = vmatprep.subr.mxu0 %v9249_v39 }
 0xb05   :  { %v3836_v60 = vpop.f32.mrf.mxu1  ;;  %v3907_v40 = vpop.f32.mrf.mxu0 }
 0xb06   :  { %v3837_v16 = vadd.f32 %v3836_v60, %v3758_v9  ;;  %v3908_v52 = vadd.f32 %v3907_v40, %v3766_v35  ;;  %v9382_v60 = vld [vmem:[#allocation19_spill] sm:$0xff] }
 0xb07   :  { %v3838_v12 = vpop.f32.mrf.mxu1  ;;  %v6341_v10 = vpop.f32.mrf.mxu0  ;;  %v3424_v33 = vadd.f32 %v9382_v60, %v8423_v15  ;;  %v8617_v60 = vld [vmem:[#allocation11 + $0x178] sm:$0xff] }
 0xb08   :  { %v3911_v29 = vadd.f32 %v3837_v16, %v3352_v8  ;;  %v3839_v23 = vadd.f32 %v3838_v12, %v3762_v41 }
 0xb0a   :  { %v3913_v28 = vmul.f32 0.5, %v3911_v29  ;;  %v3912_v6 = vadd.f32 %v3839_v23, %v3354_v11 }
 0xb0c   :  { %6787 = vtanh.f32 %v3913_v28  ;;  %v3914_v2 = vmul.f32 0.5, %v3912_v6 }
 0xb0e   :  { %6789 = vtanh.f32 %v3914_v2 }
 0xb19   :  { %v6788_v55 = vpop.eup %6787 }
 0xb1a   :  { %v3917_v5 = vmul.f32 0.5, %v6788_v55 }
 0xb1b   :  { %v6790_v29 = vpop.eup %6789 }
 0xb1c   :  { %v3919_v9 = vadd.f32 0.5, %v3917_v5  ;;  %v3918_v12 = vmul.f32 0.5, %v6790_v29  ;;  %v8627_v29 = vld [vmem:[#allocation11 + $0x160] sm:$0xff] }
 0xb1e   :  { %v3921_v10 = vmul.f32 %v3919_v9, %v3908_v52  ;;  %v3920_v16 = vadd.f32 0.5, %v3918_v12  ;;  %v8612_v52 = vld [vmem:[#allocation11 + $0x170] sm:$0xff]  ;;  %v8615_v9 = vld [vmem:[#allocation11 + $0x168] sm:$0xff]  ;;  %v8631_v12 = vld [vmem:[#allocation11 + $0x140] sm:$0xff] }
 0xb1f   :  { %9398 = vst [vmem:[#allocation49_spill] sm:$0xff] %v8612_v52 }
 0xb20   :  { %v3922_v8 = vadd.f32 %v3921_v10, %v3424_v33  ;;  %v3924_v17 = vsub.f32 1.0, %v3920_v16  ;;  %v3926_v2 = vmul.f32 %v3920_v16, %v8426_v14  ;;  %v8621_v10 = vld [vmem:[#allocation11 + $0x158] sm:$0xff] }
 0xb21   :  { %v8635_v16 = vld [vmem:[#allocation11 + $0x138] sm:$0xff] }
 0xb22   :  { %6791 = vtanh.f32 %v3922_v8  ;;  %v8625_v8 = vld [vmem:[#allocation11 + $0x150] sm:$0xff] }
 0xb2f   :  { %v6792_v41 = vpop.eup %6791 }
 0xb30   :  { %v3925_v11 = vmul.f32 %v6792_v41, %v3924_v17  ;;  %v8637_v17 = vld [vmem:[#allocation11 + $0x148] sm:$0xff] }
 0xb31   :  { %v8641_v41 = vld [vmem:[#allocation11 + $0x128] sm:$0xff] }
 0xb32   :  { %v8514_v6 = vadd.f32 %v3926_v2, %v3925_v11  ;;  %v8645_v11 = vld [vmem:[#allocation11 + $0x120] sm:$0xff]  ;;  %v8647_v2 = vld [vmem:[#allocation11 + $0x130] sm:$0xff] }
 0xb34   :  { %3928 = vst [vmem:[%s9111_s12 + $0x8] sm:$0xff] %v8514_v6  ;;  %4062 = vmatmul.mubr.f32.vlgmr.msra.gmra.mxu1 %v8514_v6  ;;  %6375 = vmatmul.mubr.f32.vlgmr.msra.gmra.mxu0 %v8514_v6 }
 0xb35   :  { %4225 = vmatpush1.msra.mxu1 %v8122_v22  ;;  %6378 = vmatpush3.msra.mxu0 %v8184_v27  ;;  %v9383_v22 = vld [vmem:[#allocation29_spill] sm:$0xff] }
 0xb36   :  { %4226 = vmatprep.subr.mxu1 %v8125_v48  ;;  %6379 = vmatprep.subr.mxu0 %v9249_v39  ;;  %v9384_v48 = vld [vmem:[#allocation24_spill] sm:$0xff] }
 0xb37   :  { %4227 = vmatpush1.msra.mxu1 %v8128_v57  ;;  %6380 = vmatpush3.msra.mxu0 %v8194_v0  ;;  %v9385_v57 = vld [vmem:[#allocation25_spill] sm:$0xff] }
 0xb38   :  { %4228 = vmatprep.subr.mxu1 %v8131_v1  ;;  %6381 = vmatprep.subr.mxu0 %v9249_v39  ;;  %v9386_v1 = vld [vmem:[#allocation30_spill] sm:$0xff] }
 0xb39   :  { %4229 = vmatpush1.msra.mxu1 %v8134_v43  ;;  %6382 = vmatpush3.msra.mxu0 %v8204_v34  ;;  %v9387_v43 = vld [vmem:[#allocation34_spill] sm:$0xff] }
 0xb3a   :  { %4230 = vmatprep.subr.mxu1 %v8137_v31  ;;  %6383 = vmatprep.subr.mxu0 %v9249_v39  ;;  %v9388_v31 = vld [vmem:[#allocation26_spill] sm:$0xff] }
 0xb3b   :  { %4231 = vmatpush1.msra.mxu1 %v8140_v19  ;;  %6384 = vmatpush3.msra.mxu0 %v8214_v47  ;;  %v9389_v19 = vld [vmem:[#allocation36_spill] sm:$0xff] }
 0xb3c   :  { %4232 = vmatprep.subr.mxu1 %v8143_v20  ;;  %6385 = vmatprep.subr.mxu0 %v9249_v39  ;;  %v9390_v20 = vld [vmem:[#allocation27_spill] sm:$0xff] }
 0xb3d   :  { %4233 = vmatpush1.msra.mxu1 %v8146_v37  ;;  %6386 = vmatpush3.msra.mxu0 %v8224_v7  ;;  %v9391_v37 = vld [vmem:[#allocation35_spill] sm:$0xff] }
 0xb3e   :  { %4234 = vmatprep.subr.mxu1 %v8149_v32  ;;  %6387 = vmatprep.subr.mxu0 %v9249_v39  ;;  %v9392_v32 = vld [vmem:[#allocation39_spill] sm:$0xff] }
 0xb3f   :  { %4235 = vmatpush1.msra.mxu1 %v8152_v51  ;;  %6388 = vmatpush3.msra.mxu0 %v8232_v18  ;;  %v3980_v51 = vld [vmem:[%s9108_s9] sm:$0x7] }
 0xb40   :  { %4236 = vmatprep.subr.mxu1 %v8155_v50  ;;  %6389 = vmatprep.subr.mxu0 %v9249_v39  ;;  %v9393_v50 = vld [vmem:[#allocation37_spill] sm:$0xff]  ;;  %v3993_v47 = vrot.slane %v3980_v51, %v7506_v30 }
 0xb41   :  { %4237 = vmatpush1.msra.mxu1 %v8158_v49  ;;  %6390 = vmatpush3.msra.mxu0 %v8238_v21  ;;  %v3985_v49 = vrot.slane %v3980_v51, %v9393_v50 }
 0xb42   :  { %4238 = vmatprep.subr.mxu1 %v8161_v36  ;;  %6391 = vmatprep.subr.mxu0 %v9249_v39 }
 0xb43   :  { %4239 = vmatpush1.msra.mxu1 %v8164_v42  ;;  %6392 = vmatpush3.msra.mxu0 %v8241_v53 }
 0xb44   :  { %4240 = vmatprep.subr.mxu1 %v8167_v46  ;;  %6393 = vmatprep.subr.mxu0 %v9249_v39  ;;  %v9394_v46 = vld [vmem:[#allocation41_spill] sm:$0xff] }
 0xb45   :  { %4241 = vmatpush1.msra.mxu1 %v8170_v44  ;;  %6394 = vmatpush3.msra.mxu0 %v8246_v61  ;;  %v3358_v44 = vadd.f32 %v9394_v46, %v9378_v63  ;;  %v9397_v61 = vld [vmem:[#allocation54_spill] sm:$0xff]  ;;  %v8697_v46 = vld [vmem:[#allocation11 + $0x98] sm:$0xff] }
 0xb46   :  { %4242 = vmatprep.subr.mxu1 %v8173_v26  ;;  %6395 = vmatprep.subr.mxu0 %v9249_v39 }
 0xb47   :  { %4243 = vmatpush1.msra.mxu1 %v8176_v38  ;;  %6396 = vmatpush3.msra.mxu0 %v8250_v62  ;;  %v9395_v38 = vld [vmem:[#allocation38_spill] sm:$0xff]  ;;  %v3429_v62 = vadd.f32 %v9397_v61, %v8423_v15  ;;  %v8757_v61 = vld [vmem:[#allocation11 + $0x8] sm:$0xff] }
 0xb48   :  { %4244 = vmatprep.subr.mxu1 %v8179_v56  ;;  %6397 = vmatprep.subr.mxu0 %v9249_v39  ;;  %v3989_v56 = vrot.slane %v3980_v51, %v9395_v38  ;;  %v8685_v51 = vld [vmem:[#allocation11 + $0xd0] sm:$0xff]  ;;  %9406 = vst [vmem:[#allocation40_spill] sm:$0xff] %v8757_v61 }
 0xb49   :  { %4245 = vmatpush1.msra.mxu1 %v8182_v25  ;;  %6398 = vmatpush3.msra.mxu0 %v8254_v3 }
 0xb4a   :  { %4246 = vmatprep.subr.mxu1 %v8187_v58  ;;  %6399 = vmatprep.subr.mxu0 %v9249_v39 }
 0xb4b   :  { %4247 = vmatpush1.msra.mxu1 %v8191_v59  ;;  %6400 = vmatpush3.msra.mxu0 %v8258_v4 }
 0xb4c   :  { %4248 = vmatprep.subr.mxu1 %v8197_v54  ;;  %6401 = vmatprep.subr.mxu0 %v9249_v39  ;;  %v9396_v54 = vld [vmem:[#allocation42_spill] sm:$0xff] }
 0xb4d   :  { %4249 = vmatpush1.msra.mxu1 %v8201_v45  ;;  %6402 = vmatpush3.msra.mxu0 %v9383_v22  ;;  %v3360_v45 = vadd.f32 %v9396_v54, %v8418_v13  ;;  %v8655_v22 = vld [vmem:[#allocation11 + $0x108] sm:$0xff]  ;;  %v8727_v54 = vld [vmem:[#allocation11 + $0x50] sm:$0xff] }
 0xb4e   :  { %4250 = vmatprep.subr.mxu1 %v9384_v48  ;;  %6403 = vmatprep.subr.mxu0 %v9249_v39  ;;  %v8657_v48 = vld [vmem:[#allocation11 + $0x118] sm:$0xff] }
 0xb4f   :  { %4251 = vmatpush1.msra.mxu1 %v9385_v57  ;;  %6404 = vmatpush3.msra.mxu0 %v9386_v1  ;;  %v8661_v57 = vld [vmem:[#allocation11 + $0xf8] sm:$0xff]  ;;  %v8665_v1 = vld [vmem:[#allocation11 + $0xf0] sm:$0xff] }
 0xb50   :  { %4252 = vmatprep.subr.mxu1 %v9387_v43  ;;  %6405 = vmatprep.subr.mxu0 %v9249_v39  ;;  %v8667_v43 = vld [vmem:[#allocation11 + $0x100] sm:$0xff] }
 0xb51   :  { %4253 = vmatpush1.msra.mxu1 %v9388_v31  ;;  %6406 = vmatpush3.msra.mxu0 %v9389_v19  ;;  %v8671_v31 = vld [vmem:[#allocation11 + $0xe0] sm:$0xff]  ;;  %v8675_v19 = vld [vmem:[#allocation11 + $0xd8] sm:$0xff] }
 0xb52   :  { %4254 = vmatprep.subr.mxu1 %v9390_v20  ;;  %6407 = vmatprep.subr.mxu0 %v9249_v39  ;;  %v8677_v20 = vld [vmem:[#allocation11 + $0xe8] sm:$0xff] }
 0xb53   :  { %4255 = vmatpush1.msra.mxu1 %v9391_v37  ;;  %4288 = vmatprep.mubr.f32.mxu1 %v9249_v39  ;;  %v8681_v37 = vld [vmem:[#allocation11 + $0xc8] sm:$0xff] }
 0xb54   :  { %6408 = vmatpush3.msra.mxu0 %v9392_v32  ;;  %6409 = vmatprep.mubr.msk.f32.mxu0 %vm6972_vm8, %v9249_v39  ;;  %v8683_v32 = vld [vmem:[#allocation11 + $0xc0] sm:$0xff] }
 0xb55   :  { %6412 = vmatprep.subr.mxu0 %v9249_v39  ;;  %4451 = vmatprep.subr.mxu1 %v8612_v52 }
 0xbf4   :  { %v4063_v36 = vpop.f32.mrf.mxu1  ;;  %v4134_v42 = vpop.f32.mrf.mxu0 }
 0xbf5   :  { %v4064_v26 = vadd.f32 %v4063_v36, %v3985_v49  ;;  %v4135_v21 = vadd.f32 %v4134_v42, %v3993_v47  ;;  %v8689_v49 = vld [vmem:[#allocation11 + $0xb0] sm:$0xff]  ;;  %v8691_v36 = vld [vmem:[#allocation11 + $0xa8] sm:$0xff]  ;;  %v8693_v42 = vld [vmem:[#allocation11 + $0xb8] sm:$0xff] }
 0xbf6   :  { %v4065_v25 = vpop.f32.mrf.mxu1  ;;  %v6376_v27 = vpop.f32.mrf.mxu0  ;;  %v8741_v47 = vld [vmem:[#allocation11 + $0x30] sm:$0xff] }
 0xbf7   :  { %v4138_v58 = vadd.f32 %v4064_v26, %v3358_v44  ;;  %v4066_v0 = vadd.f32 %v4065_v25, %v3989_v56  ;;  %v8701_v44 = vld [vmem:[#allocation11 + $0x90] sm:$0xff]  ;;  %v8703_v26 = vld [vmem:[#allocation11 + $0xa0] sm:$0xff]  ;;  %v8711_v25 = vld [vmem:[#allocation11 + $0x78] sm:$0xff]  ;;  %9401 = vst [vmem:[#allocation51_spill] sm:$0xff] %v8741_v47 }
 0xbf8   :  { %v8707_v56 = vld [vmem:[#allocation11 + $0x80] sm:$0xff]  ;;  %v8713_v27 = vld [vmem:[#allocation11 + $0x88] sm:$0xff] }
 0xbf9   :  { %v4140_v59 = vmul.f32 0.5, %v4138_v58  ;;  %v4139_v34 = vadd.f32 %v4066_v0, %v3360_v45  ;;  %v8717_v58 = vld [vmem:[#allocation11 + $0x68] sm:$0xff]  ;;  %v8723_v0 = vld [vmem:[#allocation11 + $0x70] sm:$0xff] }
 0xbfa   :  { %v8731_v45 = vld [vmem:[#allocation11 + $0x48] sm:$0xff] }
 0xbfb   :  { %6793 = vtanh.f32 %v4140_v59  ;;  %v4141_v55 = vmul.f32 0.5, %v4139_v34  ;;  %v8721_v59 = vld [vmem:[#allocation11 + $0x60] sm:$0xff]  ;;  %v8733_v34 = vld [vmem:[#allocation11 + $0x58] sm:$0xff] }
 0xbfc   :  { %9399 = vst [vmem:[#allocation50_spill] sm:$0xff] %v8733_v34 }
 0xbfd   :  { %6795 = vtanh.f32 %v4141_v55  ;;  %v8737_v55 = vld [vmem:[#allocation11 + $0x38] sm:$0xff] }
 0xbfe   :  { %9400 = vst [vmem:[#allocation57_spill] sm:$0xff] %v8737_v55 }
 0xc08   :  { %v6794_v7 = vpop.eup %6793 }
 0xc09   :  { %v4144_v18 = vmul.f32 0.5, %v6794_v7  ;;  %v8743_v7 = vld [vmem:[#allocation11 + $0x40] sm:$0xff] }
 0xc0a   :  { %v6796_v5 = vpop.eup %6795  ;;  %9402 = vst [vmem:[#allocation52_spill] sm:$0xff] %v8743_v7 }
 0xc0b   :  { %v4146_v53 = vadd.f32 0.5, %v4144_v18  ;;  %v4145_v14 = vmul.f32 0.5, %v6796_v5  ;;  %v8747_v18 = vld [vmem:[#allocation11 + $0x20] sm:$0xff] }
 0xc0c   :  { %9403 = vst [vmem:[#allocation58_spill] sm:$0xff] %v8747_v18 }
 0xc0d   :  { %v4148_v3 = vmul.f32 %v4146_v53, %v4135_v21  ;;  %v4147_v23 = vadd.f32 0.5, %v4145_v14  ;;  %v8751_v21 = vld [vmem:[#allocation11 + $0x18] sm:$0xff]  ;;  %v8753_v53 = vld [vmem:[#allocation11 + $0x28] sm:$0xff] }
 0xc0e   :  { %9404 = vst [vmem:[#allocation33_spill] sm:$0xff] %v8751_v21  ;;  %9405 = vst [vmem:[#allocation47_spill] sm:$0xff] %v8753_v53 }
 0xc0f   :  { %v4149_v4 = vadd.f32 %v4148_v3, %v3429_v62  ;;  %v4151_v24 = vsub.f32 1.0, %v4147_v23  ;;  %v4153_v33 = vmul.f32 %v4147_v23, %v8514_v6  ;;  %v8651_v6 = vld [vmem:[#allocation11 + $0x110] sm:$0xff]  ;;  %v8761_v62 = vld [vmem:[#allocation11] sm:$0xff] }
 0xc10   :  { %9407 = vst [vmem:[#allocation53_spill] sm:$0xff] %v8761_v62  ;;  %v8763_v3 = vld [vmem:[#allocation11 + $0x10] sm:$0xff] }
 0xc11   :  { %6797 = vtanh.f32 %v4149_v4  ;;  %9408 = vst [vmem:[#allocation19_spill] sm:$0xff] %v8763_v3  ;;  %v4207_v4 = vld [vmem:[%s9108_s9] sm:$0x7] }
 0xc12   :  { %v4212_v5 = vrot.slane %v4207_v4, %v9393_v50  ;;  %v4220_v50 = vrot.slane %v4207_v4, %v7506_v30 }
 0xc1e   :  { %v6798_v35 = vpop.eup %6797 }
 0xc1f   :  { %v4152_v40 = vmul.f32 %v6798_v35, %v4151_v24  ;;  %v9409_v24 = vld [vmem:[#allocation43_spill] sm:$0xff] }
 0xc20   :  { %v3362_v35 = vadd.f32 %v9409_v24, %v9378_v63 }
 0xc21   :  { %v8601_v28 = vadd.f32 %v4153_v33, %v4152_v40  ;;  %v4216_v33 = vrot.slane %v4207_v4, %v9395_v38  ;;  %v9418_v4 = vld [vmem:[#allocation47_spill] sm:$0xff] }
 0xc23   :  { %4155 = vst [vmem:[%s9111_s12 + $0x10] sm:$0xff] %v8601_v28  ;;  %4289 = vmatmul.mubr.f32.vlgmr.msra.gmra.mxu1 %v8601_v28  ;;  %6410 = vmatmul.mubr.f32.vlgmr.msra.gmra.mxu0 %v8601_v28 }
 0xc24   :  { %4515 = vmatprep.mubr.f32.mxu1 %v9249_v39  ;;  %6444 = vmatprep.mubr.msk.f32.mxu0 %vm6972_vm8, %v9249_v39 }
 0xc25   :  { %4452 = vmatpush1.msra.mxu1 %v8615_v9  ;;  %6413 = vmatpush3.msra.mxu0 %v8617_v60 }
 0xc26   :  { %4453 = vmatprep.subr.mxu1 %v8621_v10  ;;  %6414 = vmatprep.subr.mxu0 %v9249_v39 }
 0xc27   :  { %4454 = vmatpush1.msra.mxu1 %v8625_v8  ;;  %6415 = vmatpush3.msra.mxu0 %v8627_v29 }
 0xc28   :  { %4455 = vmatprep.subr.mxu1 %v8631_v12  ;;  %6416 = vmatprep.subr.mxu0 %v9249_v39 }
 0xc29   :  { %4456 = vmatpush1.msra.mxu1 %v8635_v16  ;;  %6417 = vmatpush3.msra.mxu0 %v8637_v17 }
 0xc2a   :  { %4457 = vmatprep.subr.mxu1 %v8641_v41  ;;  %6418 = vmatprep.subr.mxu0 %v9249_v39 }
 0xc2b   :  { %4458 = vmatpush1.msra.mxu1 %v8645_v11  ;;  %6419 = vmatpush3.msra.mxu0 %v8647_v2 }
 0xc2c   :  { %4459 = vmatprep.subr.mxu1 %v8651_v6  ;;  %6420 = vmatprep.subr.mxu0 %v9249_v39 }
 0xc2d   :  { %4460 = vmatpush1.msra.mxu1 %v8655_v22  ;;  %6421 = vmatpush3.msra.mxu0 %v8657_v48 }
 0xc2e   :  { %4461 = vmatprep.subr.mxu1 %v8661_v57  ;;  %6422 = vmatprep.subr.mxu0 %v9249_v39 }
 0xc2f   :  { %4462 = vmatpush1.msra.mxu1 %v8665_v1  ;;  %6423 = vmatpush3.msra.mxu0 %v8667_v43 }
 0xc30   :  { %4463 = vmatprep.subr.mxu1 %v8671_v31  ;;  %6424 = vmatprep.subr.mxu0 %v9249_v39 }
 0xc31   :  { %4464 = vmatpush1.msra.mxu1 %v8675_v19  ;;  %6425 = vmatpush3.msra.mxu0 %v8677_v20 }
 0xc32   :  { %4465 = vmatprep.subr.mxu1 %v8681_v37  ;;  %6426 = vmatprep.subr.mxu0 %v9249_v39 }
 0xc33   :  { %4466 = vmatpush1.msra.mxu1 %v8683_v32  ;;  %6427 = vmatpush3.msra.mxu0 %v8685_v51 }
 0xc34   :  { %4467 = vmatprep.subr.mxu1 %v8689_v49  ;;  %6428 = vmatprep.subr.mxu0 %v9249_v39 }
 0xc35   :  { %4468 = vmatpush1.msra.mxu1 %v8691_v36  ;;  %6429 = vmatpush3.msra.mxu0 %v8693_v42 }
 0xc36   :  { %4469 = vmatprep.subr.mxu1 %v8697_v46  ;;  %6430 = vmatprep.subr.mxu0 %v9249_v39 }
 0xc37   :  { %4470 = vmatpush1.msra.mxu1 %v8701_v44  ;;  %6431 = vmatpush3.msra.mxu0 %v8703_v26 }
 0xc38   :  { %4471 = vmatprep.subr.mxu1 %v8707_v56  ;;  %6432 = vmatprep.subr.mxu0 %v9249_v39 }
 0xc39   :  { %4472 = vmatpush1.msra.mxu1 %v8711_v25  ;;  %6433 = vmatpush3.msra.mxu0 %v8713_v27 }
 0xc3a   :  { %4473 = vmatprep.subr.mxu1 %v8717_v58  ;;  %6434 = vmatprep.subr.mxu0 %v9249_v39 }
 0xc3b   :  { %4474 = vmatpush1.msra.mxu1 %v8721_v59  ;;  %6435 = vmatpush3.msra.mxu0 %v8723_v0 }
 0xc3c   :  { %4475 = vmatprep.subr.mxu1 %v8727_v54  ;;  %6436 = vmatprep.subr.mxu0 %v9249_v39 }
 0xc3d   :  { %4476 = vmatpush1.msra.mxu1 %v8731_v45  ;;  %6437 = vmatpush3.msra.mxu0 %v8733_v34 }
 0xc3e   :  { %4477 = vmatprep.subr.mxu1 %v8737_v55  ;;  %6438 = vmatprep.subr.mxu0 %v9249_v39 }
 0xc3f   :  { %4478 = vmatpush1.msra.mxu1 %v8741_v47  ;;  %6439 = vmatpush3.msra.mxu0 %v8743_v7 }
 0xc40   :  { %4479 = vmatprep.subr.mxu1 %v8747_v18  ;;  %6440 = vmatprep.subr.mxu0 %v9249_v39 }
 0xc41   :  { %4480 = vmatpush1.msra.mxu1 %v8751_v21  ;;  %6441 = vmatpush3.msra.mxu0 %v8753_v53  ;;  %v9410_v21 = vld [vmem:[#allocation44_spill] sm:$0xff] }
 0xc42   :  { %4481 = vmatprep.subr.mxu1 %v8757_v61  ;;  %6442 = vmatprep.subr.mxu0 %v9249_v39  ;;  %v3364_v18 = vadd.f32 %v9410_v21, %v8418_v13 }
 0xc43   :  { %4482 = vmatpush1.msra.mxu1 %v8761_v62  ;;  %6443 = vmatpush3.msra.mxu0 %v8763_v3 }
 0xc44   :  { %4678 = vmatprep.subr.mxu1 %v8612_v52  ;;  %6447 = vmatprep.subr.mxu0 %v9249_v39 }
 0xce3   :  { %v4290_v14 = vpop.f32.mrf.mxu1  ;;  %v4361_v23 = vpop.f32.mrf.mxu0 }
 0xce4   :  { %v4291_v40 = vadd.f32 %v4290_v14, %v4212_v5  ;;  %v4362_v24 = vadd.f32 %v4361_v23, %v4220_v50  ;;  %v9411_v14 = vld [vmem:[#allocation46_spill] sm:$0xff]  ;;  %v9419_v23 = vld [vmem:[#allocation40_spill] sm:$0xff] }
 0xce5   :  { %v4292_v62 = vpop.f32.mrf.mxu1  ;;  %v6411_v3 = vpop.f32.mrf.mxu0  ;;  %v3432_v38 = vadd.f32 %v9411_v14, %v8423_v15  ;;  %v9412_v50 = vld [vmem:[#allocation50_spill] sm:$0xff] }
 0xce6   :  { %v4365_v61 = vadd.f32 %v4291_v40, %v3362_v35  ;;  %v4293_v53 = vadd.f32 %v4292_v62, %v4216_v33  ;;  %v9420_v33 = vld [vmem:[#allocation53_spill] sm:$0xff]  ;;  %v4434_v14 = vld [vmem:[%s9108_s9] sm:$0x7] }
 0xce8   :  { %v4367_v52 = vmul.f32 0.5, %v4365_v61  ;;  %v4366_v7 = vadd.f32 %v4293_v53, %v3364_v18  ;;  %v9417_v53 = vld [vmem:[#allocation33_spill] sm:$0xff] }
 0xcea   :  { %6799 = vtanh.f32 %v4367_v52  ;;  %v4368_v47 = vmul.f32 0.5, %v4366_v7 }
 0xcec   :  { %6801 = vtanh.f32 %v4368_v47 }
 0xcf7   :  { %v6800_v55 = vpop.eup %6799 }
 0xcf8   :  { %v4371_v34 = vmul.f32 0.5, %v6800_v55  ;;  %v9416_v55 = vld [vmem:[#allocation58_spill] sm:$0xff] }
 0xcf9   :  { %v6802_v61 = vpop.eup %6801 }
 0xcfa   :  { %v4373_v5 = vadd.f32 0.5, %v4371_v34  ;;  %v4372_v62 = vmul.f32 0.5, %v6802_v61  ;;  %v9415_v34 = vld [vmem:[#allocation52_spill] sm:$0xff] }
 0xcfc   :  { %v4375_v3 = vmul.f32 %v4373_v5, %v4362_v24  ;;  %v4374_v40 = vadd.f32 0.5, %v4372_v62  ;;  %v9421_v24 = vld [vmem:[#allocation19_spill] sm:$0xff]  ;;  %v9422_v5 = vld [vmem:[#allocation49_spill] sm:$0xff] }
 0xcfe   :  { %v4376_v35 = vadd.f32 %v4375_v3, %v3432_v38  ;;  %v4378_v21 = vsub.f32 1.0, %v4374_v40  ;;  %v4380_v47 = vmul.f32 %v4374_v40, %v8601_v28  ;;  %v9413_v38 = vld [vmem:[#allocation57_spill] sm:$0xff]  ;;  %v9414_v28 = vld [vmem:[#allocation51_spill] sm:$0xff]  ;;  %v9424_v40 = vld [vmem:[#allocation28_spill] sm:$0xff] }
 0xcff   :  { %v9423_v3 = vld [vmem:[#allocation37_spill] sm:$0xff] }
 0xd00   :  { %6803 = vtanh.f32 %v4376_v35  ;;  %v4439_v35 = vrot.slane %v4434_v14, %v9423_v3  ;;  %v4447_v3 = vrot.slane %v4434_v14, %v7506_v30 }
 0xd0d   :  { %v6804_v52 = vpop.eup %6803 }
 0xd0e   :  { %v4379_v18 = vmul.f32 %v6804_v52, %v4378_v21  ;;  %v3368_v21 = vadd.f32 %v9424_v40, %v9378_v63 }
 0xd10   :  { %v8786_v7 = vadd.f32 %v4380_v47, %v4379_v18  ;;  %v9425_v18 = vld [vmem:[#allocation38_spill] sm:$0xff] }
 0xd11   :  { %v4443_v47 = vrot.slane %v4434_v14, %v9425_v18  ;;  %v9432_v14 = vld [vmem:[#allocation58_spill] sm:$0xff] }
 0xd12   :  { %4382 = vst [vmem:[%s9111_s12 + $0x18] sm:$0xff] %v8786_v7  ;;  %4516 = vmatmul.mubr.f32.vlgmr.msra.gmra.mxu1 %v8786_v7  ;;  %6445 = vmatmul.mubr.f32.vlgmr.msra.gmra.mxu0 %v8786_v7 }
 0xd13   :  { %4679 = vmatpush1.msra.mxu1 %v8615_v9  ;;  %6448 = vmatpush3.msra.mxu0 %v8617_v60 }
 0xd14   :  { %4680 = vmatprep.subr.mxu1 %v8621_v10  ;;  %6449 = vmatprep.subr.mxu0 %v9249_v39 }
 0xd15   :  { %4681 = vmatpush1.msra.mxu1 %v8625_v8  ;;  %6450 = vmatpush3.msra.mxu0 %v8627_v29 }
 0xd16   :  { %4682 = vmatprep.subr.mxu1 %v8631_v12  ;;  %6451 = vmatprep.subr.mxu0 %v9249_v39 }
 0xd17   :  { %4683 = vmatpush1.msra.mxu1 %v8635_v16  ;;  %6452 = vmatpush3.msra.mxu0 %v8637_v17 }
 0xd18   :  { %4684 = vmatprep.subr.mxu1 %v8641_v41  ;;  %6453 = vmatprep.subr.mxu0 %v9249_v39 }
 0xd19   :  { %4685 = vmatpush1.msra.mxu1 %v8645_v11  ;;  %6454 = vmatpush3.msra.mxu0 %v8647_v2 }
 0xd1a   :  { %4686 = vmatprep.subr.mxu1 %v8651_v6  ;;  %6455 = vmatprep.subr.mxu0 %v9249_v39 }
 0xd1b   :  { %4687 = vmatpush1.msra.mxu1 %v8655_v22  ;;  %6456 = vmatpush3.msra.mxu0 %v8657_v48 }
 0xd1c   :  { %4688 = vmatprep.subr.mxu1 %v8661_v57  ;;  %6457 = vmatprep.subr.mxu0 %v9249_v39 }
 0xd1d   :  { %4689 = vmatpush1.msra.mxu1 %v8665_v1  ;;  %6458 = vmatpush3.msra.mxu0 %v8667_v43 }
 0xd1e   :  { %4690 = vmatprep.subr.mxu1 %v8671_v31  ;;  %6459 = vmatprep.subr.mxu0 %v9249_v39 }
 0xd1f   :  { %4691 = vmatpush1.msra.mxu1 %v8675_v19  ;;  %6460 = vmatpush3.msra.mxu0 %v8677_v20 }
 0xd20   :  { %4692 = vmatprep.subr.mxu1 %v8681_v37  ;;  %6461 = vmatprep.subr.mxu0 %v9249_v39 }
 0xd21   :  { %4693 = vmatpush1.msra.mxu1 %v8683_v32  ;;  %6462 = vmatpush3.msra.mxu0 %v8685_v51 }
 0xd22   :  { %4694 = vmatprep.subr.mxu1 %v8689_v49  ;;  %6463 = vmatprep.subr.mxu0 %v9249_v39 }
 0xd23   :  { %4695 = vmatpush1.msra.mxu1 %v8691_v36  ;;  %6464 = vmatpush3.msra.mxu0 %v8693_v42 }
 0xd24   :  { %4696 = vmatprep.subr.mxu1 %v8697_v46  ;;  %6465 = vmatprep.subr.mxu0 %v9249_v39 }
 0xd25   :  { %4697 = vmatpush1.msra.mxu1 %v8701_v44  ;;  %6466 = vmatpush3.msra.mxu0 %v8703_v26 }
 0xd26   :  { %4698 = vmatprep.subr.mxu1 %v8707_v56  ;;  %6467 = vmatprep.subr.mxu0 %v9249_v39 }
 0xd27   :  { %4699 = vmatpush1.msra.mxu1 %v8711_v25  ;;  %6468 = vmatpush3.msra.mxu0 %v8713_v27 }
 0xd28   :  { %4700 = vmatprep.subr.mxu1 %v8717_v58  ;;  %6469 = vmatprep.subr.mxu0 %v9249_v39 }
 0xd29   :  { %4701 = vmatpush1.msra.mxu1 %v8721_v59  ;;  %6470 = vmatpush3.msra.mxu0 %v8723_v0 }
 0xd2a   :  { %4702 = vmatprep.subr.mxu1 %v8727_v54  ;;  %6471 = vmatprep.subr.mxu0 %v9249_v39 }
 0xd2b   :  { %4703 = vmatpush1.msra.mxu1 %v8731_v45  ;;  %6472 = vmatpush3.msra.mxu0 %v9412_v50 }
 0xd2c   :  { %4704 = vmatprep.subr.mxu1 %v9413_v38  ;;  %6473 = vmatprep.subr.mxu0 %v9249_v39 }
 0xd2d   :  { %4705 = vmatpush1.msra.mxu1 %v9414_v28  ;;  %6474 = vmatpush3.msra.mxu0 %v9415_v34 }
 0xd2e   :  { %4706 = vmatprep.subr.mxu1 %v9416_v55  ;;  %6475 = vmatprep.subr.mxu0 %v9249_v39 }
 0xd2f   :  { %4707 = vmatpush1.msra.mxu1 %v9417_v53  ;;  %6476 = vmatpush3.msra.mxu0 %v9418_v4  ;;  %v9426_v53 = vld [vmem:[#allocation45_spill] sm:$0xff] }
 0xd30   :  { %4708 = vmatprep.subr.mxu1 %v9419_v23  ;;  %6477 = vmatprep.subr.mxu0 %v9249_v39  ;;  %v3370_v55 = vadd.f32 %v9426_v53, %v8418_v13 }
 0xd31   :  { %4709 = vmatpush1.msra.mxu1 %v9420_v33  ;;  %4742 = vmatprep.mubr.f32.mxu1 %v9249_v39 }
 0xd32   :  { %6478 = vmatpush3.msra.mxu0 %v9421_v24  ;;  %6479 = vmatprep.mubr.msk.f32.mxu0 %vm6972_vm8, %v9249_v39 }
 0xd33   :  { %4905 = vmatprep.subr.mxu1 %v9422_v5  ;;  %6482 = vmatprep.subr.mxu0 %v9249_v39 }
 0xdd2   :  { %v4517_v61 = vpop.f32.mrf.mxu1  ;;  %v4588_v62 = vpop.f32.mrf.mxu0 }
 0xdd3   :  { %v4518_v52 = vadd.f32 %v4517_v61, %v4439_v35  ;;  %v4589_v40 = vadd.f32 %v4588_v62, %v4447_v3  ;;  %v9427_v61 = vld [vmem:[#allocation32_spill] sm:$0xff]  ;;  %v9433_v3 = vld [vmem:[#allocation33_spill] sm:$0xff]  ;;  %v9434_v62 = vld [vmem:[#allocation47_spill] sm:$0xff] }
 0xdd4   :  { %v4519_v24 = vpop.f32.mrf.mxu1  ;;  %v6446_v33 = vpop.f32.mrf.mxu0  ;;  %v3437_v18 = vadd.f32 %v9427_v61, %v8423_v15  ;;  %v4661_v61 = vld [vmem:[%s9108_s9] sm:$0x7] }
 0xdd5   :  { %v4592_v23 = vadd.f32 %v4518_v52, %v3368_v21  ;;  %v4520_v4 = vadd.f32 %v4519_v24, %v4443_v47  ;;  %v9436_v47 = vld [vmem:[#allocation53_spill] sm:$0xff] }
 0xdd7   :  { %v4594_v5 = vmul.f32 0.5, %v4592_v23  ;;  %v4593_v34 = vadd.f32 %v4520_v4, %v3370_v55  ;;  %v9431_v4 = vld [vmem:[#allocation52_spill] sm:$0xff] }
 0xdd9   :  { %6805 = vtanh.f32 %v4594_v5  ;;  %v4595_v28 = vmul.f32 0.5, %v4593_v34 }
 0xddb   :  { %6807 = vtanh.f32 %v4595_v28 }
 0xde6   :  { %v6806_v38 = vpop.eup %6805 }
 0xde7   :  { %v4598_v50 = vmul.f32 0.5, %v6806_v38  ;;  %v9430_v38 = vld [vmem:[#allocation51_spill] sm:$0xff] }
 0xde8   :  { %v6808_v23 = vpop.eup %6807 }
 0xde9   :  { %v4600_v35 = vadd.f32 0.5, %v4598_v50  ;;  %v4599_v24 = vmul.f32 0.5, %v6808_v23  ;;  %v9429_v50 = vld [vmem:[#allocation57_spill] sm:$0xff] }
 0xdeb   :  { %v4602_v33 = vmul.f32 %v4600_v35, %v4589_v40  ;;  %v4601_v52 = vadd.f32 0.5, %v4599_v24  ;;  %v9437_v40 = vld [vmem:[#allocation19_spill] sm:$0xff]  ;;  %v9438_v35 = vld [vmem:[#allocation49_spill] sm:$0xff] }
 0xded   :  { %v4603_v21 = vadd.f32 %v4602_v33, %v3437_v18  ;;  %v4605_v53 = vsub.f32 1.0, %v4601_v52  ;;  %v4607_v28 = vmul.f32 %v4601_v52, %v8786_v7  ;;  %v9428_v7 = vld [vmem:[#allocation50_spill] sm:$0xff]  ;;  %v9435_v18 = vld [vmem:[#allocation40_spill] sm:$0xff]  ;;  %v9439_v33 = vld [vmem:[#allocation37_spill] sm:$0xff] }
 0xdee   :  { %v9440_v52 = vld [vmem:[#allocation55_spill] sm:$0xff] }
 0xdef   :  { %6809 = vtanh.f32 %v4603_v21  ;;  %v4666_v21 = vrot.slane %v4661_v61, %v9439_v33  ;;  %v4674_v33 = vrot.slane %v4661_v61, %v7506_v30 }
 0xdfc   :  { %v6810_v5 = vpop.eup %6809 }
 0xdfd   :  { %v4606_v55 = vmul.f32 %v6810_v5, %v4605_v53  ;;  %v3372_v53 = vadd.f32 %v9440_v52, %v9378_v63 }
 0xdff   :  { %v8874_v34 = vadd.f32 %v4607_v28, %v4606_v55  ;;  %v9441_v55 = vld [vmem:[#allocation38_spill] sm:$0xff] }
 0xe00   :  { %v4670_v28 = vrot.slane %v4661_v61, %v9441_v55 }
 0xe01   :  { %4609 = vst [vmem:[%s9111_s12 + $0x20] sm:$0xff] %v8874_v34  ;;  %4743 = vmatmul.mubr.f32.vlgmr.msra.gmra.mxu1 %v8874_v34  ;;  %6480 = vmatmul.mubr.f32.vlgmr.msra.gmra.mxu0 %v8874_v34 }
 0xe02   :  { %4906 = vmatpush1.msra.mxu1 %v8615_v9  ;;  %6483 = vmatpush3.msra.mxu0 %v8617_v60 }
 0xe03   :  { %4907 = vmatprep.subr.mxu1 %v8621_v10  ;;  %6484 = vmatprep.subr.mxu0 %v9249_v39 }
 0xe04   :  { %4908 = vmatpush1.msra.mxu1 %v8625_v8  ;;  %6485 = vmatpush3.msra.mxu0 %v8627_v29 }
 0xe05   :  { %4909 = vmatprep.subr.mxu1 %v8631_v12  ;;  %6486 = vmatprep.subr.mxu0 %v9249_v39 }
 0xe06   :  { %4910 = vmatpush1.msra.mxu1 %v8635_v16  ;;  %6487 = vmatpush3.msra.mxu0 %v8637_v17 }
 0xe07   :  { %4911 = vmatprep.subr.mxu1 %v8641_v41  ;;  %6488 = vmatprep.subr.mxu0 %v9249_v39 }
 0xe08   :  { %4912 = vmatpush1.msra.mxu1 %v8645_v11  ;;  %6489 = vmatpush3.msra.mxu0 %v8647_v2 }
 0xe09   :  { %4913 = vmatprep.subr.mxu1 %v8651_v6  ;;  %6490 = vmatprep.subr.mxu0 %v9249_v39 }
 0xe0a   :  { %4914 = vmatpush1.msra.mxu1 %v8655_v22  ;;  %6491 = vmatpush3.msra.mxu0 %v8657_v48 }
 0xe0b   :  { %4915 = vmatprep.subr.mxu1 %v8661_v57  ;;  %6492 = vmatprep.subr.mxu0 %v9249_v39 }
 0xe0c   :  { %4916 = vmatpush1.msra.mxu1 %v8665_v1  ;;  %6493 = vmatpush3.msra.mxu0 %v8667_v43 }
 0xe0d   :  { %4917 = vmatprep.subr.mxu1 %v8671_v31  ;;  %6494 = vmatprep.subr.mxu0 %v9249_v39 }
 0xe0e   :  { %4918 = vmatpush1.msra.mxu1 %v8675_v19  ;;  %6495 = vmatpush3.msra.mxu0 %v8677_v20 }
 0xe0f   :  { %4919 = vmatprep.subr.mxu1 %v8681_v37  ;;  %6496 = vmatprep.subr.mxu0 %v9249_v39 }
 0xe10   :  { %4920 = vmatpush1.msra.mxu1 %v8683_v32  ;;  %6497 = vmatpush3.msra.mxu0 %v8685_v51 }
 0xe11   :  { %4921 = vmatprep.subr.mxu1 %v8689_v49  ;;  %6498 = vmatprep.subr.mxu0 %v9249_v39 }
 0xe12   :  { %4922 = vmatpush1.msra.mxu1 %v8691_v36  ;;  %6499 = vmatpush3.msra.mxu0 %v8693_v42 }
 0xe13   :  { %4923 = vmatprep.subr.mxu1 %v8697_v46  ;;  %6500 = vmatprep.subr.mxu0 %v9249_v39 }
 0xe14   :  { %4924 = vmatpush1.msra.mxu1 %v8701_v44  ;;  %6501 = vmatpush3.msra.mxu0 %v8703_v26 }
 0xe15   :  { %4925 = vmatprep.subr.mxu1 %v8707_v56  ;;  %6502 = vmatprep.subr.mxu0 %v9249_v39 }
 0xe16   :  { %4926 = vmatpush1.msra.mxu1 %v8711_v25  ;;  %6503 = vmatpush3.msra.mxu0 %v8713_v27 }
 0xe17   :  { %4927 = vmatprep.subr.mxu1 %v8717_v58  ;;  %6504 = vmatprep.subr.mxu0 %v9249_v39 }
 0xe18   :  { %4928 = vmatpush1.msra.mxu1 %v8721_v59  ;;  %6505 = vmatpush3.msra.mxu0 %v8723_v0 }
 0xe19   :  { %4929 = vmatprep.subr.mxu1 %v8727_v54  ;;  %6506 = vmatprep.subr.mxu0 %v9249_v39 }
 0xe1a   :  { %4930 = vmatpush1.msra.mxu1 %v8731_v45  ;;  %6507 = vmatpush3.msra.mxu0 %v9428_v7 }
 0xe1b   :  { %4931 = vmatprep.subr.mxu1 %v9429_v50  ;;  %6508 = vmatprep.subr.mxu0 %v9249_v39 }
 0xe1c   :  { %4932 = vmatpush1.msra.mxu1 %v9430_v38  ;;  %6509 = vmatpush3.msra.mxu0 %v9431_v4 }
 0xe1d   :  { %4933 = vmatprep.subr.mxu1 %v9432_v14  ;;  %6510 = vmatprep.subr.mxu0 %v9249_v39 }
 0xe1e   :  { %4934 = vmatpush1.msra.mxu1 %v9433_v3  ;;  %6511 = vmatpush3.msra.mxu0 %v9434_v62  ;;  %v9442_v3 = vld [vmem:[#allocation18_spill] sm:$0xff] }
 0xe1f   :  { %4935 = vmatprep.subr.mxu1 %v9435_v18  ;;  %6512 = vmatprep.subr.mxu0 %v9249_v39  ;;  %v3374_v14 = vadd.f32 %v9442_v3, %v8418_v13 }
 0xe20   :  { %4936 = vmatpush1.msra.mxu1 %v9436_v47  ;;  %4969 = vmatprep.mubr.f32.mxu1 %v9249_v39 }
 0xe21   :  { %6513 = vmatpush3.msra.mxu0 %v9437_v40  ;;  %6514 = vmatprep.mubr.msk.f32.mxu0 %vm6972_vm8, %v9249_v39 }
 0xe22   :  { %5132 = vmatprep.subr.mxu1 %v9438_v35  ;;  %6517 = vmatprep.subr.mxu0 %v9249_v39 }
 0xec1   :  { %v4744_v23 = vpop.f32.mrf.mxu1  ;;  %v4815_v24 = vpop.f32.mrf.mxu0 }
 0xec2   :  { %v4745_v5 = vadd.f32 %v4744_v23, %v4666_v21  ;;  %v4816_v52 = vadd.f32 %v4815_v24, %v4674_v33  ;;  %v9443_v23 = vld [vmem:[#allocation56_spill] sm:$0xff] }
 0xec3   :  { %v4746_v40 = vpop.f32.mrf.mxu1  ;;  %v6481_v47 = vpop.f32.mrf.mxu0  ;;  %v3440_v55 = vadd.f32 %v9443_v23, %v8423_v15  ;;  %v5305_v23 = vld [vmem:[#allocation12 + $0x68] sm:$0xff] }
 0xec4   :  { %v4819_v18 = vadd.f32 %v4745_v5, %v3372_v53  ;;  %v4747_v62 = vadd.f32 %v4746_v40, %v4670_v28 }
 0xec6   :  { %v4821_v35 = vmul.f32 0.5, %v4819_v18  ;;  %v4820_v4 = vadd.f32 %v4747_v62, %v3374_v14 }
 0xec8   :  { %6811 = vtanh.f32 %v4821_v35  ;;  %v4822_v38 = vmul.f32 0.5, %v4820_v4 }
 0xeca   :  { %6813 = vtanh.f32 %v4822_v38 }
 0xed5   :  { %v6812_v50 = vpop.eup %6811 }
 0xed6   :  { %v4825_v7 = vmul.f32 0.5, %v6812_v50 }
 0xed7   :  { %v6814_v18 = vpop.eup %6813 }
 0xed8   :  { %v4827_v21 = vadd.f32 0.5, %v4825_v7  ;;  %v4826_v40 = vmul.f32 0.5, %v6814_v18  ;;  %v5302_v18 = vld [vmem:[#allocation12 + $0x50] sm:$0xff] }
 0xeda   :  { %v4829_v47 = vmul.f32 %v4827_v21, %v4816_v52  ;;  %v4828_v5 = vadd.f32 0.5, %v4826_v40  ;;  %v5307_v52 = vld [vmem:[#allocation12 + $0x78] sm:$0xff]  ;;  %v5306_v21 = vld [vmem:[#allocation12 + $0x70] sm:$0xff]  ;;  %v5301_v40 = vld [vmem:[#allocation12 + $0x48] sm:$0xff] }
 0xedc   :  { %v4830_v53 = vadd.f32 %v4829_v47, %v3440_v55  ;;  %v4832_v3 = vsub.f32 1.0, %v4828_v5  ;;  %v4834_v38 = vmul.f32 %v4828_v5, %v8874_v34  ;;  %v5304_v47 = vld [vmem:[#allocation12 + $0x60] sm:$0xff] }
 0xedd   :  { %v5300_v5 = vld [vmem:[#allocation12 + $0x40] sm:$0xff] }
 0xede   :  { %6815 = vtanh.f32 %v4830_v53  ;;  %v5303_v53 = vld [vmem:[#allocation12 + $0x58] sm:$0xff] }
 0xeeb   :  { %v6816_v28 = vpop.eup %6815 }
 0xeec   :  { %v4833_v14 = vmul.f32 %v6816_v28, %v4832_v3  ;;  %v5299_v3 = vld [vmem:[#allocation12 + $0x38] sm:$0xff]  ;;  %v5298_v28 = vld [vmem:[#allocation12 + $0x30] sm:$0xff] }
 0xeee   :  { %v8962_v4 = vadd.f32 %v4834_v38, %v4833_v14  ;;  %v5297_v14 = vld [vmem:[#allocation12 + $0x28] sm:$0xff]  ;;  %v5296_v38 = vld [vmem:[#allocation12 + $0x20] sm:$0xff] }
 0xef0   :  { %4836 = vst [vmem:[%s9111_s12 + $0x28] sm:$0xff] %v8962_v4  ;;  %4970 = vmatmul.mubr.f32.vlgmr.msra.gmra.mxu1 %v8962_v4  ;;  %6515 = vmatmul.mubr.f32.vlgmr.msra.gmra.mxu0 %v8962_v4 }
 0xef1   :  { %5133 = vmatpush1.msra.mxu1 %v8615_v9  ;;  %6518 = vmatpush3.msra.mxu0 %v8617_v60  ;;  %v9444_v9 = vld [vmem:[#allocation50_spill] sm:$0xff]  ;;  %v9445_v60 = vld [vmem:[#allocation57_spill] sm:$0xff] }
 0xef2   :  { %5134 = vmatprep.subr.mxu1 %v8621_v10  ;;  %6519 = vmatprep.subr.mxu0 %v9249_v39  ;;  %v9446_v10 = vld [vmem:[#allocation51_spill] sm:$0xff] }
 0xef3   :  { %5135 = vmatpush1.msra.mxu1 %v8625_v8  ;;  %6520 = vmatpush3.msra.mxu0 %v8627_v29  ;;  %v9447_v8 = vld [vmem:[#allocation52_spill] sm:$0xff]  ;;  %v9448_v29 = vld [vmem:[#allocation58_spill] sm:$0xff] }
 0xef4   :  { %5136 = vmatprep.subr.mxu1 %v8631_v12  ;;  %6521 = vmatprep.subr.mxu0 %v9249_v39  ;;  %v9449_v12 = vld [vmem:[#allocation33_spill] sm:$0xff] }
 0xef5   :  { %5137 = vmatpush1.msra.mxu1 %v8635_v16  ;;  %6522 = vmatpush3.msra.mxu0 %v8637_v17  ;;  %v9450_v16 = vld [vmem:[#allocation47_spill] sm:$0xff]  ;;  %v9451_v17 = vld [vmem:[#allocation40_spill] sm:$0xff] }
 0xef6   :  { %5138 = vmatprep.subr.mxu1 %v8641_v41  ;;  %6523 = vmatprep.subr.mxu0 %v9249_v39  ;;  %v9452_v41 = vld [vmem:[#allocation53_spill] sm:$0xff] }
 0xef7   :  { %5139 = vmatpush1.msra.mxu1 %v8645_v11  ;;  %6524 = vmatpush3.msra.mxu0 %v8647_v2  ;;  %v9453_v11 = vld [vmem:[#allocation19_spill] sm:$0xff]  ;;  %v4888_v2 = vld [vmem:[%s9108_s9] sm:$0x7] }
 0xef8   :  { %5140 = vmatprep.subr.mxu1 %v8651_v6  ;;  %6525 = vmatprep.subr.mxu0 %v9249_v39  ;;  %v9454_v6 = vld [vmem:[#allocation37_spill] sm:$0xff] }
 0xef9   :  { %5141 = vmatpush1.msra.mxu1 %v8655_v22  ;;  %6526 = vmatpush3.msra.mxu0 %v8657_v48  ;;  %v4893_v22 = vrot.slane %v4888_v2, %v9454_v6 }
 0xefa   :  { %5142 = vmatprep.subr.mxu1 %v8661_v57  ;;  %6527 = vmatprep.subr.mxu0 %v9249_v39 }
 0xefb   :  { %5143 = vmatpush1.msra.mxu1 %v8665_v1  ;;  %6528 = vmatpush3.msra.mxu0 %v8667_v43  ;;  %v9455_v1 = vld [vmem:[#allocation31_spill] sm:$0xff] }
 0xefc   :  { %5144 = vmatprep.subr.mxu1 %v8671_v31  ;;  %6529 = vmatprep.subr.mxu0 %v9249_v39  ;;  %v3378_v43 = vadd.f32 %v9455_v1, %v9378_v63 }
 0xefd   :  { %5145 = vmatpush1.msra.mxu1 %v8675_v19  ;;  %6530 = vmatpush3.msra.mxu0 %v8677_v20  ;;  %v9456_v19 = vld [vmem:[#allocation38_spill] sm:$0xff] }
 0xefe   :  { %5146 = vmatprep.subr.mxu1 %v8681_v37  ;;  %6531 = vmatprep.subr.mxu0 %v9249_v39  ;;  %v4897_v20 = vrot.slane %v4888_v2, %v9456_v19 }
 0xeff   :  { %5147 = vmatpush1.msra.mxu1 %v8683_v32  ;;  %6532 = vmatpush3.msra.mxu0 %v8685_v51 }
 0xf00   :  { %5148 = vmatprep.subr.mxu1 %v8689_v49  ;;  %6533 = vmatprep.subr.mxu0 %v9249_v39 }
 0xf01   :  { %5149 = vmatpush1.msra.mxu1 %v8691_v36  ;;  %6534 = vmatpush3.msra.mxu0 %v8693_v42  ;;  %v9457_v42 = vld [vmem:[#allocation20_spill] sm:$0xff] }
 0xf02   :  { %5150 = vmatprep.subr.mxu1 %v8697_v46  ;;  %6535 = vmatprep.subr.mxu0 %v9249_v39  ;;  %v3380_v46 = vadd.f32 %v9457_v42, %v8418_v13 }
 0xf03   :  { %5151 = vmatpush1.msra.mxu1 %v8701_v44  ;;  %6536 = vmatpush3.msra.mxu0 %v8703_v26 }
 0xf04   :  { %5152 = vmatprep.subr.mxu1 %v8707_v56  ;;  %6537 = vmatprep.subr.mxu0 %v9249_v39  ;;  %v4901_v56 = vrot.slane %v4888_v2, %v7506_v30 }
 0xf05   :  { %5153 = vmatpush1.msra.mxu1 %v8711_v25  ;;  %6538 = vmatpush3.msra.mxu0 %v8713_v27 }
 0xf06   :  { %5154 = vmatprep.subr.mxu1 %v8717_v58  ;;  %6539 = vmatprep.subr.mxu0 %v9249_v39 }
 0xf07   :  { %5155 = vmatpush1.msra.mxu1 %v8721_v59  ;;  %6540 = vmatpush3.msra.mxu0 %v8723_v0  ;;  %v9458_v0 = vld [vmem:[#allocation21_spill] sm:$0xff] }
 0xf08   :  { %5156 = vmatprep.subr.mxu1 %v8727_v54  ;;  %6541 = vmatprep.subr.mxu0 %v9249_v39  ;;  %v3445_v54 = vadd.f32 %v9458_v0, %v8423_v15 }
 0xf09   :  { %5157 = vmatpush1.msra.mxu1 %v8731_v45  ;;  %6542 = vmatpush3.msra.mxu0 %v9444_v9  ;;  %v5294_v9 = vld [vmem:[#allocation12 + $0x10] sm:$0xff] }
 0xf0a   :  { %5158 = vmatprep.subr.mxu1 %v9445_v60  ;;  %6543 = vmatprep.subr.mxu0 %v9249_v39  ;;  %v5293_v60 = vld [vmem:[#allocation12 + $0x8] sm:$0xff] }
 0xf0b   :  { %5159 = vmatpush1.msra.mxu1 %v9446_v10  ;;  %6544 = vmatpush3.msra.mxu0 %v9447_v8  ;;  %v5292_v10 = vld [vmem:[#allocation12] sm:$0xff] }
 0xf0c   :  { %5160 = vmatprep.subr.mxu1 %v9448_v29  ;;  %6545 = vmatprep.subr.mxu0 %v9249_v39  ;;  %v5115_v8 = vld [vmem:[%s9108_s9] sm:$0x7] }
 0xf0d   :  { %5161 = vmatpush1.msra.mxu1 %v9449_v12  ;;  %6546 = vmatpush3.msra.mxu0 %v9450_v16  ;;  %v5120_v29 = vrot.slane %v5115_v8, %v9454_v6  ;;  %v5124_v2 = vrot.slane %v5115_v8, %v9456_v19  ;;  %v5128_v6 = vrot.slane %v5115_v8, %v7506_v30  ;;  %v9461_v19 = vld [vmem:[#allocation22_spill] sm:$0xff] }
 0xf0e   :  { %5162 = vmatprep.subr.mxu1 %v9451_v17  ;;  %6547 = vmatprep.subr.mxu0 %v9249_v39  ;;  %v9459_v17 = vld [vmem:[#allocation23_spill] sm:$0xff]  ;;  %v5522_v30 = vld [vmem:[%s9110_s11] ss:$0 sm:$0xff] }
 0xf0f   :  { %5163 = vmatpush1.msra.mxu1 %v9452_v41  ;;  %5196 = vmatprep.mubr.f32.mxu1 %v9249_v39  ;;  %v3382_v41 = vadd.f32 %v9459_v17, %v9378_v63 }
 0xf10   :  { %6548 = vmatpush3.msra.mxu0 %v9453_v11  ;;  %6549 = vmatprep.mubr.msk.f32.mxu0 %vm6972_vm8, %v9249_v39 }
 0xf11   :  { %6552 = vmatprep.subr.mxu1 %v9249_v39 }
 0xfb0   :  { %v4971_v48 = vpop.f32.mrf.mxu1  ;;  %v5042_v57 = vpop.f32.mrf.mxu0 }
 0xfb1   :  { %v4972_v31 = vadd.f32 %v4971_v48, %v4893_v22  ;;  %v5043_v58 = vadd.f32 %v5042_v57, %v4901_v56 }
 0xfb2   :  { %v4973_v37 = vpop.f32.mrf.mxu1  ;;  %v6516_v32 = vpop.f32.mrf.mxu0 }
 0xfb3   :  { %v5046_v51 = vadd.f32 %v4972_v31, %v3378_v43  ;;  %v4974_v36 = vadd.f32 %v4973_v37, %v4897_v20  ;;  %v9460_v43 = vld [vmem:[#allocation48_spill] sm:$0xff] }
 0xfb4   :  { %v3384_v31 = vadd.f32 %v9460_v43, %v8418_v13 }
 0xfb5   :  { %v5048_v49 = vmul.f32 0.5, %v5046_v51  ;;  %v5047_v44 = vadd.f32 %v4974_v36, %v3380_v46  ;;  %v3448_v36 = vadd.f32 %v9461_v19, %v8423_v15 }
 0xfb7   :  { %6817 = vtanh.f32 %v5048_v49  ;;  %v5049_v26 = vmul.f32 0.5, %v5047_v44 }
 0xfb9   :  { %6819 = vtanh.f32 %v5049_v26 }
 0xfc4   :  { %v6818_v25 = vpop.eup %6817 }
 0xfc5   :  { %v5052_v27 = vmul.f32 0.5, %v6818_v25 }
 0xfc6   :  { %v6820_v7 = vpop.eup %6819 }
 0xfc7   :  { %v5054_v59 = vadd.f32 0.5, %v5052_v27  ;;  %v5053_v50 = vmul.f32 0.5, %v6820_v7 }
 0xfc9   :  { %v5056_v45 = vmul.f32 %v5054_v59, %v5043_v58  ;;  %v5055_v62 = vadd.f32 0.5, %v5053_v50 }
 0xfcb   :  { %v5057_v34 = vadd.f32 %v5056_v45, %v3445_v54  ;;  %v5059_v61 = vsub.f32 1.0, %v5055_v62  ;;  %v5061_v55 = vmul.f32 %v5055_v62, %v8962_v4  ;;  %v5295_v4 = vld [vmem:[#allocation12 + $0x18] sm:$0xff] }
 0xfcd   :  { %6821 = vtanh.f32 %v5057_v34 }
 0xfda   :  { %v6822_v33 = vpop.eup %6821 }
 0xfdb   :  { %v5060_v24 = vmul.f32 %v6822_v33, %v5059_v61 }
 0xfdd   :  { %v9049_v35 = vadd.f32 %v5061_v55, %v5060_v24 }
 0xfdf   :  { %5063 = vst [vmem:[%s9111_s12 + $0x30] sm:$0xff] %v9049_v35  ;;  %5197 = vmatmul.mubr.f32.vlgmr.msra.gmra.mxu1 %v9049_v35  ;;  %6550 = vmatmul.mubr.f32.vlgmr.msra.gmra.mxu0 %v9049_v35 }
 0xfe0   :  { %6584 = vmatprep.mubr.msk.f32.mxu1 %vm6972_vm8, %v9249_v39  ;;  %6553 = vmatpush3.msra.mxu1 %v5307_v52 }
 0xfe1   :  { %6554 = vmatprep.subr.mxu1 %v9249_v39 }
 0xfe2   :  { %6555 = vmatpush3.msra.mxu1 %v5306_v21 }
 0xfe3   :  { %6556 = vmatprep.subr.mxu1 %v9249_v39 }
 0xfe4   :  { %6557 = vmatpush3.msra.mxu1 %v5305_v23 }
 0xfe5   :  { %6558 = vmatprep.subr.mxu1 %v9249_v39 }
 0xfe6   :  { %6559 = vmatpush3.msra.mxu1 %v5304_v47 }
 0xfe7   :  { %6560 = vmatprep.subr.mxu1 %v9249_v39 }
 0xfe8   :  { %6561 = vmatpush3.msra.mxu1 %v5303_v53 }
 0xfe9   :  { %6562 = vmatprep.subr.mxu1 %v9249_v39 }
 0xfea   :  { %6563 = vmatpush3.msra.mxu1 %v5302_v18 }
 0xfeb   :  { %6564 = vmatprep.subr.mxu1 %v9249_v39 }
 0xfec   :  { %6565 = vmatpush3.msra.mxu1 %v5301_v40 }
 0xfed   :  { %6566 = vmatprep.subr.mxu1 %v9249_v39 }
 0xfee   :  { %6567 = vmatpush3.msra.mxu1 %v5300_v5 }
 0xfef   :  { %6568 = vmatprep.subr.mxu1 %v9249_v39 }
 0xff0   :  { %6569 = vmatpush3.msra.mxu1 %v5299_v3 }
 0xff1   :  { %6570 = vmatprep.subr.mxu1 %v9249_v39 }
 0xff2   :  { %6571 = vmatpush3.msra.mxu1 %v5298_v28 }
 0xff3   :  { %6572 = vmatprep.subr.mxu1 %v9249_v39 }
 0xff4   :  { %6573 = vmatpush3.msra.mxu1 %v5297_v14 }
 0xff5   :  { %6574 = vmatprep.subr.mxu1 %v9249_v39 }
 0xff6   :  { %6575 = vmatpush3.msra.mxu1 %v5296_v38 }
 0xff7   :  { %6576 = vmatprep.subr.mxu1 %v9249_v39 }
 0xff8   :  { %6577 = vmatpush3.msra.mxu1 %v5295_v4 }
 0xff9   :  { %6578 = vmatprep.subr.mxu1 %v9249_v39 }
 0xffa   :  { %6579 = vmatpush3.msra.mxu1 %v5294_v9 }
 0xffb   :  { %6580 = vmatprep.subr.mxu1 %v9249_v39 }
 0xffc   :  { %6581 = vmatpush3.msra.mxu1 %v5293_v60 }
 0xffd   :  { %6582 = vmatprep.subr.mxu1 %v9249_v39 }
 0xffe   :  { %6583 = vmatpush3.msra.mxu1 %v5292_v10 }
0x109f   :  { %v5198_v12 = vpop.f32.mrf.mxu1  ;;  %v5269_v16 = vpop.f32.mrf.mxu0 }
0x10a0   :  { %v5199_v11 = vadd.f32 %v5198_v12, %v5120_v29  ;;  %v5270_v63 = vadd.f32 %v5269_v16, %v5128_v6 }
0x10a1   :  { %v5200_v22 = vpop.f32.mrf.mxu1  ;;  %v6551_v48 = vpop.f32.mrf.mxu0 }
0x10a2   :  { %v5273_v57 = vadd.f32 %v5199_v11, %v3382_v41  ;;  %v5201_v39 = vadd.f32 %v5200_v22, %v5124_v2 }
0x10a4   :  { %v5275_v1 = vmul.f32 0.5, %v5273_v57  ;;  %v5274_v20 = vadd.f32 %v5201_v39, %v3384_v31 }
0x10a6   :  { %6823 = vtanh.f32 %v5275_v1  ;;  %v5276_v37 = vmul.f32 0.5, %v5274_v20 }
0x10a8   :  { %6825 = vtanh.f32 %v5276_v37 }
0x10b3   :  { %v6824_v32 = vpop.eup %6823 }
0x10b4   :  { %v5279_v51 = vmul.f32 0.5, %v6824_v32 }
0x10b5   :  { %v6826_v44 = vpop.eup %6825 }
0x10b6   :  { %v5281_v49 = vadd.f32 0.5, %v5279_v51  ;;  %v5280_v26 = vmul.f32 0.5, %v6826_v44 }
0x10b8   :  { %v5283_v42 = vmul.f32 %v5281_v49, %v5270_v63  ;;  %v5282_v56 = vadd.f32 0.5, %v5280_v26 }
0x10ba   :  { %v5284_v46 = vadd.f32 %v5283_v42, %v3448_v36  ;;  %v5286_v13 = vsub.f32 1.0, %v5282_v56  ;;  %v5288_v58 = vmul.f32 %v5282_v56, %v9049_v35 }
0x10bc   :  { %6827 = vtanh.f32 %v5284_v46 }
0x10c9   :  { %v6828_v25 = vpop.eup %6827 }
0x10ca   :  { %v5287_v27 = vmul.f32 %v6828_v25, %v5286_v13 }
0x10cc   :  { %v5289_v59 = vadd.f32 %v5288_v58, %v5287_v27 }
0x10ce   :  { %5290 = vst [vmem:[%s9111_s12 + $0x38] sm:$0xff] %v5289_v59  ;;  %5291 = vst [vmem:[%s9112_s13] sm:$0xff] %v5289_v59  ;;  %6585 = vmatmul.mubr.f32.vlgmr.msra.gmra.mxu1 %v5289_v59 }
0x118e   :  { %v5381_v15 = vpop.f32.mrf.mxu1 }
0x118f   :  { %v5382_v0 = vadd.f32 %v5522_v30, %v5381_v15 }
0x1190   :  { %v6586_v54 = vpop.f32.mrf.mxu1 }
0x1191   :  { %5385 = vst [vmem:[%s9113_s14] sm:$0xff] %v5382_v0 }
0x1192   :  { %5398 = vsyncpa [#allocation5], 1 }
0x1193   :  { %5399 = vsyncpa [#allocation7], 1 }
0x1194   :  { %5400 = vsyncpa [#allocation10], 1 }
0x1195   :  { %5401 = vsyncpa [#allocation13], 1 }

</bundles_post_ra>
